<compile_context>
chip_gen: v5e
topology: v5e:2x2
jax: 0.10.0
libtpu: 0.0.40
codegen_flags: <defaults>
</compile_context>

<pallas_src>
import math

import jax
import jax.numpy as jnp
from jax.experimental import pallas as pl
from jax.experimental.pallas import tpu as pltpu

_BN_EPS = 1e-5
_LAYER_CFG = [(1, 0), (2, 1), (2, 1), (2, 1), (2, 1)]   # (stride, padding), k=4
_VMEM_LIMIT = 32 * 1024 * 1024   # safe on v5e/v6e/v7x; raise for bigger tiles.

# kh (kernel-row) index that contributes to output-row phase `pr` from input
# row offset `dh`, for ConvTranspose2d(k=4, s=2, p=1):  oh = 2*ih - 1 + kh.
_KH_OF = {(0, -1): 3, (0, 0): 1, (1, 0): 2, (1, 1): 0}


def _num_tensorcores():
    # Only used to decide whether a single-tile grid should be split so both
    # TensorCores of a multi-core part (v7x) get work.  Single-core parts
    # (v5e/v6e) keep the biggest tile (no extra per-step overhead).
    try:
        return max(1, int(getattr(jax.devices()[0], "num_cores", 1) or 1))
    except Exception:
        return 1


_NUM_CORES = _num_tensorcores()


# ----------------------------- tile selection --------------------------------

def _pick_tile(M, target=512, min_steps=1):
    """Largest multiple-of-8 divisor of M that is <= target (else full M)."""
    tm = M
    d = min(target, M)
    while d >= 8:
        if M % d == 0 and d % 8 == 0:
            tm = d
            break
        d -= 8
    # Give each TensorCore at least one block on multi-core parts.
    while min_steps > 1 and (M // tm) < min_steps and tm % 16 == 0:
        tm //= 2
    return tm


def _pick_lane_tile(M, target=512):
    tn = M
    d = min(target, M)
    while d >= 128:
        if M % d == 0 and d % 128 == 0:
            tn = d
            break
        d -= 128
    return tn


# ----------------------------- Pallas kernels ---------------------------------

def _matmul_stats_body(a, w_ref, y_ref, s_ref, q_ref):
    y = jnp.dot(a.astype(jnp.bfloat16), w_ref[...],
                preferred_element_type=jnp.float32)
    y_bf = y.astype(jnp.bfloat16)
    y_ref[...] = y_bf
    # Stats of the bf16-rounded y == exactly what the next layer consumes.
    yr = y_bf.astype(jnp.float32)
    s_ref[0] = jnp.sum(yr, axis=0, keepdims=True)
    q_ref[0] = jnp.sum(yr * yr, axis=0, keepdims=True)


def _matmul_stats_kernel(a_ref, w_ref, y_ref, s_ref, q_ref):
    _matmul_stats_body(a_ref[...], w_ref, y_ref, s_ref, q_ref)


def _bnrelu_matmul_stats_kernel(a_ref, w_ref, scale_ref, shift_ref,
                                y_ref, s_ref, q_ref):
    # Fused training-mode BN + ReLU of the *previous* layer, applied to the
    # im2col'd pre-BN activation (scale/shift tiled per tap; spatially padded
    # taps hold the per-channel neutral value and land exactly on 0 here).
    a = a_ref[...].astype(jnp.float32)
    a = jnp.maximum(a * scale_ref[...] + shift_ref[...], 0.0)
    _matmul_stats_body(a, w_ref, y_ref, s_ref, q_ref)


def pallas_matmul_stats(A, Wm, scale_in=None, shift_in=None, *, tm):
    """y = act(A) @ Wm with fused per-column row-sum / row-sumsq outputs.

    A:(M,K) bf16, Wm:(K,Nc) bf16 -> y:(M,Nc) bf16, s,q:(Mt,1,Nc) f32.
    If scale_in/shift_in are given, act(a) = relu(a*scale + shift) (BN fusion).
    """
    M, K = A.shape
    Nc = Wm.shape[1]
    Mt = M // tm
    in_specs = [pl.BlockSpec((tm, K), lambda i: (i, 0)),
                pl.BlockSpec((K, Nc), lambda i: (0, 0))]
    operands = [A, Wm]
    if scale_in is None:
        kernel = _matmul_stats_kernel
    else:
        kernel = _bnrelu_matmul_stats_kernel
        in_specs += [pl.BlockSpec((1, K), lambda i: (0, 0)),
                     pl.BlockSpec((1, K), lambda i: (0, 0))]
        operands += [scale_in.reshape(1, K).astype(jnp.float32),
                     shift_in.reshape(1, K).astype(jnp.float32)]
    return pl.pallas_call(
        kernel,
        out_shape=(jax.ShapeDtypeStruct((M, Nc), jnp.bfloat16),
                   jax.ShapeDtypeStruct((Mt, 1, Nc), jnp.float32),
                   jax.ShapeDtypeStruct((Mt, 1, Nc), jnp.float32)),
        grid=(Mt,),
        in_specs=in_specs,
        out_specs=(pl.BlockSpec((tm, Nc), lambda i: (i, 0)),
                   pl.BlockSpec((1, 1, Nc), lambda i: (i, 0, 0)),
                   pl.BlockSpec((1, 1, Nc), lambda i: (i, 0, 0))),
        compiler_params=pltpu.CompilerParams(
            dimension_semantics=("parallel",),
            vmem_limit_bytes=_VMEM_LIMIT),
    )(*operands)


def _last_layer_kernel(w_ref, a_ref, scale_ref, shift_ref, bias_ref, o_ref):
    a = a_ref[...].astype(jnp.float32)
    a = jnp.maximum(a * scale_ref[...] + shift_ref[...], 0.0)  # fused BN3+ReLU
    y = jnp.dot(w_ref[...], a.astype(jnp.bfloat16),
                preferred_element_type=jnp.float32)
    o_ref[...] = jnp.tanh(y + bias_ref[0, 0])


def pallas_last_layer(WT, AT, scale_col, shift_col, bias, *, tn):
    """WT:(8,K) bf16 (phase kernels in rows 0-3), AT:(K,M) bf16 -> (8,M) f32."""
    R, K = WT.shape
    M = AT.shape[1]
    bias_arr = jnp.asarray(bias, jnp.float32).reshape(1, 1)
    return pl.pallas_call(
        _last_layer_kernel,
        out_shape=jax.ShapeDtypeStruct((R, M), jnp.float32),
        grid=(M // tn,),
        in_specs=[
            pl.BlockSpec((R, K), lambda j: (0, 0)),
            pl.BlockSpec((K, tn), lambda j: (0, j)),
            pl.BlockSpec((K, 1), lambda j: (0, 0)),
            pl.BlockSpec((K, 1), lambda j: (0, 0)),
            pl.BlockSpec(memory_space=pltpu.MemorySpace.SMEM),
        ],
        out_specs=pl.BlockSpec((R, tn), lambda j: (0, j)),
        compiler_params=pltpu.CompilerParams(
            dimension_semantics=("parallel",),
            vmem_limit_bytes=_VMEM_LIMIT),
    )(WT, AT, scale_col.astype(jnp.float32), shift_col.astype(jnp.float32),
      bias_arr)


# ------------------ phase-merged deconv lowering (JAX glue) -------------------

def _merged_weight(w_pt):
    """(Cin,Cout,4,4) -> (9*Cin, 4*Cout) for phase-merged k=4,s=2,p=1 deconv.

    Rows: tap t = (dh+1)*3 + (dw+1) over the 3x3 input window, channel-minor.
    Cols: phase p = pr*2 + pc, channel-minor.  Unused taps per phase are 0."""
    cin, cout = w_pt.shape[:2]
    zero = jnp.zeros((cin, cout), w_pt.dtype)
    cols = []
    for pr in range(2):
        for pc in range(2):
            taps = []
            for dh in (-1, 0, 1):
                for dw in (-1, 0, 1):
                    kh = _KH_OF.get((pr, dh))
                    kw = _KH_OF.get((pc, dw))
                    taps.append(zero if kh is None or kw is None
                                else w_pt[:, :, kh, kw])
            cols.append(jnp.concatenate(taps, axis=0))    # (9*Cin, Cout)
    return jnp.concatenate(cols, axis=1)                  # (9*Cin, 4*Cout)


def _merged_weight_lastT(w_pt, rows=8):
    """Transposed last-layer (Cout=1) weights: (rows, 9*Cin), phases in rows 0-3."""
    wm = _merged_weight(w_pt)                             # (9*Cin, 4)
    wt = wm.T                                             # (4, 9*Cin)
    return jnp.concatenate(
        [wt, jnp.zeros((rows - 4, wt.shape[1]), wt.dtype)], axis=0)


def _im2col3(xp):
    """xp:(N,H+2,W+2,C) padded -> A:(N*H*W, 9*C); columns ordered (tap, c)."""
    N, Hp, Wp, C = xp.shape
    H, W = Hp - 2, Wp - 2
    taps = [xp[:, 1 + dh:1 + dh + H, 1 + dw:1 + dw + W, :]
            for dh in (-1, 0, 1) for dw in (-1, 0, 1)]
    return jnp.stack(taps, axis=3).reshape(N * H * W, 9 * C)


def _im2col3_T(xp):
    """xp:(N,H+2,W+2,C) padded -> AT:(9*C, N*H*W); rows ordered (tap, c)."""
    N, Hp, Wp, C = xp.shape
    H, W = Hp - 2, Wp - 2
    taps = [xp[:, 1 + dh:1 + dh + H, 1 + dw:1 + dw + W, :]
            for dh in (-1, 0, 1) for dw in (-1, 0, 1)]
    a = jnp.transpose(jnp.stack(taps, axis=0), (0, 4, 1, 2, 3))   # (9,C,N,H,W)
    return a.reshape(9 * C, N * H * W)


def _pad_prebn(x, pad_val):
    """Spatially pad the pre-BN activation with the per-channel neutral value
    (relu(pad*scale+shift) == 0) so fused BN+ReLU treats padded taps as zero."""
    yp = jnp.pad(x, ((0, 0), (1, 1), (1, 1), (0, 0)))
    pv = pad_val.astype(x.dtype)
    yp = yp.at[:, 0, :, :].set(pv)
    yp = yp.at[:, -1, :, :].set(pv)
    yp = yp.at[:, :, 0, :].set(pv)
    yp = yp.at[:, :, -1, :].set(pv)
    return yp


def _bn_fold(s_tiles, q_tiles, n_groups, cout, m_total, gamma, beta):
    """Fold fused per-tile row sums into BN scale/shift + neutral pad value."""
    s = jnp.sum(s_tiles.reshape(-1, n_groups, cout), axis=(0, 1))
    q = jnp.sum(q_tiles.reshape(-1, n_groups, cout), axis=(0, 1))
    mean = s / m_total
    # TODO(synk): E[y^2]-mean^2 cancels badly if |mean| >> std at very large
    #             batch*spatial sizes; switch to a shifted/Welford accumulation.
    var = jnp.maximum(q / m_total - mean * mean, 0.0)     # biased, PyTorch train BN
    scale = gamma * jax.lax.rsqrt(var + _BN_EPS)
    shift = beta - mean * scale
    # Neutral padding value: relu(v*scale + shift) == 0 exactly even after the
    # bf16 rounding of v (guard term).  Degenerate only if gamma == 0.
    guard = jnp.abs(shift) * 0.05 + 1e-3
    safe_scale = jnp.where(jnp.abs(scale) < 1e-12, jnp.float32(1e-12), scale)
    pad_val = -(shift + guard) / safe_scale
    return scale, shift, pad_val


# -------------------------------- Generator -----------------------------------

def init_generator_params(key, z_dim, img_size):
    chans = [z_dim, img_size * 8, img_size * 4, img_size * 2, img_size, 1]
    params = {}
    for i in range(5):
        cin, cout = chans[i], chans[i + 1]
        key, kw, kb = jax.random.split(key, 3)
        bound = 1.0 / math.sqrt(cin * 4 * 4)
        params[f"w{i}"] = jax.random.uniform(kw, (cin, cout, 4, 4), jnp.float32,
                                             -bound, bound)
        params[f"b{i}"] = jax.random.uniform(kb, (cout,), jnp.float32,
                                             -bound, bound)
        if i < 4:
            params[f"gamma{i}"] = jnp.ones((cout,), jnp.float32)
            params[f"beta{i}"] = jnp.zeros((cout,), jnp.float32)
    return params


@jax.jit
def generator_forward(x_nchw, params):
    """Matches Generator.forward (training-mode BatchNorm, i.e. batch stats)."""
    N, zdim = x_nchw.shape[0], x_nchw.shape[1]
    z = x_nchw.reshape(N, zdim).astype(jnp.bfloat16)      # latent, 1x1 spatial

    # ---- Layer 0: k=4, s=1 deconv of a 1x1 input == one lane-dense matmul.
    #      (conv bias omitted: cancelled exactly by training-mode BN.)
    w0 = params["w0"]
    c0 = w0.shape[1]
    W0m = jnp.transpose(w0, (0, 2, 3, 1)).reshape(zdim, 16 * c0)
    y, s, q = pallas_matmul_stats(z, W0m.astype(jnp.bfloat16),
                                  tm=_pick_tile(N, min_steps=_NUM_CORES))
    scale, shift, pad_val = _bn_fold(s, q, 16, c0, N * 16.0,
                                     params["gamma0"], params["beta0"])
    x = y.reshape(N, 4, 4, c0)                            # pre-BN, bf16, NHWC
    H = W = 4

    # ---- Layers 1-3: phase-merged stride-2 deconv; previous layer's BN+ReLU
    #      is fused into the matmul prologue.
    for li in range(1, 4):
        w = params[f"w{li}"]
        cout = w.shape[1]
        A = _im2col3(_pad_prebn(x, pad_val))              # (N*H*W, 9*Cin) bf16
        Wm = _merged_weight(w).astype(jnp.bfloat16)       # (9*Cin, 4*Cout)
        M = N * H * W
        y, s, q = pallas_matmul_stats(
            A, Wm, jnp.tile(scale, 9), jnp.tile(shift, 9),
            tm=_pick_tile(M, min_steps=_NUM_CORES))
        scale, shift, pad_val = _bn_fold(s, q, 4, cout, 4.0 * M,
                                         params[f"gamma{li}"],
                                         params[f"beta{li}"])
        # Interleave the 4 phases back to NHWC for the next layer's 3x3 window.
        # TODO(synk): carry the phase-separated layout between layers and build
        #             taps in-kernel from halo blocks to drop this transpose and
        #             the 9x im2col materialization.
        x = jnp.transpose(y.reshape(N, H, W, 2, 2, cout),
                          (0, 1, 3, 2, 4, 5)).reshape(N, 2 * H, 2 * W, cout)
        H, W = 2 * H, 2 * W

    # ---- Layer 4: phase-merged deconv (Cout=1) + bias + Tanh, transposed so
    #      the output block is lane-dense; one pass over AT, 4 useful rows of 8.
    AT = _im2col3_T(_pad_prebn(x, pad_val))               # (9*Cin, N*H*W) bf16
    WT = _merged_weight_lastT(params["w4"]).astype(jnp.bfloat16)   # (8, 9*Cin)
    M = N * H * W
    out8 = pallas_last_layer(WT, AT,
                             jnp.tile(scale, 9).reshape(-1, 1),
                             jnp.tile(shift, 9).reshape(-1, 1),
                             params["b4"], tn=_pick_lane_tile(M))   # (8, M) f32
    out4 = out8[:4].reshape(2, 2, N, H, W)                # (pr, pc, n, h, w)
    img = jnp.transpose(out4, (2, 3, 0, 4, 1)).reshape(N, 2 * H, 2 * W)
    return img[:, None, :, :]                             # NCHW (N, 1, 2H, 2W)


# --------------------------- pure-JAX f32 reference ---------------------------

def _conv_transpose_ref(x, w, b, stride, padding):
    """PyTorch ConvTranspose2d (NCHW, weight (Cin,Cout,kh,kw)) in f32."""
    k = w.shape[2]
    wf = jnp.transpose(w[:, :, ::-1, ::-1], (1, 0, 2, 3))  # (Cout,Cin,kh,kw)
    pad = k - 1 - padding
    y = jax.lax.conv_general_dilated(
        x, wf, window_strides=(1, 1), padding=((pad, pad), (pad, pad)),
        lhs_dilation=(stride, stride),
        dimension_numbers=("NCHW", "OIHW", "NCHW"),
        precision=jax.lax.Precision.HIGHEST)
    return y + b.reshape(1, -1, 1, 1)


@jax.jit
def reference_forward(x_nchw, params):
    x = x_nchw.astype(jnp.float32)
    for i in range(4):
        stride, padding = _LAYER_CFG[i]
        y = _conv_transpose_ref(x, params[f"w{i}"], params[f"b{i}"],
                                stride, padding)
        mean = jnp.mean(y, axis=(0, 2, 3), keepdims=True)
        var = jnp.mean(jnp.square(y - mean), axis=(0, 2, 3), keepdims=True)
        g = params[f"gamma{i}"].reshape(1, -1, 1, 1)
        bt = params[f"beta{i}"].reshape(1, -1, 1, 1)
        x = jnp.maximum((y - mean) * jax.lax.rsqrt(var + _BN_EPS) * g + bt, 0.0)
    stride, padding = _LAYER_CFG[4]
    y = _conv_transpose_ref(x, params["w4"], params["b4"], stride, padding)
    return jnp.tanh(y)


# ------------------------------------ main ------------------------------------

if __name__ == "__main__":
    batch, z_dim, img_size = 2, 8, 8
    key = jax.random.PRNGKey(0)
    k_param, k_input = jax.random.split(key)

    params = init_generator_params(k_param, z_dim, img_size)
    # DCGAN generator input: latent noise of shape (N, z_dim, 1, 1), NCHW.
    x = jax.random.normal(k_input, (batch, z_dim, 1, 1), jnp.float32)

    out = jax.block_until_ready(generator_forward(x, params))

    expected_shape = (batch, 1, 64, 64)   # 1 -> 4 -> 8 -> 16 -> 32 -> 64
    assert out.shape == expected_shape, (out.shape, expected_shape)
    assert bool(jnp.all(jnp.isfinite(out)))
    assert bool(jnp.all(jnp.abs(out) <= 1.0 + 1e-6))      # tanh output range

    # Numerical check against a pure-JAX f32 reference of the PyTorch module
    # (ConvTranspose2d + training-mode BatchNorm + ReLU / Tanh); the kernel
    # path stores activations in bf16, hence the tolerance.
    ref = jax.block_until_ready(reference_forward(x, params))
    max_err = float(jnp.max(jnp.abs(out - ref)))
    assert max_err < 0.1, f"mismatch vs reference: max abs err {max_err}"

    print("KERNEL_OK")
</pallas_src>

<mosaic_0001>
module attributes {stable_mosaic.version = 11 : i64} {
  func.func @_matmul_stats_kernel(%arg0: i32, %arg1: memref<2x8xbf16, #tpu.memory_space<vmem>>, %arg2: memref<8x1024xbf16, #tpu.memory_space<vmem>>, %arg3: memref<2x1024xbf16, #tpu.memory_space<vmem>>, %arg4: memref<1x1x1024xf32, #tpu.memory_space<vmem>>, %arg5: memref<1x1x1024xf32, #tpu.memory_space<vmem>>) attributes {dimension_semantics = [#tpu.dimension_semantics<parallel>], iteration_bounds = array<i64: 1>, scalar_prefetch = 0 : i64, scratch_operands = 0 : i64, tpu.core_type = #tpu.core_type<tc>, window_params = [{transform_indices = @transform_0, window_bounds = array<i64: 2, 8>}, {pipeline_mode = #tpu.pipeline_mode<synchronous>, transform_indices = @transform_1, window_bounds = array<i64: 8, 1024>}, {transform_indices = @transform_2, window_bounds = array<i64: 2, 1024>}, {transform_indices = @transform_3, window_bounds = array<i64: 1, 1, 1024>}, {transform_indices = @transform_4, window_bounds = array<i64: 1, 1, 1024>}]} {
    %c0 = arith.constant 0 : index
    %c0_0 = arith.constant 0 : index
    %0 = vector.load %arg1[%c0, %c0_0] : memref<2x8xbf16, #tpu.memory_space<vmem>>, vector<2x8xbf16>
    %c0_1 = arith.constant 0 : index
    %c0_2 = arith.constant 0 : index
    %1 = vector.load %arg2[%c0_1, %c0_2] : memref<8x1024xbf16, #tpu.memory_space<vmem>>, vector<8x1024xbf16>
    %cst = arith.constant dense<0.000000e+00> : vector<2x1024xf32>
    %2 = tpu.matmul %0, %1, %cst {dimension_numbers = #tpu.dot_dimension_numbers<[1], [0], [0], [1], [0, 0, 1, 1], [], []>} : vector<2x8xbf16>, vector<8x1024xbf16>, vector<2x1024xf32> -> vector<2x1024xf32>
    %3 = arith.truncf %2 : vector<2x1024xf32> to vector<2x1024xbf16>
    %c0_3 = arith.constant 0 : index
    %c0_4 = arith.constant 0 : index
    %4 = vector.load %arg3[%c0_3, %c0_4] : memref<2x1024xbf16, #tpu.memory_space<vmem>>, vector<2x1024xbf16>
    tpu.vector_store %arg3[%c0_3, %c0_4], %3 {strides = array<i32>} : memref<2x1024xbf16, #tpu.memory_space<vmem>>, vector<2x1024xbf16>,
    %5 = arith.extf %3 : vector<2x1024xbf16> to vector<2x1024xf32>
    %cst_5 = arith.constant dense<0.000000e+00> : vector<1024xf32>
    %6 = vector.multi_reduction <add>, %5, %cst_5 [0] : vector<2x1024xf32> to vector<1024xf32>
    %7 = vector.shape_cast %6 : vector<1024xf32> to vector<1x1024xf32>
    %c0_6 = arith.constant 0 : index
    %c0_7 = arith.constant 0 : index
    %c0_8 = arith.constant 0 : index
    %8 = vector.load %arg4[%c0_6, %c0_7, %c0_8] : memref<1x1x1024xf32, #tpu.memory_space<vmem>>, vector<1x1x1024xf32>
    %9 = vector.shape_cast %8 : vector<1x1x1024xf32> to vector<1x1024xf32>
    %10 = vector.shape_cast %7 : vector<1x1024xf32> to vector<1x1x1024xf32>
    tpu.vector_store %arg4[%c0_6, %c0_7, %c0_8], %10 {strides = array<i32>} : memref<1x1x1024xf32, #tpu.memory_space<vmem>>, vector<1x1x1024xf32>,
    %11 = arith.mulf %5, %5 : vector<2x1024xf32>
    %cst_9 = arith.constant dense<0.000000e+00> : vector<1024xf32>
    %12 = vector.multi_reduction <add>, %11, %cst_9 [0] : vector<2x1024xf32> to vector<1024xf32>
    %13 = vector.shape_cast %12 : vector<1024xf32> to vector<1x1024xf32>
    %c0_10 = arith.constant 0 : index
    %c0_11 = arith.constant 0 : index
    %c0_12 = arith.constant 0 : index
    %14 = vector.load %arg5[%c0_10, %c0_11, %c0_12] : memref<1x1x1024xf32, #tpu.memory_space<vmem>>, vector<1x1x1024xf32>
    %15 = vector.shape_cast %14 : vector<1x1x1024xf32> to vector<1x1024xf32>
    %16 = vector.shape_cast %13 : vector<1x1024xf32> to vector<1x1x1024xf32>
    tpu.vector_store %arg5[%c0_10, %c0_11, %c0_12], %16 {strides = array<i32>} : memref<1x1x1024xf32, #tpu.memory_space<vmem>>, vector<1x1x1024xf32>,
    return
  }
  func.func @transform_0(%arg0: i32) -> (i32, i32) {
    %c0_i32 = arith.constant 0 : i32
    %c0_i32_0 = arith.constant 0 : i32
    return %arg0, %c0_i32 : i32, i32
  }
  func.func @transform_1(%arg0: i32) -> (i32, i32) {
    %c0_i32 = arith.constant 0 : i32
    %c0_i32_0 = arith.constant 0 : i32
    %c0_i32_1 = arith.constant 0 : i32
    return %c0_i32, %c0_i32_0 : i32, i32
  }
  func.func @transform_2(%arg0: i32) -> (i32, i32) {
    %c0_i32 = arith.constant 0 : i32
    %c0_i32_0 = arith.constant 0 : i32
    return %arg0, %c0_i32 : i32, i32
  }
  func.func @transform_3(%arg0: i32) -> (i32, i32, i32) {
    %c0_i32 = arith.constant 0 : i32
    %c0_i32_0 = arith.constant 0 : i32
    %c0_i32_1 = arith.constant 0 : i32
    return %arg0, %c0_i32, %c0_i32_0 : i32, i32, i32
  }
  func.func @transform_4(%arg0: i32) -> (i32, i32, i32) {
    %c0_i32 = arith.constant 0 : i32
    %c0_i32_0 = arith.constant 0 : i32
    %c0_i32_1 = arith.constant 0 : i32
    return %arg0, %c0_i32, %c0_i32_0 : i32, i32, i32
  }
}

module attributes {stable_mosaic.version = 11 : i64} {
  func.func @_bnrelu_matmul_stats_kernel(%arg0: i32, %arg1: memref<32x576xbf16, #tpu.memory_space<vmem>>, %arg2: memref<576x128xbf16, #tpu.memory_space<vmem>>, %arg3: memref<1x576xf32, #tpu.memory_space<vmem>>, %arg4: memref<1x576xf32, #tpu.memory_space<vmem>>, %arg5: memref<32x128xbf16, #tpu.memory_space<vmem>>, %arg6: memref<1x1x128xf32, #tpu.memory_space<vmem>>, %arg7: memref<1x1x128xf32, #tpu.memory_space<vmem>>) attributes {dimension_semantics = [#tpu.dimension_semantics<parallel>], iteration_bounds = array<i64: 1>, scalar_prefetch = 0 : i64, scratch_operands = 0 : i64, tpu.core_type = #tpu.core_type<tc>, window_params = [{transform_indices = @transform_0, window_bounds = array<i64: 32, 576>}, {pipeline_mode = #tpu.pipeline_mode<synchronous>, transform_indices = @transform_1, window_bounds = array<i64: 576, 128>}, {pipeline_mode = #tpu.pipeline_mode<synchronous>, transform_indices = @transform_2, window_bounds = array<i64: 1, 576>}, {pipeline_mode = #tpu.pipeline_mode<synchronous>, transform_indices = @transform_3, window_bounds = array<i64: 1, 576>}, {transform_indices = @transform_4, window_bounds = array<i64: 32, 128>}, {transform_indices = @transform_5, window_bounds = array<i64: 1, 1, 128>}, {transform_indices = @transform_6, window_bounds = array<i64: 1, 1, 128>}]} {
    %c0 = arith.constant 0 : index
    %c0_0 = arith.constant 0 : index
    %0 = vector.load %arg1[%c0, %c0_0] : memref<32x576xbf16, #tpu.memory_space<vmem>>, vector<32x576xbf16>
    %1 = arith.extf %0 : vector<32x576xbf16> to vector<32x576xf32>
    %c0_1 = arith.constant 0 : index
    %c0_2 = arith.constant 0 : index
    %2 = vector.load %arg3[%c0_1, %c0_2] : memref<1x576xf32, #tpu.memory_space<vmem>>, vector<1x576xf32>
    %3 = vector.broadcast %2 : vector<1x576xf32> to vector<32x576xf32>
    %4 = arith.mulf %1, %3 : vector<32x576xf32>
    %c0_3 = arith.constant 0 : index
    %c0_4 = arith.constant 0 : index
    %5 = vector.load %arg4[%c0_3, %c0_4] : memref<1x576xf32, #tpu.memory_space<vmem>>, vector<1x576xf32>
    %6 = vector.broadcast %5 : vector<1x576xf32> to vector<32x576xf32>
    %7 = arith.addf %4, %6 : vector<32x576xf32>
    %cst = arith.constant 0.000000e+00 : f32
    %8 = vector.broadcast %cst : f32 to vector<32x576xf32>
    %9 = arith.maximumf %7, %8 : vector<32x576xf32>
    %10 = arith.truncf %9 : vector<32x576xf32> to vector<32x576xbf16>
    %c0_5 = arith.constant 0 : index
    %c0_6 = arith.constant 0 : index
    %11 = vector.load %arg2[%c0_5, %c0_6] : memref<576x128xbf16, #tpu.memory_space<vmem>>, vector<576x128xbf16>
    %cst_7 = arith.constant dense<0.000000e+00> : vector<32x128xf32>
    %12 = tpu.matmul %10, %11, %cst_7 {dimension_numbers = #tpu.dot_dimension_numbers<[1], [0], [0], [1], [0, 0, 1, 1], [], []>} : vector<32x576xbf16>, vector<576x128xbf16>, vector<32x128xf32> -> vector<32x128xf32>
    %13 = arith.truncf %12 : vector<32x128xf32> to vector<32x128xbf16>
    %c0_8 = arith.constant 0 : index
    %c0_9 = arith.constant 0 : index
    %14 = vector.load %arg5[%c0_8, %c0_9] : memref<32x128xbf16, #tpu.memory_space<vmem>>, vector<32x128xbf16>
    tpu.vector_store %arg5[%c0_8, %c0_9], %13 {strides = array<i32>} : memref<32x128xbf16, #tpu.memory_space<vmem>>, vector<32x128xbf16>,
    %15 = arith.extf %13 : vector<32x128xbf16> to vector<32x128xf32>
    %cst_10 = arith.constant dense<0.000000e+00> : vector<128xf32>
    %16 = vector.multi_reduction <add>, %15, %cst_10 [0] : vector<32x128xf32> to vector<128xf32>
    %17 = vector.shape_cast %16 : vector<128xf32> to vector<1x128xf32>
    %c0_11 = arith.constant 0 : index
    %c0_12 = arith.constant 0 : index
    %c0_13 = arith.constant 0 : index
    %18 = vector.load %arg6[%c0_11, %c0_12, %c0_13] : memref<1x1x128xf32, #tpu.memory_space<vmem>>, vector<1x1x128xf32>
    %19 = vector.shape_cast %18 : vector<1x1x128xf32> to vector<1x128xf32>
    %20 = vector.shape_cast %17 : vector<1x128xf32> to vector<1x1x128xf32>
    tpu.vector_store %arg6[%c0_11, %c0_12, %c0_13], %20 {strides = array<i32>} : memref<1x1x128xf32, #tpu.memory_space<vmem>>, vector<1x1x128xf32>,
    %21 = arith.mulf %15, %15 : vector<32x128xf32>
    %cst_14 = arith.constant dense<0.000000e+00> : vector<128xf32>
    %22 = vector.multi_reduction <add>, %21, %cst_14 [0] : vector<32x128xf32> to vector<128xf32>
    %23 = vector.shape_cast %22 : vector<128xf32> to vector<1x128xf32>
    %c0_15 = arith.constant 0 : index
    %c0_16 = arith.constant 0 : index
    %c0_17 = arith.constant 0 : index
    %24 = vector.load %arg7[%c0_15, %c0_16, %c0_17] : memref<1x1x128xf32, #tpu.memory_space<vmem>>, vector<1x1x128xf32>
    %25 = vector.shape_cast %24 : vector<1x1x128xf32> to vector<1x128xf32>
    %26 = vector.shape_cast %23 : vector<1x128xf32> to vector<1x1x128xf32>
    tpu.vector_store %arg7[%c0_15, %c0_16, %c0_17], %26 {strides = array<i32>} : memref<1x1x128xf32, #tpu.memory_space<vmem>>, vector<1x1x128xf32>,
    return
  }
  func.func @transform_0(%arg0: i32) -> (i32, i32) {
    %c0_i32 = arith.constant 0 : i32
    %c0_i32_0 = arith.constant 0 : i32
    return %arg0, %c0_i32 : i32, i32
  }
  func.func @transform_1(%arg0: i32) -> (i32, i32) {
    %c0_i32 = arith.constant 0 : i32
    %c0_i32_0 = arith.constant 0 : i32
    %c0_i32_1 = arith.constant 0 : i32
    return %c0_i32, %c0_i32_0 : i32, i32
  }
  func.func @transform_2(%arg0: i32) -> (i32, i32) {
    %c0_i32 = arith.constant 0 : i32
    %c0_i32_0 = arith.constant 0 : i32
    %c0_i32_1 = arith.constant 0 : i32
    return %c0_i32, %c0_i32_0 : i32, i32
  }
  func.func @transform_3(%arg0: i32) -> (i32, i32) {
    %c0_i32 = arith.constant 0 : i32
    %c0_i32_0 = arith.constant 0 : i32
    %c0_i32_1 = arith.constant 0 : i32
    return %c0_i32, %c0_i32_0 : i32, i32
  }
  func.func @transform_4(%arg0: i32) -> (i32, i32) {
    %c0_i32 = arith.constant 0 : i32
    %c0_i32_0 = arith.constant 0 : i32
    return %arg0, %c0_i32 : i32, i32
  }
  func.func @transform_5(%arg0: i32) -> (i32, i32, i32) {
    %c0_i32 = arith.constant 0 : i32
    %c0_i32_0 = arith.constant 0 : i32
    %c0_i32_1 = arith.constant 0 : i32
    return %arg0, %c0_i32, %c0_i32_0 : i32, i32, i32
  }
  func.func @transform_6(%arg0: i32) -> (i32, i32, i32) {
    %c0_i32 = arith.constant 0 : i32
    %c0_i32_0 = arith.constant 0 : i32
    %c0_i32_1 = arith.constant 0 : i32
    return %arg0, %c0_i32, %c0_i32_0 : i32, i32, i32
  }
}

module attributes {stable_mosaic.version = 11 : i64} {
  func.func @_bnrelu_matmul_stats_kernel(%arg0: i32, %arg1: memref<128x288xbf16, #tpu.memory_space<vmem>>, %arg2: memref<288x64xbf16, #tpu.memory_space<vmem>>, %arg3: memref<1x288xf32, #tpu.memory_space<vmem>>, %arg4: memref<1x288xf32, #tpu.memory_space<vmem>>, %arg5: memref<128x64xbf16, #tpu.memory_space<vmem>>, %arg6: memref<1x1x64xf32, #tpu.memory_space<vmem>>, %arg7: memref<1x1x64xf32, #tpu.memory_space<vmem>>) attributes {dimension_semantics = [#tpu.dimension_semantics<parallel>], iteration_bounds = array<i64: 1>, scalar_prefetch = 0 : i64, scratch_operands = 0 : i64, tpu.core_type = #tpu.core_type<tc>, window_params = [{transform_indices = @transform_0, window_bounds = array<i64: 128, 288>}, {pipeline_mode = #tpu.pipeline_mode<synchronous>, transform_indices = @transform_1, window_bounds = array<i64: 288, 64>}, {pipeline_mode = #tpu.pipeline_mode<synchronous>, transform_indices = @transform_2, window_bounds = array<i64: 1, 288>}, {pipeline_mode = #tpu.pipeline_mode<synchronous>, transform_indices = @transform_3, window_bounds = array<i64: 1, 288>}, {transform_indices = @transform_4, window_bounds = array<i64: 128, 64>}, {transform_indices = @transform_5, window_bounds = array<i64: 1, 1, 64>}, {transform_indices = @transform_6, window_bounds = array<i64: 1, 1, 64>}]} {
    %c0 = arith.constant 0 : index
    %c0_0 = arith.constant 0 : index
    %0 = vector.load %arg1[%c0, %c0_0] : memref<128x288xbf16, #tpu.memory_space<vmem>>, vector<128x288xbf16>
    %1 = arith.extf %0 : vector<128x288xbf16> to vector<128x288xf32>
    %c0_1 = arith.constant 0 : index
    %c0_2 = arith.constant 0 : index
    %2 = vector.load %arg3[%c0_1, %c0_2] : memref<1x288xf32, #tpu.memory_space<vmem>>, vector<1x288xf32>
    %3 = vector.broadcast %2 : vector<1x288xf32> to vector<128x288xf32>
    %4 = arith.mulf %1, %3 : vector<128x288xf32>
    %c0_3 = arith.constant 0 : index
    %c0_4 = arith.constant 0 : index
    %5 = vector.load %arg4[%c0_3, %c0_4] : memref<1x288xf32, #tpu.memory_space<vmem>>, vector<1x288xf32>
    %6 = vector.broadcast %5 : vector<1x288xf32> to vector<128x288xf32>
    %7 = arith.addf %4, %6 : vector<128x288xf32>
    %cst = arith.constant 0.000000e+00 : f32
    %8 = vector.broadcast %cst : f32 to vector<128x288xf32>
    %9 = arith.maximumf %7, %8 : vector<128x288xf32>
    %10 = arith.truncf %9 : vector<128x288xf32> to vector<128x288xbf16>
    %c0_5 = arith.constant 0 : index
    %c0_6 = arith.constant 0 : index
    %11 = vector.load %arg2[%c0_5, %c0_6] : memref<288x64xbf16, #tpu.memory_space<vmem>>, vector<288x64xbf16>
    %cst_7 = arith.constant dense<0.000000e+00> : vector<128x64xf32>
    %12 = tpu.matmul %10, %11, %cst_7 {dimension_numbers = #tpu.dot_dimension_numbers<[1], [0], [0], [1], [0, 0, 1, 1], [], []>} : vector<128x288xbf16>, vector<288x64xbf16>, vector<128x64xf32> -> vector<128x64xf32>
    %13 = arith.truncf %12 : vector<128x64xf32> to vector<128x64xbf16>
    %c0_8 = arith.constant 0 : index
    %c0_9 = arith.constant 0 : index
    %14 = vector.load %arg5[%c0_8, %c0_9] : memref<128x64xbf16, #tpu.memory_space<vmem>>, vector<128x64xbf16>
    tpu.vector_store %arg5[%c0_8, %c0_9], %13 {strides = array<i32>} : memref<128x64xbf16, #tpu.memory_space<vmem>>, vector<128x64xbf16>,
    %15 = arith.extf %13 : vector<128x64xbf16> to vector<128x64xf32>
    %cst_10 = arith.constant dense<0.000000e+00> : vector<64xf32>
    %16 = vector.multi_reduction <add>, %15, %cst_10 [0] : vector<128x64xf32> to vector<64xf32>
    %17 = vector.shape_cast %16 : vector<64xf32> to vector<1x64xf32>
    %c0_11 = arith.constant 0 : index
    %c0_12 = arith.constant 0 : index
    %c0_13 = arith.constant 0 : index
    %18 = vector.load %arg6[%c0_11, %c0_12, %c0_13] : memref<1x1x64xf32, #tpu.memory_space<vmem>>, vector<1x1x64xf32>
    %19 = vector.shape_cast %18 : vector<1x1x64xf32> to vector<1x64xf32>
    %20 = vector.shape_cast %17 : vector<1x64xf32> to vector<1x1x64xf32>
    tpu.vector_store %arg6[%c0_11, %c0_12, %c0_13], %20 {strides = array<i32>} : memref<1x1x64xf32, #tpu.memory_space<vmem>>, vector<1x1x64xf32>,
    %21 = arith.mulf %15, %15 : vector<128x64xf32>
    %cst_14 = arith.constant dense<0.000000e+00> : vector<64xf32>
    %22 = vector.multi_reduction <add>, %21, %cst_14 [0] : vector<128x64xf32> to vector<64xf32>
    %23 = vector.shape_cast %22 : vector<64xf32> to vector<1x64xf32>
    %c0_15 = arith.constant 0 : index
    %c0_16 = arith.constant 0 : index
    %c0_17 = arith.constant 0 : index
    %24 = vector.load %arg7[%c0_15, %c0_16, %c0_17] : memref<1x1x64xf32, #tpu.memory_space<vmem>>, vector<1x1x64xf32>
    %25 = vector.shape_cast %24 : vector<1x1x64xf32> to vector<1x64xf32>
    %26 = vector.shape_cast %23 : vector<1x64xf32> to vector<1x1x64xf32>
    tpu.vector_store %arg7[%c0_15, %c0_16, %c0_17], %26 {strides = array<i32>} : memref<1x1x64xf32, #tpu.memory_space<vmem>>, vector<1x1x64xf32>,
    return
  }
  func.func @transform_0(%arg0: i32) -> (i32, i32) {
    %c0_i32 = arith.constant 0 : i32
    %c0_i32_0 = arith.constant 0 : i32
    return %arg0, %c0_i32 : i32, i32
  }
  func.func @transform_1(%arg0: i32) -> (i32, i32) {
    %c0_i32 = arith.constant 0 : i32
    %c0_i32_0 = arith.constant 0 : i32
    %c0_i32_1 = arith.constant 0 : i32
    return %c0_i32, %c0_i32_0 : i32, i32
  }
  func.func @transform_2(%arg0: i32) -> (i32, i32) {
    %c0_i32 = arith.constant 0 : i32
    %c0_i32_0 = arith.constant 0 : i32
    %c0_i32_1 = arith.constant 0 : i32
    return %c0_i32, %c0_i32_0 : i32, i32
  }
  func.func @transform_3(%arg0: i32) -> (i32, i32) {
    %c0_i32 = arith.constant 0 : i32
    %c0_i32_0 = arith.constant 0 : i32
    %c0_i32_1 = arith.constant 0 : i32
    return %c0_i32, %c0_i32_0 : i32, i32
  }
  func.func @transform_4(%arg0: i32) -> (i32, i32) {
    %c0_i32 = arith.constant 0 : i32
    %c0_i32_0 = arith.constant 0 : i32
    return %arg0, %c0_i32 : i32, i32
  }
  func.func @transform_5(%arg0: i32) -> (i32, i32, i32) {
    %c0_i32 = arith.constant 0 : i32
    %c0_i32_0 = arith.constant 0 : i32
    %c0_i32_1 = arith.constant 0 : i32
    return %arg0, %c0_i32, %c0_i32_0 : i32, i32, i32
  }
  func.func @transform_6(%arg0: i32) -> (i32, i32, i32) {
    %c0_i32 = arith.constant 0 : i32
    %c0_i32_0 = arith.constant 0 : i32
    %c0_i32_1 = arith.constant 0 : i32
    return %arg0, %c0_i32, %c0_i32_0 : i32, i32, i32
  }
}

module attributes {stable_mosaic.version = 11 : i64} {
  func.func @_bnrelu_matmul_stats_kernel(%arg0: i32, %arg1: memref<512x144xbf16, #tpu.memory_space<vmem>>, %arg2: memref<144x32xbf16, #tpu.memory_space<vmem>>, %arg3: memref<1x144xf32, #tpu.memory_space<vmem>>, %arg4: memref<1x144xf32, #tpu.memory_space<vmem>>, %arg5: memref<512x32xbf16, #tpu.memory_space<vmem>>, %arg6: memref<1x1x32xf32, #tpu.memory_space<vmem>>, %arg7: memref<1x1x32xf32, #tpu.memory_space<vmem>>) attributes {dimension_semantics = [#tpu.dimension_semantics<parallel>], iteration_bounds = array<i64: 1>, scalar_prefetch = 0 : i64, scratch_operands = 0 : i64, tpu.core_type = #tpu.core_type<tc>, window_params = [{transform_indices = @transform_0, window_bounds = array<i64: 512, 144>}, {pipeline_mode = #tpu.pipeline_mode<synchronous>, transform_indices = @transform_1, window_bounds = array<i64: 144, 32>}, {pipeline_mode = #tpu.pipeline_mode<synchronous>, transform_indices = @transform_2, window_bounds = array<i64: 1, 144>}, {pipeline_mode = #tpu.pipeline_mode<synchronous>, transform_indices = @transform_3, window_bounds = array<i64: 1, 144>}, {transform_indices = @transform_4, window_bounds = array<i64: 512, 32>}, {transform_indices = @transform_5, window_bounds = array<i64: 1, 1, 32>}, {transform_indices = @transform_6, window_bounds = array<i64: 1, 1, 32>}]} {
    %c0 = arith.constant 0 : index
    %c0_0 = arith.constant 0 : index
    %0 = vector.load %arg1[%c0, %c0_0] : memref<512x144xbf16, #tpu.memory_space<vmem>>, vector<512x144xbf16>
    %1 = arith.extf %0 : vector<512x144xbf16> to vector<512x144xf32>
    %c0_1 = arith.constant 0 : index
    %c0_2 = arith.constant 0 : index
    %2 = vector.load %arg3[%c0_1, %c0_2] : memref<1x144xf32, #tpu.memory_space<vmem>>, vector<1x144xf32>
    %3 = vector.broadcast %2 : vector<1x144xf32> to vector<512x144xf32>
    %4 = arith.mulf %1, %3 : vector<512x144xf32>
    %c0_3 = arith.constant 0 : index
    %c0_4 = arith.constant 0 : index
    %5 = vector.load %arg4[%c0_3, %c0_4] : memref<1x144xf32, #tpu.memory_space<vmem>>, vector<1x144xf32>
    %6 = vector.broadcast %5 : vector<1x144xf32> to vector<512x144xf32>
    %7 = arith.addf %4, %6 : vector<512x144xf32>
    %cst = arith.constant 0.000000e+00 : f32
    %8 = vector.broadcast %cst : f32 to vector<512x144xf32>
    %9 = arith.maximumf %7, %8 : vector<512x144xf32>
    %10 = arith.truncf %9 : vector<512x144xf32> to vector<512x144xbf16>
    %c0_5 = arith.constant 0 : index
    %c0_6 = arith.constant 0 : index
    %11 = vector.load %arg2[%c0_5, %c0_6] : memref<144x32xbf16, #tpu.memory_space<vmem>>, vector<144x32xbf16>
    %cst_7 = arith.constant dense<0.000000e+00> : vector<512x32xf32>
    %12 = tpu.matmul %10, %11, %cst_7 {dimension_numbers = #tpu.dot_dimension_numbers<[1], [0], [0], [1], [0, 0, 1, 1], [], []>} : vector<512x144xbf16>, vector<144x32xbf16>, vector<512x32xf32> -> vector<512x32xf32>
    %13 = arith.truncf %12 : vector<512x32xf32> to vector<512x32xbf16>
    %c0_8 = arith.constant 0 : index
    %c0_9 = arith.constant 0 : index
    %14 = vector.load %arg5[%c0_8, %c0_9] : memref<512x32xbf16, #tpu.memory_space<vmem>>, vector<512x32xbf16>
    tpu.vector_store %arg5[%c0_8, %c0_9], %13 {strides = array<i32>} : memref<512x32xbf16, #tpu.memory_space<vmem>>, vector<512x32xbf16>,
    %15 = arith.extf %13 : vector<512x32xbf16> to vector<512x32xf32>
    %cst_10 = arith.constant dense<0.000000e+00> : vector<32xf32>
    %16 = vector.multi_reduction <add>, %15, %cst_10 [0] : vector<512x32xf32> to vector<32xf32>
    %17 = vector.shape_cast %16 : vector<32xf32> to vector<1x32xf32>
    %c0_11 = arith.constant 0 : index
    %c0_12 = arith.constant 0 : index
    %c0_13 = arith.constant 0 : index
    %18 = vector.load %arg6[%c0_11, %c0_12, %c0_13] : memref<1x1x32xf32, #tpu.memory_space<vmem>>, vector<1x1x32xf32>
    %19 = vector.shape_cast %18 : vector<1x1x32xf32> to vector<1x32xf32>
    %20 = vector.shape_cast %17 : vector<1x32xf32> to vector<1x1x32xf32>
    tpu.vector_store %arg6[%c0_11, %c0_12, %c0_13], %20 {strides = array<i32>} : memref<1x1x32xf32, #tpu.memory_space<vmem>>, vector<1x1x32xf32>,
    %21 = arith.mulf %15, %15 : vector<512x32xf32>
    %cst_14 = arith.constant dense<0.000000e+00> : vector<32xf32>
    %22 = vector.multi_reduction <add>, %21, %cst_14 [0] : vector<512x32xf32> to vector<32xf32>
    %23 = vector.shape_cast %22 : vector<32xf32> to vector<1x32xf32>
    %c0_15 = arith.constant 0 : index
    %c0_16 = arith.constant 0 : index
    %c0_17 = arith.constant 0 : index
    %24 = vector.load %arg7[%c0_15, %c0_16, %c0_17] : memref<1x1x32xf32, #tpu.memory_space<vmem>>, vector<1x1x32xf32>
    %25 = vector.shape_cast %24 : vector<1x1x32xf32> to vector<1x32xf32>
    %26 = vector.shape_cast %23 : vector<1x32xf32> to vector<1x1x32xf32>
    tpu.vector_store %arg7[%c0_15, %c0_16, %c0_17], %26 {strides = array<i32>} : memref<1x1x32xf32, #tpu.memory_space<vmem>>, vector<1x1x32xf32>,
    return
  }
  func.func @transform_0(%arg0: i32) -> (i32, i32) {
    %c0_i32 = arith.constant 0 : i32
    %c0_i32_0 = arith.constant 0 : i32
    return %arg0, %c0_i32 : i32, i32
  }
  func.func @transform_1(%arg0: i32) -> (i32, i32) {
    %c0_i32 = arith.constant 0 : i32
    %c0_i32_0 = arith.constant 0 : i32
    %c0_i32_1 = arith.constant 0 : i32
    return %c0_i32, %c0_i32_0 : i32, i32
  }
  func.func @transform_2(%arg0: i32) -> (i32, i32) {
    %c0_i32 = arith.constant 0 : i32
    %c0_i32_0 = arith.constant 0 : i32
    %c0_i32_1 = arith.constant 0 : i32
    return %c0_i32, %c0_i32_0 : i32, i32
  }
  func.func @transform_3(%arg0: i32) -> (i32, i32) {
    %c0_i32 = arith.constant 0 : i32
    %c0_i32_0 = arith.constant 0 : i32
    %c0_i32_1 = arith.constant 0 : i32
    return %c0_i32, %c0_i32_0 : i32, i32
  }
  func.func @transform_4(%arg0: i32) -> (i32, i32) {
    %c0_i32 = arith.constant 0 : i32
    %c0_i32_0 = arith.constant 0 : i32
    return %arg0, %c0_i32 : i32, i32
  }
  func.func @transform_5(%arg0: i32) -> (i32, i32, i32) {
    %c0_i32 = arith.constant 0 : i32
    %c0_i32_0 = arith.constant 0 : i32
    %c0_i32_1 = arith.constant 0 : i32
    return %arg0, %c0_i32, %c0_i32_0 : i32, i32, i32
  }
  func.func @transform_6(%arg0: i32) -> (i32, i32, i32) {
    %c0_i32 = arith.constant 0 : i32
    %c0_i32_0 = arith.constant 0 : i32
    %c0_i32_1 = arith.constant 0 : i32
    return %arg0, %c0_i32, %c0_i32_0 : i32, i32, i32
  }
}

module attributes {stable_mosaic.version = 11 : i64} {
  func.func @_last_layer_kernel(%arg0: i32, %arg1: memref<8x72xbf16, #tpu.memory_space<vmem>>, %arg2: memref<72x512xbf16, #tpu.memory_space<vmem>>, %arg3: memref<72x1xf32, #tpu.memory_space<vmem>>, %arg4: memref<72x1xf32, #tpu.memory_space<vmem>>, %arg5: memref<1x1xf32, #tpu.memory_space<smem>>, %arg6: memref<8x512xf32, #tpu.memory_space<vmem>>) attributes {dimension_semantics = [#tpu.dimension_semantics<parallel>], iteration_bounds = array<i64: 4>, scalar_prefetch = 0 : i64, scratch_operands = 0 : i64, tpu.core_type = #tpu.core_type<tc>, window_params = [{pipeline_mode = #tpu.pipeline_mode<synchronous>, transform_indices = @transform_0, window_bounds = array<i64: 8, 72>}, {transform_indices = @transform_1, window_bounds = array<i64: 72, 512>}, {pipeline_mode = #tpu.pipeline_mode<synchronous>, transform_indices = @transform_2, window_bounds = array<i64: 72, 1>}, {pipeline_mode = #tpu.pipeline_mode<synchronous>, transform_indices = @transform_3, window_bounds = array<i64: 72, 1>}, {transform_indices = @transform_4, window_bounds = array<i64: 1, 1>}, {transform_indices = @transform_5, window_bounds = array<i64: 8, 512>}]} {
    %c0 = arith.constant 0 : index
    %c0_0 = arith.constant 0 : index
    %0 = vector.load %arg2[%c0, %c0_0] : memref<72x512xbf16, #tpu.memory_space<vmem>>, vector<72x512xbf16>
    %1 = arith.extf %0 : vector<72x512xbf16> to vector<72x512xf32>
    %c0_1 = arith.constant 0 : index
    %c0_2 = arith.constant 0 : index
    %2 = vector.load %arg3[%c0_1, %c0_2] : memref<72x1xf32, #tpu.memory_space<vmem>>, vector<72x1xf32>
    %3 = vector.broadcast %2 : vector<72x1xf32> to vector<72x512xf32>
    %4 = arith.mulf %1, %3 : vector<72x512xf32>
    %c0_3 = arith.constant 0 : index
    %c0_4 = arith.constant 0 : index
    %5 = vector.load %arg4[%c0_3, %c0_4] : memref<72x1xf32, #tpu.memory_space<vmem>>, vector<72x1xf32>
    %6 = vector.broadcast %5 : vector<72x1xf32> to vector<72x512xf32>
    %7 = arith.addf %4, %6 : vector<72x512xf32>
    %cst = arith.constant 0.000000e+00 : f32
    %8 = vector.broadcast %cst : f32 to vector<72x512xf32>
    %9 = arith.maximumf %7, %8 : vector<72x512xf32>
    %c0_5 = arith.constant 0 : index
    %c0_6 = arith.constant 0 : index
    %10 = vector.load %arg1[%c0_5, %c0_6] : memref<8x72xbf16, #tpu.memory_space<vmem>>, vector<8x72xbf16>
    %11 = arith.truncf %9 : vector<72x512xf32> to vector<72x512xbf16>
    %cst_7 = arith.constant dense<0.000000e+00> : vector<8x512xf32>
    %12 = tpu.matmul %10, %11, %cst_7 {dimension_numbers = #tpu.dot_dimension_numbers<[1], [0], [0], [1], [0, 0, 1, 1], [], []>} : vector<8x72xbf16>, vector<72x512xbf16>, vector<8x512xf32> -> vector<8x512xf32>
    %c0_8 = arith.constant 0 : index
    %c0_9 = arith.constant 0 : index
    %13 = memref.load %arg5[%c0_8, %c0_9] : memref<1x1xf32, #tpu.memory_space<smem>>
    %14 = vector.broadcast %13 : f32 to vector<8x512xf32>
    %15 = arith.addf %12, %14 : vector<8x512xf32>
    %16 = math.tanh %15 : vector<8x512xf32>
    %c0_10 = arith.constant 0 : index
    %c0_11 = arith.constant 0 : index
    %17 = vector.load %arg6[%c0_10, %c0_11] : memref<8x512xf32, #tpu.memory_space<vmem>>, vector<8x512xf32>
    tpu.vector_store %arg6[%c0_10, %c0_11], %16 {strides = array<i32>} : memref<8x512xf32, #tpu.memory_space<vmem>>, vector<8x512xf32>,
    return
  }
  func.func @transform_0(%arg0: i32) -> (i32, i32) {
    %c0_i32 = arith.constant 0 : i32
    %c0_i32_0 = arith.constant 0 : i32
    %c0_i32_1 = arith.constant 0 : i32
    return %c0_i32, %c0_i32_0 : i32, i32
  }
  func.func @transform_1(%arg0: i32) -> (i32, i32) {
    %c0_i32 = arith.constant 0 : i32
    %c0_i32_0 = arith.constant 0 : i32
    return %c0_i32, %arg0 : i32, i32
  }
  func.func @transform_2(%arg0: i32) -> (i32, i32) {
    %c0_i32 = arith.constant 0 : i32
    %c0_i32_0 = arith.constant 0 : i32
    %c0_i32_1 = arith.constant 0 : i32
    return %c0_i32, %c0_i32_0 : i32, i32
  }
  func.func @transform_3(%arg0: i32) -> (i32, i32) {
    %c0_i32 = arith.constant 0 : i32
    %c0_i32_0 = arith.constant 0 : i32
    %c0_i32_1 = arith.constant 0 : i32
    return %c0_i32, %c0_i32_0 : i32, i32
  }
  func.func @transform_4(%arg0: i32) -> (i32, i32) {
    %c0_i32 = arith.constant 0 : i32
    %c0_i32_0 = arith.constant 0 : i32
    %c0_i32_1 = arith.constant 0 : i32
    return %c0_i32, %c0_i32_0 : i32, i32
  }
  func.func @transform_5(%arg0: i32) -> (i32, i32) {
    %c0_i32 = arith.constant 0 : i32
    %c0_i32_0 = arith.constant 0 : i32
    return %c0_i32, %arg0 : i32, i32
  }
}

</mosaic_0001>

<bundles_post_ra>
// kernel: tile.47
= control target key start
LH: loop header
LB: loop body
LE: loop exit
PB: predicated region body
PF: predicated region fallthrough
CT: control target
= control target key end

     0   :  { %s28_s0 = inlined_call_operand.vmem [shape: f32[64], index: 0, kind: input, shape index: {}]   ;;  %s29_s1 = inlined_call_operand.vmem [shape: f32[9,64], index: 1, kind: output, shape index: {}]  }
   0x1   :  { %v4_v0 = vld [vmem:[%s28_s0] ss:$0 sm:$0xff] }
   0x2   :  { %5 = vst [vmem:[%s29_s1] sm:$0xff] %v4_v0 }
   0x3   :  { %8 = vst [vmem:[%s29_s1 + $0x8] sm:$0xff] %v4_v0 }

// kernel: tile.49
= control target key start
LH: loop header
LB: loop body
LE: loop exit
PB: predicated region body
PF: predicated region fallthrough
CT: control target
= control target key end

     0   :  { %vm3_vm0 = vcmask 523264   ;;  %s49_s8 = smov 64   ;;  %vm11_vm1 = vcmask 1048064   ;;  %s81_s0 = inlined_call_operand.vmem [shape: f32[9,64], index: 0, kind: input, shape index: {}]   ;;  %s82_s1 = inlined_call_operand.vmem [shape: f32[1,576], index: 1, kind: output, shape index: {}]  }
   0x1   :  { %v43_v0 = vld [vmem:[%s81_s0 + $0x1] ss:$2 sm:$0xf]   ;;  %v2_v1 = vld [vmem:[%s81_s0] ss:$2 sm:$0x1f]  }
   0x2   :  { %9 = vrot.lane.b32.xlu0 %v43_v0, %s49_s8  ;;  %4 = vst.msk [vmem:[#allocation0] ss:$8 sm:$0xf] %vm3_vm0, %v2_v1  }
   0x3   :  { %6 = vst.msk [vmem:[#allocation0 + $0x1c] sm:$0x10] %vm3_vm0, %v2_v1  }
   0xa   :  { %v38_v2 = vld [vmem:[#allocation0 + $0x20] sm:$0x1] }
   0xb   :  { %47 = vst [vmem:[%s82_s1 + $0x4] sm:$0x1] %v38_v2 }
  0x74   :  { %v10_v3 = vpop.permute.xlu0 %9  }
  0x75   :  { %12 = vst.msk [vmem:[#allocation0] ss:$8 sm:$0xf] %vm11_vm1, %v10_v3  }
  0x7c   :  { %v15_v4 = vld [vmem:[#allocation0] sm:$0x1]  ;;  %v20_v5 = vld [vmem:[#allocation0 + $0x8] sm:$0x1]  ;;  %v26_v6 = vld [vmem:[#allocation0 + $0x10] sm:$0x1] }
  0x7d   :  { %18 = vst [vmem:[%s82_s1] sm:$0x1] %v15_v4  ;;  %v32_v7 = vld [vmem:[#allocation0 + $0x18] sm:$0x1] }
  0x7e   :  { %44 = vst [vmem:[%s82_s1 + $0x1] sm:$0x1] %v20_v5 }
  0x7f   :  { %45 = vst [vmem:[%s82_s1 + $0x2] sm:$0x1] %v26_v6 }
  0x80   :  { %46 = vst [vmem:[%s82_s1 + $0x3] sm:$0x1] %v32_v7 }

// kernel: generator_forward.5
= control target key start
LH: loop header
LB: loop body
LE: loop exit
PB: predicated region body
PF: predicated region fallthrough
CT: control target
= control target key end

     0   :  { %vm44_vm0 = vcmask 1043456   ;;  %vm40_vm1 = vcmask 64512   ;;  %vm196_vm2 = vcmask 1041408   ;;  %vm188_vm3 = vcmask 1040384   ;;  %s530_s1 = inlined_call_operand.vmem [shape: bf16[8,1024], index: 1, kind: input, shape index: {}]   ;;  %s531_s0 = inlined_call_operand.vmem [shape: bf16[2,8], index: 0, kind: input, shape index: {}]   ;;  %s532_s2 = inlined_call_operand.vmem [shape: bf16[2,1024], index: 2, kind: output, shape index: {0}]   ;;  %s533_s3 = inlined_call_operand.vmem [shape: f32[1,1,1024], index: 3, kind: output, shape index: {1}]   ;;  %s534_s4 = inlined_call_operand.vmem [shape: f32[1,1,1024], index: 4, kind: output, shape index: {2}]  }
   0x1   :  { %v16_v0 = vld [vmem:[%s530_s1] sm:$0xff]  ;;  %v17_v1 = vld [vmem:[%s530_s1 + $0x8] sm:$0xff]  ;;  %v19_v6 = vld [vmem:[%s530_s1 + $0x18] sm:$0xff]  ;;  %vm192_vm4 = vcmask 1042434   ;;  %vm198_vm5 = vcmask 1044484   ;;  %vm202_vm6 = vcmask 1046534  }
   0x2   :  { %v24_v2 = vunpack.c.l.b16 %v16_v0  ;;  %v25_v3 = vunpack.c.h.b16 %v16_v0  ;;  %v26_v4 = vunpack.c.l.b16 %v17_v1  ;;  %v27_v5 = vunpack.c.h.b16 %v17_v1  ;;  %v18_v7 = vld [vmem:[%s530_s1 + $0x10] sm:$0xff]  ;;  %v15_v24 = vld [vmem:[%s531_s0] sm:$0x1] }
   0x3   :  { %v30_v8 = vunpack.c.l.b16 %v19_v6  ;;  %v31_v9 = vunpack.c.h.b16 %v19_v6  ;;  %v28_v10 = vunpack.c.l.b16 %v18_v7  ;;  %v29_v11 = vunpack.c.h.b16 %v18_v7 }
   0x4   :  { %v32_v12 = vpack.c.b16 %v24_v2, %v24_v2  ;;  %v33_v13 = vpack.c.b16 %v25_v3, %v25_v3  ;;  %v34_v14 = vpack.c.b16 %v26_v4, %v26_v4  ;;  %v35_v15 = vpack.c.b16 %v27_v5, %v27_v5 }
   0x5   :  { %v38_v16 = vpack.c.b16 %v30_v8, %v30_v8  ;;  %v39_v17 = vpack.c.b16 %v31_v9, %v31_v9  ;;  %v36_v18 = vpack.c.b16 %v28_v10, %v28_v10  ;;  %v37_v19 = vpack.c.b16 %v29_v11, %v29_v11 }
   0x6   :  { %v46_v20 = vsel %vm44_vm0, %v32_v12, 0  ;;  %v49_v21 = vsel %vm44_vm0, %v33_v13, 0  ;;  %v52_v22 = vsel %vm44_vm0, %v34_v14, 0  ;;  %v55_v23 = vsel %vm44_vm0, %v35_v15, 0 }
   0x7   :  { %76 = vmatpush.bf16.msra.mxu0 %v46_v20  ;;  %89 = vmatpush.bf16.msra.mxu1 %v49_v21  ;;  %v64_v25 = vsel %vm44_vm0, %v38_v16, 0  ;;  %v67_v26 = vsel %vm44_vm0, %v39_v17, 0  ;;  %v58_v27 = vsel %vm44_vm0, %v36_v18, 0  ;;  %v61_v28 = vsel %vm44_vm0, %v37_v19, 0 }
   0x8   :  { %102 = vmatpush.bf16.msra.mxu2 %v52_v22  ;;  %115 = vmatpush.bf16.msra.mxu3 %v55_v23  ;;  %vm206_vm7 = vcmask 1045508  }
   0xa   :  { %399 = vmatmul.msk.bf16.vlgmr.msra.gmra.mxu0 %vm40_vm1, %v15_v24  ;;  %400 = vmatmul.msk.bf16.vlgmr.msra.gmra.mxu1 %vm40_vm1, %v15_v24 }
   0xb   :  { %401 = vmatmul.msk.bf16.vlgmr.msra.gmra.mxu2 %vm40_vm1, %v15_v24  ;;  %402 = vmatmul.msk.bf16.vlgmr.msra.gmra.mxu3 %vm40_vm1, %v15_v24 }
   0xc   :  { %154 = vmatpush.bf16.msrb.mxu2 %v64_v25  ;;  %167 = vmatpush.bf16.msrb.mxu3 %v67_v26 }
   0xd   :  { %128 = vmatpush.bf16.msrb.mxu0 %v58_v27  ;;  %141 = vmatpush.bf16.msrb.mxu1 %v61_v28 }
  0x1a   :  { %403 = vmatmul.msk.bf16.vlgmr.msrb.gmra.mxu0 %vm40_vm1, %v15_v24  ;;  %404 = vmatmul.msk.bf16.vlgmr.msrb.gmra.mxu1 %vm40_vm1, %v15_v24 }
  0x1b   :  { %405 = vmatmul.msk.bf16.vlgmr.msrb.gmra.mxu2 %vm40_vm1, %v15_v24  ;;  %406 = vmatmul.msk.bf16.vlgmr.msrb.gmra.mxu3 %vm40_vm1, %v15_v24 }
  0x87   :  { %v78_v29 = vpop.f32.mrf.mxu0  ;;  %v91_v30 = vpop.f32.mrf.mxu1 }
  0x88   :  { %v173_v31 = vpack.c.bf16 %v91_v30, %v78_v29 }
  0x8a   :  { %v212_v32 = vunpack.c.h.bf16 %v173_v31  ;;  %v211_v33 = vunpack.c.l.bf16 %v173_v31  ;;  %v181_v59 = vrot.slane %v173_v31, 3 }
  0x8c   :  { %v226_v34 = vsel %vm196_vm2, %v212_v32, 0.0  ;;  %v300_v35 = vmul.f32 %v212_v32, %v212_v32  ;;  %v219_v38 = vsel %vm196_vm2, %v211_v33, 0.0  ;;  %v299_v42 = vmul.f32 %v211_v33, %v211_v33 }
  0x8d   :  { %v227_v39 = vrot.slane %v226_v34, 4  ;;  %v220_v44 = vrot.slane %v219_v38, 4  ;;  %v191_v5 = vsel %vm188_vm3, %v173_v31, %v181_v59 }
  0x8e   :  { %v104_v36 = vpop.f32.mrf.mxu2  ;;  %v117_v37 = vpop.f32.mrf.mxu3  ;;  %v314_v45 = vsel %vm196_vm2, %v300_v35, 0.0  ;;  %v307_v47 = vsel %vm196_vm2, %v299_v42, 0.0 }
  0x8f   :  { %v80_v40 = vpop.f32.mrf.mxu0  ;;  %v93_v41 = vpop.f32.mrf.mxu1  ;;  %v174_v43 = vpack.c.bf16 %v117_v37, %v104_v36  ;;  %v228_v46 = vadd.f32 %v227_v39, %v226_v34  ;;  %v315_v49 = vrot.slane %v314_v45, 4  ;;  %v221_v50 = vadd.f32 %v220_v44, %v219_v38 }
  0x90   :  { %v308_v55 = vrot.slane %v307_v47, 4 }
  0x91   :  { %v213_v48 = vunpack.c.l.bf16 %v174_v43  ;;  %v214_v51 = vunpack.c.h.bf16 %v174_v43  ;;  %v229_v54 = vrot.slane %v228_v46, 2  ;;  %v316_v60 = vadd.f32 %v315_v49, %v314_v45 }
  0x92   :  { %v222_v61 = vrot.slane %v221_v50, 2  ;;  %v309_v1 = vadd.f32 %v308_v55, %v307_v47  ;;  %v182_v10 = vrot.slane %v174_v43, 6  ;;  %v183_v11 = vrot.slane %v174_v43, 1 }
  0x93   :  { %v233_v58 = vsel %vm196_vm2, %v213_v48, 0.0  ;;  %v240_v62 = vsel %vm196_vm2, %v214_v51, 0.0  ;;  %v230_v0 = vadd.f32 %v229_v54, %v228_v46  ;;  %v301_v3 = vmul.f32 %v213_v48, %v213_v48 }
  0x94   :  { %v234_v2 = vrot.slane %v233_v58, 4  ;;  %v302_v4 = vmul.f32 %v214_v51, %v214_v51  ;;  %v317_v6 = vrot.slane %v316_v60, 2  ;;  %v241_v7 = vrot.slane %v240_v62, 4 }
  0x95   :  { %v223_v9 = vadd.f32 %v222_v61, %v221_v50  ;;  %v231_v15 = vrot.slane %v230_v0, 1  ;;  %v310_v16 = vrot.slane %v309_v1, 2  ;;  %v321_v21 = vsel %vm196_vm2, %v301_v3, 0.0 }
  0x96   :  { %v106_v52 = vpop.f32.mrf.mxu2  ;;  %v119_v53 = vpop.f32.mrf.mxu3  ;;  %v235_v17 = vadd.f32 %v234_v2, %v233_v58  ;;  %v328_v22 = vsel %vm196_vm2, %v302_v4, 0.0  ;;  %v318_v25 = vadd.f32 %v317_v6, %v316_v60  ;;  %v242_v26 = vadd.f32 %v241_v7, %v240_v62 }
  0x97   :  { %v130_v56 = vpop.f32.mrf.mxu0  ;;  %v143_v57 = vpop.f32.mrf.mxu1  ;;  %v224_v29 = vrot.slane %v223_v9, 1  ;;  %v195_v30 = vsel %vm192_vm4, %v182_v10, %v183_v11  ;;  %v322_v33 = vrot.slane %v321_v21, 4  ;;  %v329_v34 = vrot.slane %v328_v22, 4 }
  0x98   :  { %v469_v63 = vpack.c.bf16 %v143_v57, %v130_v56  ;;  %v236_v32 = vrot.slane %v235_v17, 2  ;;  %v480_v36 = vadd.f32 %v231_v15, %v230_v0  ;;  %v483_v40 = vadd.f32 %v310_v16, %v309_v1 }
  0x99   :  { %v319_v41 = vrot.slane %v318_v25, 1  ;;  %v243_v42 = vrot.slane %v242_v26, 2  ;;  %v197_v44 = vsel %vm196_vm2, %v191_v5, %v195_v30  ;;  %v323_v51 = vadd.f32 %v322_v33, %v321_v21 }
  0x9a   :  { %v215_v8 = vunpack.c.l.bf16 %v469_v63  ;;  %v216_v12 = vunpack.c.h.bf16 %v469_v63  ;;  %v184_v45 = vrot.slane %v469_v63, 4  ;;  %v185_v46 = vrot.slane %v469_v63, 7 }
  0x9b   :  { %v237_v50 = vadd.f32 %v236_v32, %v235_v17  ;;  %v330_v52 = vadd.f32 %v329_v34, %v328_v22  ;;  %v488_v54 = vadd.f32 %v224_v29, %v223_v9  ;;  %v283_v55 = vrot.slane %v480_v36, 7 }
  0x9c   :  { %v247_v18 = vsel %vm196_vm2, %v215_v8, 0.0  ;;  %v254_v24 = vsel %vm196_vm2, %v216_v12, 0.0  ;;  %v303_v28 = vmul.f32 %v215_v8, %v215_v8  ;;  %v304_v31 = vmul.f32 %v216_v12, %v216_v12 }
  0x9d   :  { %v248_v23 = vrot.slane %v247_v18, 4  ;;  %v255_v27 = vrot.slane %v254_v24, 4  ;;  %v491_v58 = vadd.f32 %v319_v41, %v318_v25  ;;  %v244_v59 = vadd.f32 %v243_v42, %v242_v26 }
  0x9e   :  { %v156_v13 = vpop.f32.mrf.mxu2  ;;  %v169_v14 = vpop.f32.mrf.mxu3  ;;  %v335_v35 = vsel %vm196_vm2, %v303_v28, 0.0  ;;  %v342_v39 = vsel %vm196_vm2, %v304_v31, 0.0  ;;  %v201_v62 = vsel %vm198_vm5, %v184_v45, %v185_v46  ;;  %v238_v2 = vrot.slane %v237_v50, 1 }
  0x9f   :  { %v132_v19 = vpop.f32.mrf.mxu0  ;;  %v145_v20 = vpop.f32.mrf.mxu1  ;;  %v249_v37 = vadd.f32 %v248_v23, %v247_v18  ;;  %v256_v38 = vadd.f32 %v255_v27, %v254_v24  ;;  %v336_v43 = vrot.slane %v335_v35, 4  ;;  %v343_v47 = vrot.slane %v342_v39, 4 }
  0xa0   :  { %v176_v53 = vpack.c.bf16 %v169_v14, %v156_v13  ;;  %v324_v3 = vrot.slane %v323_v51, 2  ;;  %v331_v4 = vrot.slane %v330_v52, 2  ;;  %v245_v10 = vrot.slane %v244_v59, 1 }
  0xa1   :  { %v250_v56 = vrot.slane %v249_v37, 2  ;;  %v257_v57 = vrot.slane %v256_v38, 2  ;;  %v337_v60 = vadd.f32 %v336_v43, %v335_v35  ;;  %v344_v63 = vadd.f32 %v343_v47, %v342_v39 }
  0xa2   :  { %v186_v61 = vrot.slane %v176_v53, 2  ;;  %v187_v0 = vrot.slane %v176_v53, 5  ;;  %v217_v1 = vunpack.c.l.bf16 %v176_v53  ;;  %v218_v5 = vunpack.c.h.bf16 %v176_v53 }
  0xa3   :  { %v251_v6 = vadd.f32 %v250_v56, %v249_v37  ;;  %v258_v7 = vadd.f32 %v257_v57, %v256_v38  ;;  %v338_v11 = vrot.slane %v337_v60, 2  ;;  %v345_v14 = vrot.slane %v344_v63, 2 }
  0xa4   :  { %v205_v8 = vsel %vm202_vm6, %v186_v61, %v187_v0  ;;  %v261_v9 = vsel %vm196_vm2, %v217_v1, 0.0  ;;  %v268_v16 = vsel %vm196_vm2, %v218_v5, 0.0  ;;  %v305_v17 = vmul.f32 %v217_v1, %v217_v1 }
  0xa5   :  { %v207_v12 = vsel %vm206_vm7, %v201_v62, %v205_v8  ;;  %v262_v13 = vrot.slane %v261_v9, 4  ;;  %v325_v18 = vadd.f32 %v324_v3, %v323_v51  ;;  %v332_v19 = vadd.f32 %v331_v4, %v330_v52 }
  0xa6   :  { %v158_v48 = vpop.f32.mrf.mxu2  ;;  %v171_v49 = vpop.f32.mrf.mxu3  ;;  %v208_v15 = vsel %vm44_vm0, %v197_v44, %v207_v12  ;;  %v269_v21 = vrot.slane %v268_v16, 4  ;;  %v252_v22 = vrot.slane %v251_v6, 1  ;;  %v259_v23 = vrot.slane %v258_v7, 1 }
  0xa7   :  { %210 = vst [vmem:[%s532_s2] sm:$0xff] %v208_v15  ;;  %v263_v20 = vadd.f32 %v262_v13, %v261_v9  ;;  %v306_v24 = vmul.f32 %v218_v5, %v218_v5  ;;  %v349_v25 = vsel %vm196_vm2, %v305_v17, 0.0  ;;  %v339_v26 = vadd.f32 %v338_v11, %v337_v60 }
  0xa8   :  { %v270_v28 = vadd.f32 %v269_v21, %v268_v16  ;;  %v350_v29 = vrot.slane %v349_v25, 4  ;;  %v239_v30 = vadd.f32 %v238_v2, %v237_v50  ;;  %v246_v31 = vadd.f32 %v245_v10, %v244_v59 }
  0xa9   :  { %v264_v27 = vrot.slane %v263_v20, 2  ;;  %v346_v32 = vadd.f32 %v345_v14, %v344_v63  ;;  %v356_v33 = vsel %vm196_vm2, %v306_v24, 0.0  ;;  %v326_v34 = vrot.slane %v325_v18, 1 }
  0xaa   :  { %v271_v37 = vrot.slane %v270_v28, 2  ;;  %v351_v38 = vadd.f32 %v350_v29, %v349_v25  ;;  %v333_v39 = vrot.slane %v332_v19, 1  ;;  %v253_v41 = vadd.f32 %v252_v22, %v251_v6 }
  0xab   :  { %v265_v35 = vadd.f32 %v264_v27, %v263_v20  ;;  %v260_v42 = vadd.f32 %v259_v23, %v258_v7  ;;  %v357_v43 = vrot.slane %v356_v33, 4  ;;  %v340_v44 = vrot.slane %v339_v26, 1 }
  0xac   :  { %v272_v46 = vadd.f32 %v271_v37, %v270_v28  ;;  %v352_v47 = vrot.slane %v351_v38, 2  ;;  %v284_v48 = vrot.slane %v239_v30, 6  ;;  %v285_v49 = vrot.slane %v246_v31, 5 }
  0xad   :  { %v266_v45 = vrot.slane %v265_v35, 1  ;;  %v347_v51 = vrot.slane %v346_v32, 1  ;;  %v358_v50 = vadd.f32 %v357_v43, %v356_v33  ;;  %v327_v52 = vadd.f32 %v326_v34, %v325_v18 }
  0xae   :  { %v273_v56 = vrot.slane %v272_v46, 1  ;;  %v353_v57 = vadd.f32 %v352_v47, %v351_v38  ;;  %v334_v59 = vadd.f32 %v333_v39, %v332_v19  ;;  %v286_v60 = vrot.slane %v253_v41, 4 }
  0xaf   :  { %v267_v53 = vadd.f32 %v266_v45, %v265_v35  ;;  %v287_v61 = vrot.slane %v260_v42, 3  ;;  %v359_v62 = vrot.slane %v358_v50, 2  ;;  %v341_v63 = vadd.f32 %v340_v44, %v339_v26 }
  0xb0   :  { %v274_v0 = vadd.f32 %v273_v56, %v272_v46  ;;  %v354_v2 = vrot.slane %v353_v57, 1  ;;  %v291_v3 = vsel %vm192_vm4, %v284_v48, %v285_v49  ;;  %v348_v4 = vadd.f32 %v347_v51, %v346_v32 }
  0xb1   :  { %v288_v1 = vrot.slane %v267_v53, 2  ;;  %v360_v5 = vadd.f32 %v359_v62, %v358_v50  ;;  %v290_v6 = vsel %vm188_vm3, %v488_v54, %v283_v55  ;;  %v312_v7 = vrot.slane %v483_v40, 1 }
  0xb2   :  { %v289_v8 = vrot.slane %v274_v0, 1  ;;  %v355_v9 = vadd.f32 %v354_v2, %v353_v57  ;;  %v371_v10 = vrot.slane %v491_v58, 7  ;;  %v372_v11 = vrot.slane %v327_v52, 6 }
  0xb3   :  { %v373_v12 = vrot.slane %v334_v59, 5  ;;  %v361_v13 = vrot.slane %v360_v5, 1  ;;  %v292_v14 = vsel %vm196_vm2, %v290_v6, %v291_v3  ;;  %v293_v15 = vsel %vm198_vm5, %v286_v60, %v287_v61 }
  0xb4   :  { %v374_v16 = vrot.slane %v341_v63, 4  ;;  %v294_v17 = vsel %vm202_vm6, %v288_v1, %v289_v8  ;;  %v375_v36 = vrot.slane %v348_v4, 3  ;;  %v376_v55 = vrot.slane %v355_v9, 2 }
  0xb5   :  { %v295_v18 = vsel %vm206_vm7, %v293_v15, %v294_v17  ;;  %v362_v54 = vadd.f32 %v361_v13, %v360_v5  ;;  %v313_v20 = vadd.f32 %v312_v7, %v483_v40  ;;  %v379_v58 = vsel %vm192_vm4, %v372_v11, %v373_v12 }
  0xb6   :  { %v296_v19 = vsel %vm44_vm0, %v292_v14, %v295_v18  ;;  %v381_v23 = vsel %vm198_vm5, %v374_v16, %v375_v36 }
  0xb7   :  { %298 = vst [vmem:[%s533_s3] sm:$0xff] %v296_v19  ;;  %v377_v21 = vrot.slane %v362_v54, 1  ;;  %v378_v22 = vsel %vm188_vm3, %v313_v20, %v371_v10 }
  0xb8   :  { %v380_v25 = vsel %vm196_vm2, %v378_v22, %v379_v58 }
  0xb9   :  { %v382_v24 = vsel %vm202_vm6, %v376_v55, %v377_v21 }
  0xba   :  { %v383_v26 = vsel %vm206_vm7, %v381_v23, %v382_v24 }
  0xbb   :  { %v384_v27 = vsel %vm44_vm0, %v380_v25, %v383_v26 }
  0xbc   :  { %386 = vst [vmem:[%s534_s4] sm:$0xff] %v384_v27 }

// kernel: tile.57
= control target key start
LH: loop header
LB: loop body
LE: loop exit
PB: predicated region body
PF: predicated region fallthrough
CT: control target
= control target key end

     0   :  { %s28_s0 = inlined_call_operand.vmem [shape: f32[32], index: 0, kind: input, shape index: {}]   ;;  %s29_s1 = inlined_call_operand.vmem [shape: f32[9,32], index: 1, kind: output, shape index: {}]  }
   0x1   :  { %v4_v0 = vld [vmem:[%s28_s0] ss:$0 sm:$0xff] }
   0x2   :  { %5 = vst [vmem:[%s29_s1] sm:$0xff] %v4_v0 }
   0x3   :  { %8 = vst [vmem:[%s29_s1 + $0x8] sm:$0xff] %v4_v0 }

// kernel: tile.59
= control target key start
LH: loop header
LB: loop body
LE: loop exit
PB: predicated region body
PF: predicated region fallthrough
CT: control target
= control target key end

     0   :  { %s6_s6 = smov 3  ;;  %s52_s9 = smov 96   ;;  %vm3_vm0 = vcmask 261120   ;;  %vm10_vm1 = vcmask 1048320   ;;  %vm17_vm2 = vcmask 785920   ;;  %vm24_vm3 = vcmask 523520   ;;  %s86_s0 = inlined_call_operand.vmem [shape: f32[9,32], index: 0, kind: input, shape index: {}]   ;;  %s87_s1 = inlined_call_operand.vmem [shape: f32[1,288], index: 1, kind: output, shape index: {}]  }
   0x1   :  { %v44_v0 = vld [vmem:[%s86_s0 + $0x3] ss:$4 sm:%s6_s6]   ;;  %s20_s10 = smov 3  ;;  %s13_s13 = smov 3 }
   0x2   :  { %8 = vrot.lane.b32.xlu0 %v44_v0, %s52_s9  ;;  %v46_v1 = vld [vmem:[%s86_s0 + $0x1] ss:$4 sm:%s20_s10]   ;;  %s53_s14 = smov 32   ;;  %s54_s17 = smov 64  }
   0x3   :  { %22 = vrot.lane.b32.xlu1 %v46_v1, %s53_s14  ;;  %v45_v2 = vld [vmem:[%s86_s0 + $0x2] ss:$4 sm:%s13_s13]   ;;  %v2_v3 = vld [vmem:[%s86_s0] ss:$4 sm:$0x7]  }
   0x4   :  { %4 = vst.msk [vmem:[#allocation0] ss:$8 sm:$0x7] %vm3_vm0, %v2_v3  }
   0xa   :  { %15 = vrot.lane.b32.xlu0 %v45_v2, %s54_s17 }
   0xb   :  { %v39_v4 = vld [vmem:[#allocation0 + $0x10] sm:$0x1] }
   0xc   :  { %48 = vst [vmem:[%s87_s1 + $0x2] sm:$0x1] %v39_v4 }
  0x74   :  { %v9_v5 = vpop.permute.xlu0 %8  }
  0x75   :  { %11 = vst.msk [vmem:[#allocation0] ss:$8 sm:$0x3] %vm10_vm1, %v9_v5   ;;  %v23_v6 = vpop.permute.xlu1 %22  }
  0x7c   :  { %v16_v7 = vpop.permute.xlu0 %15  }
  0x7d   :  { %18 = vst.msk [vmem:[#allocation0] ss:$8 sm:$0x3] %vm17_vm2, %v16_v7  }
  0x7e   :  { %25 = vst.msk [vmem:[#allocation0] ss:$8 sm:$0x3] %vm24_vm3, %v23_v6  }
  0x85   :  { %v28_v8 = vld [vmem:[#allocation0] sm:$0x1]  ;;  %v33_v9 = vld [vmem:[#allocation0 + $0x8] sm:$0x1] }
  0x86   :  { %31 = vst [vmem:[%s87_s1] sm:$0x1] %v28_v8 }
  0x87   :  { %47 = vst [vmem:[%s87_s1 + $0x1] sm:$0x1] %v33_v9 }

// kernel: generator_forward.6
= control target key start
LH: loop header
LB: loop body
LE: loop exit
PB: predicated region body
PF: predicated region fallthrough
CT: control target
= control target key end

     0   :  { %vm435_vm0 = vcmask 523264   ;;  %s1041_s1 = inlined_call_operand.vmem [shape: bf16[576,128], index: 1, kind: input, shape index: {}]   ;;  %s1042_s0 = inlined_call_operand.vmem [shape: bf16[32,576], index: 0, kind: input, shape index: {}]   ;;  %s1043_s2 = inlined_call_operand.vmem [shape: f32[1,576], index: 2, kind: input, shape index: {}]   ;;  %s1044_s3 = inlined_call_operand.vmem [shape: f32[1,576], index: 3, kind: input, shape index: {}]   ;;  %s1045_s4 = inlined_call_operand.vmem [shape: bf16[32,128], index: 4, kind: output, shape index: {0}]   ;;  %s1046_s5 = inlined_call_operand.vmem [shape: f32[1,1,128], index: 5, kind: output, shape index: {1}]   ;;  %s1047_s6 = inlined_call_operand.vmem [shape: f32[1,1,128], index: 6, kind: output, shape index: {2}]  }
   0x1   :  { %v738_v0 = vld [vmem:[%s1041_s1 + $0x38] sm:$0xff]  ;;  %v737_v4 = vld [vmem:[%s1041_s1 + $0x30] sm:$0xff]  ;;  %v736_v8 = vld [vmem:[%s1041_s1 + $0x28] sm:$0xff] }
   0x2   :  { %v746_v1 = vld [vmem:[%s1041_s1 + $0x78] sm:$0xff]  ;;  %442 = vmatpush.bf16.msra.mxu0 %v738_v0  ;;  %v745_v5 = vld [vmem:[%s1041_s1 + $0x70] sm:$0xff]  ;;  %v744_v9 = vld [vmem:[%s1041_s1 + $0x68] sm:$0xff] }
   0x3   :  { %v754_v2 = vld [vmem:[%s1041_s1 + $0xb8] sm:$0xff]  ;;  %461 = vmatpush.bf16.msra.mxu1 %v746_v1  ;;  %v753_v6 = vld [vmem:[%s1041_s1 + $0xb0] sm:$0xff]  ;;  %v752_v10 = vld [vmem:[%s1041_s1 + $0xa8] sm:$0xff] }
   0x4   :  { %v762_v3 = vld [vmem:[%s1041_s1 + $0xf8] sm:$0xff]  ;;  %480 = vmatpush.bf16.msra.mxu2 %v754_v2  ;;  %v761_v7 = vld [vmem:[%s1041_s1 + $0xf0] sm:$0xff]  ;;  %v760_v11 = vld [vmem:[%s1041_s1 + $0xe8] sm:$0xff] }
   0x5   :  { %499 = vmatpush.bf16.msra.mxu3 %v762_v3  ;;  %v735_v12 = vld [vmem:[%s1041_s1 + $0x20] sm:$0xff]  ;;  %v24_v17 = vld [vmem:[%s1042_s0 + $0x14] sm:$0xff]  ;;  %v22_v25 = vld [vmem:[%s1042_s0 + $0x8] sm:$0xff] }
   0x6   :  { %443 = vmatpush.bf16.msra.mxu0 %v737_v4  ;;  %v743_v13 = vld [vmem:[%s1041_s1 + $0x60] sm:$0xff]  ;;  %v38_v20 = vunpack.c.l.bf16 %v24_v17  ;;  %v39_v24 = vunpack.c.h.bf16 %v24_v17  ;;  %v35_v28 = vunpack.c.l.bf16 %v22_v25  ;;  %v734_v30 = vld [vmem:[%s1041_s1 + $0x18] sm:$0xff]  ;;  %v36_v37 = vunpack.c.h.bf16 %v22_v25  ;;  %v733_v47 = vld [vmem:[%s1041_s1 + $0x10] sm:$0xff] }
   0x7   :  { %462 = vmatpush.bf16.msra.mxu1 %v745_v5  ;;  %v751_v14 = vld [vmem:[%s1041_s1 + $0xa0] sm:$0xff]  ;;  %v742_v31 = vld [vmem:[%s1041_s1 + $0x58] sm:$0xff]  ;;  %v741_v48 = vld [vmem:[%s1041_s1 + $0x50] sm:$0xff] }
   0x8   :  { %481 = vmatpush.bf16.msra.mxu2 %v753_v6  ;;  %v21_v15 = vld [vmem:[%s1042_s0] sm:$0xff]  ;;  %v750_v33 = vld [vmem:[%s1041_s1 + $0x98] sm:$0xff]  ;;  %v749_v50 = vld [vmem:[%s1041_s1 + $0x90] sm:$0xff] }
   0x9   :  { %500 = vmatpush.bf16.msra.mxu3 %v761_v7  ;;  %v759_v16 = vld [vmem:[%s1041_s1 + $0xe0] sm:$0xff]  ;;  %v33_v18 = vunpack.c.l.bf16 %v21_v15  ;;  %v34_v23 = vunpack.c.h.bf16 %v21_v15  ;;  %v758_v34 = vld [vmem:[%s1041_s1 + $0xd8] sm:$0xff]  ;;  %v757_v51 = vld [vmem:[%s1041_s1 + $0xd0] sm:$0xff] }
   0xa   :  { %444 = vmatpush.bf16.msra.mxu0 %v736_v8  ;;  %v874_v19 = vld [vmem:[%s1043_s2] sm:$0x1f]  ;;  %v732_v60 = vld [vmem:[%s1041_s1 + $0x8] sm:$0xff] }
   0xb   :  { %463 = vmatpush.bf16.msra.mxu1 %v744_v9  ;;  %v877_v21 = vperm.slane %v874_v19, 0  ;;  %v882_v22 = vld [vmem:[%s1044_s3] sm:$0x1f]  ;;  %v891_v27 = vperm.slane %v874_v19, 1  ;;  %v900_v32 = vperm.slane %v874_v19, 2  ;;  %v924_v46 = vperm.slane %v874_v19, 3 }
   0xc   :  { %482 = vmatpush.bf16.msra.mxu2 %v752_v10  ;;  %v25_v26 = vld [vmem:[%s1042_s0 + $0x1c] sm:$0xff]  ;;  %v909_v35 = vperm.slane %v882_v22, 0  ;;  %v912_v36 = vperm.slane %v882_v22, 1  ;;  %v921_v45 = vperm.slane %v882_v22, 2  ;;  %v933_v49 = vperm.slane %v882_v22, 3  ;;  %v740_v61 = vld [vmem:[%s1041_s1 + $0x48] sm:$0xff] }
   0xd   :  { %501 = vmatpush.bf16.msra.mxu3 %v760_v11  ;;  %v40_v29 = vunpack.c.l.bf16 %v25_v26  ;;  %v41_v38 = vunpack.c.h.bf16 %v25_v26  ;;  %v65_v39 = vmul.f32 %v877_v21, %v33_v18  ;;  %v70_v40 = vmul.f32 %v877_v21, %v38_v20  ;;  %v748_v0 = vld [vmem:[%s1041_s1 + $0x88] sm:$0xff]  ;;  %v30_v9 = vld [vmem:[%s1042_s0 + $0x3c] sm:$0xff] }
   0xe   :  { %445 = vmatpush.bf16.msra.mxu0 %v735_v12  ;;  %v66_v41 = vmul.f32 %v891_v27, %v34_v23  ;;  %v71_v42 = vmul.f32 %v891_v27, %v39_v24  ;;  %v67_v43 = vmul.f32 %v900_v32, %v35_v28  ;;  %v68_v52 = vmul.f32 %v924_v46, %v36_v37  ;;  %v756_v1 = vld [vmem:[%s1041_s1 + $0xc8] sm:$0xff]  ;;  %v731_v10 = vld [vmem:[%s1041_s1] sm:$0xff]  ;;  %v766_v23 = vld [vmem:[%s1041_s1 + $0x118] sm:$0xff] }
   0xf   :  { %464 = vmatpush.bf16.msra.mxu1 %v743_v13  ;;  %v72_v44 = vmul.f32 %v900_v32, %v40_v29  ;;  %v73_v53 = vmul.f32 %v924_v46, %v41_v38  ;;  %v97_v54 = vadd.f32 %v909_v35, %v65_v39  ;;  %v102_v55 = vadd.f32 %v909_v35, %v70_v40  ;;  %v27_v8 = vld [vmem:[%s1042_s0 + $0x28] sm:$0xff]  ;;  %v739_v11 = vld [vmem:[%s1041_s1 + $0x40] sm:$0xff]  ;;  %v765_v38 = vld [vmem:[%s1041_s1 + $0x110] sm:$0xff] }
  0x10   :  { %483 = vmatpush.bf16.msra.mxu2 %v751_v14  ;;  %v98_v56 = vadd.f32 %v912_v36, %v66_v41  ;;  %v103_v57 = vadd.f32 %v912_v36, %v71_v42  ;;  %v99_v58 = vadd.f32 %v921_v45, %v67_v43  ;;  %v100_v62 = vadd.f32 %v933_v49, %v68_v52  ;;  %v28_v14 = vld [vmem:[%s1042_s0 + $0x30] sm:$0xff]  ;;  %v747_v15 = vld [vmem:[%s1041_s1 + $0x80] sm:$0xff] }
  0x11   :  { %502 = vmatpush.bf16.msra.mxu3 %v759_v16  ;;  %v104_v59 = vadd.f32 %v921_v45, %v72_v44  ;;  %v105_v63 = vadd.f32 %v933_v49, %v73_v53  ;;  %v117_v2 = vmax.f32 %v97_v54, 0.0  ;;  %v122_v3 = vmax.f32 %v102_v55, 0.0  ;;  %v755_v16 = vld [vmem:[%s1041_s1 + $0xc0] sm:$0xff] }
  0x12   :  { %446 = vmatpush.bf16.msra.mxu0 %v734_v30  ;;  %v118_v4 = vmax.f32 %v98_v56, 0.0  ;;  %v123_v5 = vmax.f32 %v103_v57, 0.0  ;;  %v119_v6 = vmax.f32 %v99_v58, 0.0  ;;  %v120_v12 = vmax.f32 %v100_v62, 0.0  ;;  %v31_v17 = vld [vmem:[%s1042_s0 + $0x44] sm:$0xff] }
  0x13   :  { %465 = vmatpush.bf16.msra.mxu1 %v742_v31  ;;  %v124_v7 = vmax.f32 %v104_v59, 0.0  ;;  %v125_v13 = vmax.f32 %v105_v63, 0.0  ;;  %v137_v18 = vpack.c.bf16 %v122_v3, %v117_v2  ;;  %v43_v24 = vunpack.c.l.bf16 %v27_v8  ;;  %v32_v63 = vld [vmem:[%s1042_s0 + $0x4c] sm:$0xf] }
  0x14   :  { %484 = vmatpush.bf16.msra.mxu2 %v750_v33  ;;  %v138_v20 = vpack.c.bf16 %v123_v5, %v118_v4  ;;  %v48_v25 = vunpack.c.l.bf16 %v30_v9  ;;  %v44_v28 = vunpack.c.h.bf16 %v27_v8  ;;  %v49_v29 = vunpack.c.h.bf16 %v30_v9 }
  0x15   :  { %503 = vmatpush.bf16.msra.mxu3 %v758_v34  ;;  %v139_v26 = vpack.c.bf16 %v124_v7, %v119_v6  ;;  %v45_v30 = vunpack.c.l.bf16 %v28_v14  ;;  %v140_v31 = vpack.c.bf16 %v125_v13, %v120_v12  ;;  %v50_v33 = vunpack.c.l.bf16 %v31_v17 }
  0x16   :  { %447 = vmatpush.bf16.msra.mxu0 %v733_v47  ;;  %v46_v34 = vunpack.c.h.bf16 %v28_v14  ;;  %v51_v37 = vunpack.c.h.bf16 %v31_v17  ;;  %v75_v39 = vmul.f32 %v877_v21, %v43_v24  ;;  %v80_v40 = vmul.f32 %v877_v21, %v48_v25 }
  0x17   :  { %466 = vmatpush.bf16.msra.mxu1 %v741_v48  ;;  %v76_v41 = vmul.f32 %v891_v27, %v44_v28  ;;  %v81_v42 = vmul.f32 %v891_v27, %v49_v29  ;;  %v77_v43 = vmul.f32 %v900_v32, %v45_v30  ;;  %v82_v44 = vmul.f32 %v900_v32, %v50_v33  ;;  %v764_v27 = vld [vmem:[%s1041_s1 + $0x108] sm:$0xff] }
  0x18   :  { %485 = vmatpush.bf16.msra.mxu2 %v749_v50  ;;  %v78_v47 = vmul.f32 %v924_v46, %v46_v34  ;;  %v83_v48 = vmul.f32 %v924_v46, %v51_v37  ;;  %v107_v21 = vadd.f32 %v909_v35, %v75_v39  ;;  %v112_v50 = vadd.f32 %v909_v35, %v80_v40  ;;  %v763_v35 = vld [vmem:[%s1041_s1 + $0x100] sm:$0xff] }
  0x19   :  { %504 = vmatpush.bf16.msra.mxu3 %v757_v51  ;;  %v108_v51 = vadd.f32 %v912_v36, %v76_v41  ;;  %v113_v52 = vadd.f32 %v912_v36, %v81_v42  ;;  %v109_v32 = vadd.f32 %v921_v45, %v77_v43  ;;  %v114_v53 = vadd.f32 %v921_v45, %v82_v44  ;;  %v23_v36 = vld [vmem:[%s1042_s0 + $0x10] sm:$0xf]  ;;  %v26_v45 = vld [vmem:[%s1042_s0 + $0x24] sm:$0xf] }
  0x1a   :  { %448 = vmatpush.bf16.msra.mxu0 %v732_v60  ;;  %v110_v46 = vadd.f32 %v933_v49, %v78_v47  ;;  %v115_v54 = vadd.f32 %v933_v49, %v83_v48  ;;  %v127_v55 = vmax.f32 %v107_v21, 0.0  ;;  %v132_v56 = vmax.f32 %v112_v50, 0.0  ;;  %v29_v49 = vld [vmem:[%s1042_s0 + $0x38] sm:$0xf] }
  0x1b   :  { %467 = vmatpush.bf16.msra.mxu1 %v740_v61  ;;  %v128_v57 = vmax.f32 %v108_v51, 0.0  ;;  %v133_v58 = vmax.f32 %v113_v52, 0.0  ;;  %v129_v59 = vmax.f32 %v109_v32, 0.0  ;;  %v134_v60 = vmax.f32 %v114_v53, 0.0 }
  0x1c   :  { %486 = vmatpush.bf16.msra.mxu2 %v748_v0  ;;  %v130_v61 = vmax.f32 %v110_v46, 0.0  ;;  %v135_v62 = vmax.f32 %v115_v54, 0.0  ;;  %v142_v0 = vpack.c.bf16 %v132_v56, %v127_v55  ;;  %v59_v2 = vperm.slane %v874_v19, 4 }
  0x1d   :  { %505 = vmatpush.bf16.msra.mxu3 %v756_v1  ;;  %v37_v1 = vunpack.c.l.bf16 %v23_v36  ;;  %v143_v3 = vpack.c.bf16 %v133_v58, %v128_v57  ;;  %v42_v4 = vunpack.c.l.bf16 %v26_v45  ;;  %v47_v5 = vunpack.c.l.bf16 %v29_v49 }
  0x1e   :  { %449 = vmatpush.bf16.msra.mxu0 %v731_v10  ;;  %v52_v6 = vunpack.c.l.bf16 %v32_v63  ;;  %v144_v7 = vpack.c.bf16 %v134_v60, %v129_v59  ;;  %v145_v8 = vpack.c.bf16 %v135_v62, %v130_v61 }
  0x1f   :  { %468 = vmatpush.bf16.msra.mxu1 %v739_v11  ;;  %v69_v9 = vmul.f32 %v59_v2, %v37_v1  ;;  %v74_v10 = vmul.f32 %v59_v2, %v42_v4  ;;  %v91_v11 = vperm.slane %v882_v22, 4  ;;  %v79_v12 = vmul.f32 %v59_v2, %v47_v5 }
  0x20   :  { %487 = vmatpush.bf16.msra.mxu2 %v747_v15  ;;  %v84_v13 = vmul.f32 %v59_v2, %v52_v6 }
  0x21   :  { %506 = vmatpush.bf16.msra.mxu3 %v755_v16  ;;  %450 = vmatmul.bf16.vlgmr.msra.gmra.mxu0 %v137_v18  ;;  %v101_v14 = vadd.f32 %v91_v11, %v69_v9  ;;  %v106_v15 = vadd.f32 %v91_v11, %v74_v10  ;;  %v111_v16 = vadd.f32 %v91_v11, %v79_v12 }
  0x22   :  { %522 = vmatpush.bf16.msrb.mxu0 %v766_v23  ;;  %469 = vmatmul.bf16.vlgmr.msra.gmra.mxu1 %v138_v20  ;;  %v116_v19 = vadd.f32 %v91_v11, %v84_v13 }
  0x23   :  { %778 = vmatpush.bf16.msrb.mxu1 %v766_v23  ;;  %488 = vmatmul.bf16.vlgmr.msra.gmra.mxu2 %v139_v26  ;;  %v121_v17 = vmax.f32 %v101_v14, 0.0  ;;  %v126_v18 = vmax.f32 %v106_v15, 0.0  ;;  %v131_v20 = vmax.f32 %v111_v16, 0.0 }
  0x24   :  { %507 = vmatmul.bf16.vlgmr.msra.gmra.mxu3 %v140_v31  ;;  %v136_v23 = vmax.f32 %v116_v19, 0.0 }
  0x25   :  { %v141_v24 = vpack.c.bf16 %v126_v18, %v121_v17 }
  0x26   :  { %523 = vmatpush.bf16.msrb.mxu0 %v765_v38  ;;  %v146_v25 = vpack.c.bf16 %v136_v23, %v131_v20 }
  0x27   :  { %779 = vmatpush.bf16.msrb.mxu1 %v765_v38 }
  0x2a   :  { %524 = vmatpush.bf16.msrb.mxu0 %v764_v27 }
  0x2b   :  { %780 = vmatpush.bf16.msrb.mxu1 %v764_v27 }
  0x2e   :  { %525 = vmatpush.bf16.msrb.mxu0 %v763_v35 }
  0x2f   :  { %781 = vmatpush.bf16.msrb.mxu1 %v763_v35 }
  0x31   :  { %455 = vmatmul.bf16.gmra.mxu0 %v142_v0 }
  0x32   :  { %474 = vmatmul.bf16.gmra.mxu1 %v143_v3 }
  0x33   :  { %493 = vmatmul.bf16.gmra.mxu2 %v144_v7 }
  0x34   :  { %512 = vmatmul.bf16.gmra.mxu3 %v145_v8 }
  0x41   :  { %729 = vmatmul.msk.bf16.vlgmr.msrb.gmra.mxu0 %vm435_vm0, %v141_v24 }
  0x42   :  { %730 = vmatmul.msk.bf16.vlgmr.msrb.gmra.mxu1 %vm435_vm0, %v146_v25 }
  0x9e   :  { %v451_v26 = vpop.f32.mrf.mxu0 }
  0x9f   :  { %v470_v28 = vpop.f32.mrf.mxu1 }
  0xa0   :  { %v471_v42 = vadd.f32 %v470_v28, %v451_v26 }
  0xa6   :  { %v489_v22 = vpop.f32.mrf.mxu2  ;;  %v453_v30 = vpop.f32.mrf.mxu0 }
  0xa7   :  { %v508_v29 = vpop.f32.mrf.mxu3  ;;  %v472_v31 = vpop.f32.mrf.mxu1  ;;  %v490_v44 = vadd.f32 %v489_v22, %v471_v42 }
  0xa8   :  { %v473_v52 = vadd.f32 %v472_v31, %v453_v30 }
  0xa9   :  { %v509_v50 = vadd.f32 %v508_v29, %v490_v44 }
  0xae   :  { %v491_v33 = vpop.f32.mrf.mxu2  ;;  %v456_v37 = vpop.f32.mrf.mxu0 }
  0xaf   :  { %v510_v34 = vpop.f32.mrf.mxu3  ;;  %v475_v38 = vpop.f32.mrf.mxu1  ;;  %v492_v46 = vadd.f32 %v491_v33, %v473_v52 }
  0xb0   :  { %v476_v47 = vadd.f32 %v475_v38, %v456_v37 }
  0xb1   :  { %v511_v57 = vadd.f32 %v510_v34, %v492_v46 }
  0xb6   :  { %v494_v39 = vpop.f32.mrf.mxu2  ;;  %v458_v40 = vpop.f32.mrf.mxu0 }
  0xb7   :  { %v477_v41 = vpop.f32.mrf.mxu1  ;;  %v513_v43 = vpop.f32.mrf.mxu3  ;;  %v495_v48 = vadd.f32 %v494_v39, %v476_v47 }
  0xb8   :  { %v478_v32 = vadd.f32 %v477_v41, %v458_v40 }
  0xb9   :  { %v514_v54 = vadd.f32 %v513_v43, %v495_v48 }
  0xbe   :  { %v496_v21 = vpop.f32.mrf.mxu2  ;;  %v527_v27 = vpop.f32.mrf.mxu0 }
  0xbf   :  { %v532_v51 = vpop.f32.mrf.mxu1  ;;  %v528_v53 = vadd.f32 %v527_v27, %v509_v50  ;;  %v497_v55 = vadd.f32 %v496_v21, %v478_v32  ;;  %v515_v56 = vpop.f32.mrf.mxu3 }
  0xc0   :  { %v533_v35 = vadd.f32 %v532_v51, %v514_v54 }
  0xc1   :  { %v537_v36 = vpack.c.bf16 %v528_v53, %v528_v53  ;;  %v516_v58 = vadd.f32 %v515_v56, %v497_v55 }
  0xc2   :  { %v539_v59 = vpack.c.bf16 %v533_v35, %v533_v35 }
  0xc3   :  { %v545_v62 = vunpack.c.l.bf16 %v537_v36 }
  0xc4   :  { %v547_v3 = vunpack.c.l.bf16 %v539_v59 }
  0xc5   :  { %v559_v5 = vmul.f32 %v545_v62, %v545_v62 }
  0xc6   :  { %v529_v45 = vpop.f32.mrf.mxu0  ;;  %v561_v9 = vmul.f32 %v547_v3, %v547_v3 }
  0xc7   :  { %v534_v49 = vpop.f32.mrf.mxu1  ;;  %v530_v60 = vadd.f32 %v529_v45, %v511_v57 }
  0xc8   :  { %v535_v61 = vadd.f32 %v534_v49, %v516_v58 }
  0xc9   :  { %v538_v63 = vpack.c.bf16 %v530_v60, %v530_v60  ;;  %v770_v0 = vpack.c.bf16 %v530_v60, %v528_v53 }
  0xca   :  { %v540_v1 = vpack.c.bf16 %v535_v61, %v535_v61  ;;  %v775_v2 = vpack.c.bf16 %v535_v61, %v533_v35 }
  0xcb   :  { %771 = vst [vmem:[%s1045_s4] sm:$0xff] %v770_v0   ;;  %v546_v4 = vunpack.c.l.bf16 %v538_v63 }
  0xcc   :  { %777 = vst [vmem:[%s1045_s4 + $0x8] sm:$0xff] %v775_v2   ;;  %v548_v8 = vunpack.c.l.bf16 %v540_v1 }
  0xcd   :  { %v549_v6 = vadd.f32 %v546_v4, %v545_v62  ;;  %v560_v7 = vmul.f32 %v546_v4, %v546_v4 }
  0xce   :  { %v562_v13 = vmul.f32 %v548_v8, %v548_v8 }
  0xcf   :  { %v563_v10 = vadd.f32 %v560_v7, %v559_v5  ;;  %v550_v11 = vadd.f32 %v549_v6, %v547_v3 }
  0xd1   :  { %v551_v12 = vadd.f32 %v550_v11, %v548_v8  ;;  %v564_v14 = vadd.f32 %v563_v10, %v561_v9 }
  0xd3   :  { %v552_v15 = vrot.slane %v551_v12, 4  ;;  %v565_v16 = vadd.f32 %v564_v14, %v562_v13 }
  0xd5   :  { %v553_v19 = vadd.f32 %v552_v15, %v551_v12  ;;  %v566_v17 = vrot.slane %v565_v16, 4 }
  0xd7   :  { %v554_v18 = vrot.slane %v553_v19, 2  ;;  %v567_v20 = vadd.f32 %v566_v17, %v565_v16 }
  0xd9   :  { %v555_v23 = vadd.f32 %v554_v18, %v553_v19  ;;  %v568_v24 = vrot.slane %v567_v20, 2 }
  0xdb   :  { %v556_v25 = vrot.slane %v555_v23, 1  ;;  %v569_v26 = vadd.f32 %v568_v24, %v567_v20 }
  0xdd   :  { %v557_v28 = vadd.f32 %v556_v25, %v555_v23  ;;  %v570_v22 = vrot.slane %v569_v26, 1 }
  0xdf   :  { %558 = vst [vmem:[%s1046_s5] sm:$0x1] %v557_v28  ;;  %v571_v29 = vadd.f32 %v570_v22, %v569_v26 }
  0xe1   :  { %572 = vst [vmem:[%s1047_s6] sm:$0x1] %v571_v29 }

// kernel: tile.67
= control target key start
LH: loop header
LB: loop body
LE: loop exit
PB: predicated region body
PF: predicated region fallthrough
CT: control target
= control target key end

     0   :  { %s28_s0 = inlined_call_operand.vmem [shape: f32[16], index: 0, kind: input, shape index: {}]   ;;  %s29_s1 = inlined_call_operand.vmem [shape: f32[9,16], index: 1, kind: output, shape index: {}]  }
   0x1   :  { %v4_v0 = vld [vmem:[%s28_s0] ss:$0 sm:$0xff] }
   0x2   :  { %5 = vst [vmem:[%s29_s1] sm:$0xff] %v4_v0 }
   0x3   :  { %8 = vst [vmem:[%s29_s1 + $0x8] sm:$0xff] %v4_v0 }

// kernel: tile.69
= control target key start
LH: loop header
LB: loop body
LE: loop exit
PB: predicated region body
PF: predicated region fallthrough
CT: control target
= control target key end

     0   :  { %s75_s10 = smov 112   ;;  %s76_s11 = smov 80   ;;  %vm4_vm0 = vcmask 130048   ;;  %vm10_vm1 = vcmask 1048448   ;;  %vm16_vm2 = vcmask 917248   ;;  %vm22_vm3 = vcmask 786048   ;;  %s122_s0 = inlined_call_operand.vmem [shape: f32[9,16], index: 0, kind: input, shape index: {}]   ;;  %s123_s1 = inlined_call_operand.vmem [shape: f32[1,144], index: 1, kind: output, shape index: {}]  }
   0x1   :  { %v60_v0 = vld [vmem:[%s122_s0 + $0x7] sm:$0x1]   ;;  %v62_v1 = vld [vmem:[%s122_s0 + $0x5] sm:$0x1]   ;;  %v64_v2 = vld [vmem:[%s122_s0 + $0x3] sm:$0x1]  }
   0x2   :  { %8 = vrot.lane.b32.xlu0 %v60_v0, %s75_s10  ;;  %20 = vrot.lane.b32.xlu1 %v62_v1, %s76_s11  ;;  %s77_s14 = smov 48   ;;  %v61_v3 = vld [vmem:[%s122_s0 + $0x6] sm:$0x1]   ;;  %v63_v4 = vld [vmem:[%s122_s0 + $0x4] sm:$0x1]   ;;  %s78_s21 = smov 96  }
   0x3   :  { %32 = vrot.lane.b32.xlu2 %v64_v2, %s77_s14  ;;  %v65_v5 = vld [vmem:[%s122_s0 + $0x2] sm:$0x1]   ;;  %s79_s22 = smov 64   ;;  %s80_s23 = smov 32   ;;  %v66_v6 = vld [vmem:[%s122_s0 + $0x1] sm:$0x1]  }
   0x4   :  { %s81_s26 = smov 16   ;;  %s2_s27 = smov 3  ;;  %vm28_vm4 = vcmask 654848   ;;  %vm34_vm5 = vcmask 523648   ;;  %vm40_vm6 = vcmask 392448   ;;  %vm46_vm7 = vcmask 261248  }
   0x5   :  { %v3_v7 = vld [vmem:[%s122_s0] ss:$8 sm:%s2_s27]  }
   0x6   :  { %5 = vst.msk [vmem:[#allocation0] ss:$8 sm:$0x3] %vm4_vm0, %v3_v7  }
   0xa   :  { %14 = vrot.lane.b32.xlu0 %v61_v3, %s78_s21  ;;  %26 = vrot.lane.b32.xlu1 %v63_v4, %s79_s22 }
   0xb   :  { %38 = vrot.lane.b32.xlu2 %v65_v5, %s80_s23 }
   0xd   :  { %v55_v8 = vld [vmem:[#allocation0 + $0x8] sm:$0x1] }
   0xe   :  { %67 = vst [vmem:[%s123_s1 + $0x1] sm:$0x1] %v55_v8 }
  0x12   :  { %44 = vrot.lane.b32.xlu0 %v66_v6, %s81_s26 }
  0x5d   :  { %v33_v9 = vpop.permute.xlu2 %32  }
  0x65   :  { %v39_v10 = vpop.permute.xlu2 %38  }
  0x74   :  { %v9_v11 = vpop.permute.xlu0 %8   ;;  %v21_v12 = vpop.permute.xlu1 %20  }
  0x75   :  { %11 = vst.msk [vmem:[#allocation0] sm:$0x1] %vm10_vm1, %v9_v11  }
  0x7c   :  { %v15_v13 = vpop.permute.xlu0 %14   ;;  %v27_v14 = vpop.permute.xlu1 %26  }
  0x7d   :  { %17 = vst.msk [vmem:[#allocation0] sm:$0x1] %vm16_vm2, %v15_v13  }
  0x7e   :  { %23 = vst.msk [vmem:[#allocation0] sm:$0x1] %vm22_vm3, %v21_v12  }
  0x7f   :  { %29 = vst.msk [vmem:[#allocation0] sm:$0x1] %vm28_vm4, %v27_v14  }
  0x80   :  { %35 = vst.msk [vmem:[#allocation0] sm:$0x1] %vm34_vm5, %v33_v9  }
  0x81   :  { %41 = vst.msk [vmem:[#allocation0] sm:$0x1] %vm40_vm6, %v39_v10  }
  0x84   :  { %v45_v15 = vpop.permute.xlu0 %44  }
  0x85   :  { %47 = vst.msk [vmem:[#allocation0] sm:$0x1] %vm46_vm7, %v45_v15  }
  0x8c   :  { %v50_v16 = vld [vmem:[#allocation0] sm:$0x1] }
  0x8d   :  { %53 = vst [vmem:[%s123_s1] sm:$0x1] %v50_v16 }

// kernel: generator_forward.7
= control target key start
LH: loop header
LB: loop body
LE: loop exit
PB: predicated region body
PF: predicated region fallthrough
CT: control target
= control target key end

     0   :  { %vm429_vm0 = vcmask 261120   ;;  %vm617_vm1 = vcmask 519168   ;;  %vm650_vm2 = vcmask 523264   ;;  %vm688_vm3 = vcmask 516096   ;;  %s1353_s1 = inlined_call_operand.vmem [shape: bf16[288,64], index: 1, kind: input, shape index: {}]   ;;  %s1354_s0 = inlined_call_operand.vmem [shape: bf16[128,288], index: 0, kind: input, shape index: {}]   ;;  %s1355_s2 = inlined_call_operand.vmem [shape: f32[1,288], index: 2, kind: input, shape index: {}]   ;;  %s1356_s3 = inlined_call_operand.vmem [shape: f32[1,288], index: 3, kind: input, shape index: {}]   ;;  %s1357_s4 = inlined_call_operand.vmem [shape: bf16[128,64], index: 4, kind: output, shape index: {0}]   ;;  %s1358_s5 = inlined_call_operand.vmem [shape: f32[1,1,64], index: 5, kind: output, shape index: {1}]   ;;  %s1359_s6 = inlined_call_operand.vmem [shape: f32[1,1,64], index: 6, kind: output, shape index: {2}]  }
   0x1   :  { %v843_v0 = vld [vmem:[%s1353_s1 + $0x38] sm:$0xff]  ;;  %v853_v2 = vld [vmem:[%s1353_s1 + $0x88] sm:$0xff]  ;;  %v842_v3 = vld [vmem:[%s1353_s1 + $0x30] sm:$0xff] }
   0x2   :  { %v911_v1 = vld [vmem:[%s1353_s1 + $0x78] sm:$0xff]  ;;  %454 = vmatpush.bf16.msra.mxu0 %v843_v0  ;;  %854 = vmatpush.bf16.msra.mxu3 %v843_v0  ;;  %v922_v4 = vld [vmem:[%s1353_s1 + $0x70] sm:$0xff]  ;;  %v852_v5 = vld [vmem:[%s1353_s1 + $0x80] sm:$0xff] }
   0x3   :  { %v22_v6 = vld [vmem:[%s1354_s0 + $0x8] sm:$0xf]  ;;  %503 = vmatpush.bf16.msra.mxu1 %v911_v1  ;;  %558 = vmatpush.bf16.msra.mxu2 %v853_v2  ;;  %v24_v7 = vld [vmem:[%s1354_s0 + $0x14] sm:$0xf]  ;;  %v101_v9 = vld [vmem:[%s1355_s2] sm:$0x7] }
   0x4   :  { %v55_v8 = vunpack.c.l.bf16 %v22_v6  ;;  %v157_v10 = vld [vmem:[%s1356_s3] sm:$0x7]  ;;  %v58_v11 = vunpack.c.l.bf16 %v24_v7  ;;  %v940_v12 = vperm.slane %v101_v9, 2  ;;  %v841_v14 = vld [vmem:[%s1353_s1 + $0x28] sm:$0xff]  ;;  %v975_v29 = vld [vmem:[%s1354_s0 + $0x90] sm:$0xff]  ;;  %v988_v35 = vperm.slane %v101_v9, 0 }
   0x5   :  { %v942_v13 = vperm.slane %v157_v10, 2  ;;  %v953_v17 = vld [vmem:[%s1353_s1 + $0x68] sm:$0xff]  ;;  %v26_v18 = vld [vmem:[%s1354_s0 + $0x20] sm:$0xf]  ;;  %v89_v36 = vunpack.c.l.bf16 %v975_v29  ;;  %v992_v38 = vperm.slane %v101_v9, 1  ;;  %v839_v39 = vld [vmem:[%s1353_s1 + $0x18] sm:$0xff] }
   0x6   :  { %455 = vmatpush.bf16.msra.mxu0 %v842_v3  ;;  %855 = vmatpush.bf16.msra.mxu3 %v842_v3  ;;  %v111_v15 = vmul.f32 %v940_v12, %v55_v8  ;;  %v114_v16 = vmul.f32 %v940_v12, %v58_v11  ;;  %v28_v19 = vld [vmem:[%s1354_s0 + $0x2c] sm:$0xf]  ;;  %v21_v22 = vld [vmem:[%s1354_s0] sm:$0xff]  ;;  %v61_v27 = vunpack.c.l.bf16 %v26_v18  ;;  %v1004_v44 = vld [vmem:[%s1353_s1 + $0x58] sm:$0xff]  ;;  %v1008_v47 = vperm.slane %v157_v10, 0 }
   0x7   :  { %504 = vmatpush.bf16.msra.mxu1 %v922_v4  ;;  %559 = vmatpush.bf16.msra.mxu2 %v852_v5  ;;  %v23_v23 = vld [vmem:[%s1354_s0 + $0xc] sm:$0xff]  ;;  %v840_v26 = vld [vmem:[%s1353_s1 + $0x20] sm:$0xff]  ;;  %v64_v28 = vunpack.c.l.bf16 %v28_v19  ;;  %v53_v33 = vunpack.c.l.bf16 %v21_v22  ;;  %v54_v42 = vunpack.c.h.bf16 %v21_v22  ;;  %v145_v48 = vmul.f32 %v988_v35, %v89_v36  ;;  %v30_v3 = vld [vmem:[%s1354_s0 + $0x38] sm:$0xf] }
   0x8   :  { %v167_v20 = vadd.f32 %v942_v13, %v111_v15  ;;  %v170_v21 = vadd.f32 %v942_v13, %v114_v16  ;;  %v980_v30 = vld [vmem:[%s1354_s0 + $0x9c] sm:$0xff]  ;;  %v56_v34 = vunpack.c.l.bf16 %v23_v23  ;;  %v117_v40 = vmul.f32 %v940_v12, %v61_v27  ;;  %v838_v51 = vld [vmem:[%s1353_s1 + $0x10] sm:$0xff]  ;;  %v837_v59 = vld [vmem:[%s1353_s1 + $0x8] sm:$0xff] }
   0x9   :  { %v986_v31 = vld [vmem:[%s1353_s1 + $0x60] sm:$0xff]  ;;  %v92_v37 = vunpack.c.l.bf16 %v980_v30  ;;  %v120_v41 = vmul.f32 %v940_v12, %v64_v28  ;;  %v57_v43 = vunpack.c.h.bf16 %v23_v23  ;;  %v109_v45 = vmul.f32 %v988_v35, %v53_v33  ;;  %v1025_v56 = vld [vmem:[%s1353_s1 + $0x50] sm:$0xff]  ;;  %v1046_v6 = vld [vmem:[%s1353_s1 + $0x48] sm:$0xff] }
   0xa   :  { %456 = vmatpush.bf16.msra.mxu0 %v841_v14  ;;  %856 = vmatpush.bf16.msra.mxu3 %v841_v14  ;;  %v215_v24 = vmax.f32 %v167_v20, 0.0  ;;  %v218_v25 = vmax.f32 %v170_v21, 0.0  ;;  %v112_v46 = vmul.f32 %v988_v35, %v56_v34  ;;  %v1012_v50 = vperm.slane %v157_v10, 1  ;;  %v32_v5 = vld [vmem:[%s1354_s0 + $0x44] sm:$0xf]  ;;  %v25_v15 = vld [vmem:[%s1354_s0 + $0x18] sm:$0xff] }
   0xb   :  { %505 = vmatpush.bf16.msra.mxu1 %v953_v17  ;;  %v148_v49 = vmul.f32 %v988_v35, %v92_v37  ;;  %v173_v52 = vadd.f32 %v942_v13, %v117_v40  ;;  %v176_v53 = vadd.f32 %v942_v13, %v120_v41  ;;  %v110_v54 = vmul.f32 %v992_v38, %v54_v42  ;;  %v27_v16 = vld [vmem:[%s1354_s0 + $0x24] sm:$0xff] }
   0xc   :  { %v263_v32 = vpack.c.bf16 %v218_v25, %v215_v24  ;;  %v113_v55 = vmul.f32 %v992_v38, %v57_v43  ;;  %v165_v57 = vadd.f32 %v1008_v47, %v109_v45  ;;  %v168_v58 = vadd.f32 %v1008_v47, %v112_v46  ;;  %v836_v19 = vld [vmem:[%s1353_s1] sm:$0xff]  ;;  %v1060_v22 = vld [vmem:[%s1354_s0 + $0xa8] sm:$0xff]  ;;  %v1071_v24 = vld [vmem:[%s1354_s0 + $0xb4] sm:$0xff] }
   0xd   :  { %v201_v60 = vadd.f32 %v1008_v47, %v145_v48  ;;  %v204_v61 = vadd.f32 %v1008_v47, %v148_v49  ;;  %v221_v62 = vmax.f32 %v173_v52, 0.0  ;;  %v224_v63 = vmax.f32 %v176_v53, 0.0  ;;  %v1066_v23 = vld [vmem:[%s1353_s1 + $0x40] sm:$0xff] }
   0xe   :  { %828 = vmatmul.msk.bf16.vlgmr.msra.gmra.mxu2 %vm429_vm0, %v263_v32  ;;  %457 = vmatpush.bf16.msra.mxu0 %v840_v26  ;;  %v166_v0 = vadd.f32 %v1012_v50, %v110_v54  ;;  %v169_v2 = vadd.f32 %v1012_v50, %v113_v55  ;;  %v213_v7 = vmax.f32 %v165_v57, 0.0  ;;  %v216_v8 = vmax.f32 %v168_v58, 0.0 }
   0xf   :  { %857 = vmatpush.bf16.msra.mxu3 %v840_v26  ;;  %506 = vmatpush.bf16.msra.mxu1 %v986_v31  ;;  %v249_v9 = vmax.f32 %v201_v60, 0.0  ;;  %v252_v10 = vmax.f32 %v204_v61, 0.0  ;;  %v67_v11 = vunpack.c.l.bf16 %v30_v3  ;;  %v70_v14 = vunpack.c.l.bf16 %v32_v5  ;;  %v34_v60 = vld [vmem:[%s1354_s0 + $0x50] sm:$0xf] }
  0x10   :  { %v266_v18 = vpack.c.bf16 %v224_v63, %v221_v62  ;;  %v214_v20 = vmax.f32 %v166_v0, 0.0  ;;  %v217_v21 = vmax.f32 %v169_v2, 0.0  ;;  %v261_v25 = vpack.c.bf16 %v216_v8, %v213_v7  ;;  %v29_v63 = vld [vmem:[%s1354_s0 + $0x30] sm:$0xff]  ;;  %v31_v0 = vld [vmem:[%s1354_s0 + $0x3c] sm:$0xff] }
  0x11   :  { %v59_v26 = vunpack.c.l.bf16 %v25_v15  ;;  %v62_v27 = vunpack.c.l.bf16 %v27_v16  ;;  %v279_v28 = vpack.c.bf16 %v252_v10, %v249_v9  ;;  %v123_v32 = vmul.f32 %v940_v12, %v67_v11 }
  0x12   :  { %458 = vmatpush.bf16.msra.mxu0 %v839_v39  ;;  %v126_v33 = vmul.f32 %v940_v12, %v70_v14  ;;  %v95_v34 = vunpack.c.l.bf16 %v1060_v22  ;;  %v262_v36 = vpack.c.bf16 %v217_v21, %v214_v20  ;;  %v98_v37 = vunpack.c.l.bf16 %v1071_v24 }
  0x13   :  { %858 = vmatpush.bf16.msra.mxu3 %v839_v39  ;;  %507 = vmatpush.bf16.msra.mxu1 %v1004_v44  ;;  %v60_v39 = vunpack.c.h.bf16 %v25_v15  ;;  %v63_v40 = vunpack.c.h.bf16 %v27_v16  ;;  %v115_v41 = vmul.f32 %v988_v35, %v59_v26  ;;  %v118_v42 = vmul.f32 %v988_v35, %v62_v27 }
  0x14   :  { %v179_v43 = vadd.f32 %v942_v13, %v123_v32  ;;  %v182_v45 = vadd.f32 %v942_v13, %v126_v33  ;;  %v151_v46 = vmul.f32 %v988_v35, %v95_v34  ;;  %v154_v48 = vmul.f32 %v988_v35, %v98_v37 }
  0x15   :  { %v116_v49 = vmul.f32 %v992_v38, %v60_v39  ;;  %v174_v52 = vadd.f32 %v1008_v47, %v118_v42  ;;  %v73_v3 = vunpack.c.l.bf16 %v34_v60  ;;  %v65_v11 = vunpack.c.l.bf16 %v29_v63  ;;  %v40_v39 = vld [vmem:[%s1354_s0 + $0x74] sm:$0xf] }
  0x16   :  { %459 = vmatpush.bf16.msra.mxu0 %v838_v51  ;;  %v227_v53 = vmax.f32 %v179_v43, 0.0  ;;  %v230_v54 = vmax.f32 %v182_v45, 0.0  ;;  %v207_v55 = vadd.f32 %v1008_v47, %v151_v46  ;;  %v210_v57 = vadd.f32 %v1008_v47, %v154_v48 }
  0x17   :  { %859 = vmatpush.bf16.msra.mxu3 %v838_v51  ;;  %508 = vmatpush.bf16.msra.mxu1 %v1025_v56  ;;  %v119_v51 = vmul.f32 %v992_v38, %v63_v40  ;;  %v172_v58 = vadd.f32 %v1012_v50, %v116_v49  ;;  %v222_v62 = vmax.f32 %v174_v52, 0.0  ;;  %v68_v14 = vunpack.c.l.bf16 %v31_v0 }
  0x18   :  { %v269_v2 = vpack.c.bf16 %v230_v54, %v227_v53  ;;  %v255_v7 = vmax.f32 %v207_v55, 0.0  ;;  %v258_v8 = vmax.f32 %v210_v57, 0.0  ;;  %v129_v15 = vmul.f32 %v940_v12, %v73_v3  ;;  %v35_v55 = vld [vmem:[%s1354_s0 + $0x54] sm:$0xff]  ;;  %v1146_v57 = vld [vmem:[%s1354_s0 + $0x60] sm:$0xff] }
  0x19   :  { %v220_v9 = vmax.f32 %v172_v58, 0.0  ;;  %v90_v20 = vunpack.c.h.bf16 %v975_v29  ;;  %v93_v21 = vunpack.c.h.bf16 %v980_v30  ;;  %v121_v27 = vmul.f32 %v988_v35, %v65_v11 }
  0x1a   :  { %460 = vmatpush.bf16.msra.mxu0 %v837_v59  ;;  %v78_v60 = vunpack.c.h.bf16 %v1146_v57 }
  0x1b   :  { %860 = vmatpush.bf16.msra.mxu3 %v837_v59  ;;  %509 = vmatpush.bf16.msra.mxu1 %v1046_v6  ;;  %v175_v59 = vadd.f32 %v1012_v50, %v119_v51  ;;  %v146_v30 = vmul.f32 %v992_v38, %v90_v20  ;;  %v149_v34 = vmul.f32 %v992_v38, %v93_v21  ;;  %v82_v51 = vunpack.c.l.bf16 %v40_v39 }
  0x1c   :  { %v134_v3 = vmul.f32 %v992_v38, %v78_v60  ;;  %v77_v60 = vunpack.c.l.bf16 %v1146_v57 }
  0x1d   :  { %v223_v10 = vmax.f32 %v175_v59, 0.0  ;;  %v202_v45 = vadd.f32 %v1012_v50, %v146_v30  ;;  %v205_v46 = vadd.f32 %v1012_v50, %v149_v34 }
  0x1e   :  { %829 = vmatmul.msk.bf16.gmra.mxu2 %vm429_vm0, %v266_v18  ;;  %461 = vmatpush.bf16.msra.mxu0 %v836_v19  ;;  %v66_v18 = vunpack.c.h.bf16 %v29_v63  ;;  %v138_v63 = vmul.f32 %v940_v12, %v82_v51 }
  0x1f   :  { %861 = vmatpush.bf16.msra.mxu3 %v836_v19  ;;  %510 = vmatpush.bf16.msra.mxu1 %v1066_v23  ;;  %v69_v19 = vunpack.c.h.bf16 %v31_v0  ;;  %v265_v26 = vpack.c.bf16 %v223_v10, %v220_v9  ;;  %v250_v58 = vmax.f32 %v202_v45, 0.0  ;;  %v253_v59 = vmax.f32 %v205_v46, 0.0 }
  0x20   :  { %v122_v33 = vmul.f32 %v992_v38, %v66_v18  ;;  %v96_v9 = vunpack.c.h.bf16 %v1060_v22  ;;  %v99_v10 = vunpack.c.h.bf16 %v1071_v24 }
  0x21   :  { %462 = vmatmul.bf16.vlgmr.msra.gmra.mxu0 %v261_v25  ;;  %v282_v25 = vpack.c.bf16 %v258_v8, %v255_v7  ;;  %v125_v29 = vmul.f32 %v992_v38, %v69_v19  ;;  %v75_v8 = vunpack.c.h.bf16 %v35_v55 }
  0x22   :  { %492 = vmatmul.bf16.vlgmr.msra.gmra.mxu3 %v279_v28  ;;  %511 = vmatmul.bf16.vlgmr.msra.gmra.mxu1 %v262_v36  ;;  %v124_v28 = vmul.f32 %v988_v35, %v68_v14  ;;  %v177_v36 = vadd.f32 %v1008_v47, %v121_v27  ;;  %v178_v42 = vadd.f32 %v1012_v50, %v122_v33 }
  0x23   :  { %862 = vmatpush.bf16.msrb.mxu3 %v911_v1  ;;  %v171_v1 = vadd.f32 %v1008_v47, %v115_v41  ;;  %v181_v43 = vadd.f32 %v1012_v50, %v125_v29  ;;  %v280_v14 = vpack.c.bf16 %v253_v59, %v250_v58  ;;  %v131_v21 = vmul.f32 %v992_v38, %v75_v8 }
  0x24   :  { %v180_v37 = vadd.f32 %v1008_v47, %v124_v28  ;;  %v225_v48 = vmax.f32 %v177_v36, 0.0  ;;  %v226_v53 = vmax.f32 %v178_v42, 0.0 }
  0x25   :  { %v219_v61 = vmax.f32 %v171_v1, 0.0  ;;  %v33_v1 = vld [vmem:[%s1354_s0 + $0x48] sm:$0xff]  ;;  %v229_v54 = vmax.f32 %v181_v43, 0.0  ;;  %v187_v30 = vadd.f32 %v1012_v50, %v131_v21 }
  0x26   :  { %v71_v0 = vunpack.c.l.bf16 %v33_v1  ;;  %v72_v7 = vunpack.c.h.bf16 %v33_v1 }
  0x27   :  { %863 = vmatpush.bf16.msrb.mxu3 %v922_v4  ;;  %v36_v4 = vld [vmem:[%s1354_s0 + $0x5c] sm:$0xf]  ;;  %v268_v11 = vpack.c.bf16 %v229_v54, %v226_v53  ;;  %v235_v43 = vmax.f32 %v187_v30, 0.0 }
  0x28   :  { %v76_v5 = vunpack.c.l.bf16 %v36_v4  ;;  %v127_v18 = vmul.f32 %v988_v35, %v71_v0  ;;  %v128_v24 = vmul.f32 %v992_v38, %v72_v7 }
  0x2a   :  { %v132_v16 = vmul.f32 %v940_v12, %v76_v5  ;;  %v184_v29 = vadd.f32 %v1012_v50, %v128_v24 }
  0x2b   :  { %864 = vmatpush.bf16.msrb.mxu3 %v953_v17  ;;  %v264_v17 = vpack.c.bf16 %v222_v62, %v219_v61 }
  0x2c   :  { %v188_v32 = vadd.f32 %v942_v13, %v132_v16  ;;  %v194_v16 = vadd.f32 %v942_v13, %v138_v63  ;;  %v232_v42 = vmax.f32 %v184_v29, 0.0 }
  0x2e   :  { %830 = vmatmul.msk.bf16.gmra.mxu2 %vm429_vm0, %v269_v2  ;;  %v236_v41 = vmax.f32 %v188_v32, 0.0  ;;  %v74_v2 = vunpack.c.l.bf16 %v35_v55  ;;  %v183_v32 = vadd.f32 %v1008_v47, %v127_v18  ;;  %v271_v58 = vpack.c.bf16 %v235_v43, %v232_v42 }
  0x2f   :  { %865 = vmatpush.bf16.msrb.mxu3 %v986_v31  ;;  %v185_v31 = vadd.f32 %v942_v13, %v129_v15 }
  0x30   :  { %v130_v19 = vmul.f32 %v988_v35, %v74_v2 }
  0x31   :  { %467 = vmatmul.bf16.gmra.mxu0 %v264_v17  ;;  %v233_v40 = vmax.f32 %v185_v31, 0.0  ;;  %v190_v17 = vadd.f32 %v1012_v50, %v134_v3  ;;  %v242_v31 = vmax.f32 %v194_v16, 0.0 }
  0x32   :  { %497 = vmatmul.bf16.gmra.mxu3 %v282_v25  ;;  %516 = vmatmul.bf16.gmra.mxu1 %v265_v26  ;;  %v152_v25 = vmul.f32 %v992_v38, %v96_v9  ;;  %v155_v26 = vmul.f32 %v992_v38, %v99_v10  ;;  %v186_v33 = vadd.f32 %v1008_v47, %v130_v19 }
  0x33   :  { %866 = vmatpush.bf16.msrb.mxu3 %v1004_v44  ;;  %v38_v44 = vld [vmem:[%s1354_s0 + $0x68] sm:$0xf]  ;;  %v272_v52 = vpack.c.bf16 %v236_v41, %v233_v40  ;;  %v238_v20 = vmax.f32 %v190_v17, 0.0  ;;  %v231_v40 = vmax.f32 %v183_v32, 0.0 }
  0x34   :  { %v79_v49 = vunpack.c.l.bf16 %v38_v44  ;;  %v208_v34 = vadd.f32 %v1012_v50, %v152_v25  ;;  %v211_v36 = vadd.f32 %v1012_v50, %v155_v26  ;;  %v44_v44 = vld [vmem:[%s1354_s0 + $0x8c] sm:$0xf]  ;;  %v234_v41 = vmax.f32 %v186_v33, 0.0 }
  0x35   :  { %v88_v51 = vunpack.c.l.bf16 %v44_v44 }
  0x36   :  { %v135_v62 = vmul.f32 %v940_v12, %v79_v49  ;;  %v256_v45 = vmax.f32 %v208_v34, 0.0  ;;  %v259_v46 = vmax.f32 %v211_v36, 0.0  ;;  %v270_v53 = vpack.c.bf16 %v234_v41, %v231_v40  ;;  %v50_v34 = vld [vmem:[%s1354_s0 + $0xb0] sm:$0xf] }
  0x37   :  { %867 = vmatpush.bf16.msrb.mxu3 %v1025_v56  ;;  %v228_v56 = vmax.f32 %v180_v37, 0.0  ;;  %v42_v37 = vld [vmem:[%s1354_s0 + $0x80] sm:$0xf]  ;;  %v97_v44 = vunpack.c.l.bf16 %v50_v34 }
  0x38   :  { %v191_v15 = vadd.f32 %v942_v13, %v135_v62  ;;  %v85_v49 = vunpack.c.l.bf16 %v42_v37  ;;  %v283_v59 = vpack.c.bf16 %v259_v46, %v256_v45  ;;  %v144_v62 = vmul.f32 %v940_v12, %v88_v51 }
  0x39   :  { %v267_v61 = vpack.c.bf16 %v228_v56, %v225_v48  ;;  %v41_v48 = vld [vmem:[%s1354_s0 + $0x78] sm:$0xff]  ;;  %v43_v56 = vld [vmem:[%s1354_s0 + $0x84] sm:$0xff] }
  0x3a   :  { %v239_v28 = vmax.f32 %v191_v15, 0.0  ;;  %v84_v1 = vunpack.c.h.bf16 %v41_v48 }
  0x3b   :  { %868 = vmatpush.bf16.msrb.mxu3 %v1046_v6  ;;  %v1151_v6 = vld [vmem:[%s1354_s0 + $0x6c] sm:$0xff] }
  0x3c   :  { %v81_v4 = vunpack.c.h.bf16 %v1151_v6  ;;  %v275_v39 = vpack.c.bf16 %v242_v31, %v239_v28  ;;  %v140_v54 = vmul.f32 %v992_v38, %v84_v1 }
  0x3e   :  { %v137_v5 = vmul.f32 %v992_v38, %v81_v4  ;;  %831 = vmatmul.msk.bf16.gmra.mxu2 %vm429_vm0, %v272_v52  ;;  %v87_v52 = vunpack.c.h.bf16 %v43_v56  ;;  %v80_v4 = vunpack.c.l.bf16 %v1151_v6  ;;  %v196_v63 = vadd.f32 %v1012_v50, %v140_v54 }
  0x3f   :  { %869 = vmatpush.bf16.msrb.mxu3 %v1066_v23  ;;  %v200_v6 = vadd.f32 %v942_v13, %v144_v62 }
  0x40   :  { %v193_v23 = vadd.f32 %v1012_v50, %v137_v5  ;;  %v143_v55 = vmul.f32 %v992_v38, %v87_v52  ;;  %v244_v2 = vmax.f32 %v196_v63, 0.0  ;;  %v133_v38 = vmul.f32 %v988_v35, %v77_v60 }
  0x41   :  { %472 = vmatmul.bf16.gmra.mxu0 %v267_v61  ;;  %v141_v61 = vmul.f32 %v940_v12, %v85_v49  ;;  %v136_v5 = vmul.f32 %v988_v35, %v80_v4 }
  0x42   :  { %v241_v22 = vmax.f32 %v193_v23, 0.0  ;;  %521 = vmatmul.bf16.gmra.mxu1 %v268_v11  ;;  %541 = vmatmul.bf16.vlgmr.msrb.gmra.mxu3 %v280_v14  ;;  %v199_v0 = vadd.f32 %v1012_v50, %v143_v55  ;;  %v189_v8 = vadd.f32 %v1008_v47, %v133_v38  ;;  %v248_v50 = vmax.f32 %v200_v6, 0.0  ;;  %v46_v11 = vld [vmem:[%s1354_s0 + $0x98] sm:$0xf]  ;;  %v48_v14 = vld [vmem:[%s1354_s0 + $0xa4] sm:$0xf] }
  0x43   :  { %v197_v57 = vadd.f32 %v942_v13, %v141_v61  ;;  %v192_v9 = vadd.f32 %v1008_v47, %v136_v5  ;;  %v91_v16 = vunpack.c.l.bf16 %v46_v11  ;;  %v94_v18 = vunpack.c.l.bf16 %v48_v14 }
  0x44   :  { %v1173_v27 = vpack.c.bf16 %v241_v22, %v238_v20  ;;  %v247_v3 = vmax.f32 %v199_v0, 0.0  ;;  %v237_v17 = vmax.f32 %v189_v8, 0.0  ;;  %v83_v20 = vunpack.c.l.bf16 %v41_v48 }
  0x45   :  { %v245_v10 = vmax.f32 %v197_v57, 0.0  ;;  %v240_v23 = vmax.f32 %v192_v9, 0.0  ;;  %v86_v22 = vunpack.c.l.bf16 %v43_v56  ;;  %v147_v24 = vmul.f32 %v940_v12, %v91_v16 }
  0x46   :  { %v277_v7 = vpack.c.bf16 %v247_v3, %v244_v2  ;;  %v150_v21 = vmul.f32 %v940_v12, %v94_v18  ;;  %v139_v25 = vmul.f32 %v988_v35, %v83_v20 }
  0x47   :  { %v278_v15 = vpack.c.bf16 %v248_v50, %v245_v10  ;;  %v273_v19 = vpack.c.bf16 %v240_v23, %v237_v17  ;;  %v142_v26 = vmul.f32 %v988_v35, %v86_v22  ;;  %v203_v28 = vadd.f32 %v942_v13, %v147_v24  ;;  %v52_v35 = vld [vmem:[%s1354_s0 + $0xbc] sm:$0xf] }
  0x48   :  { %v206_v31 = vadd.f32 %v942_v13, %v150_v21  ;;  %v195_v32 = vadd.f32 %v1008_v47, %v139_v25 }
  0x49   :  { %v198_v33 = vadd.f32 %v1008_v47, %v142_v26  ;;  %v251_v29 = vmax.f32 %v203_v28, 0.0  ;;  %v153_v47 = vmul.f32 %v940_v12, %v97_v44 }
  0x4a   :  { %v254_v30 = vmax.f32 %v206_v31, 0.0  ;;  %v243_v36 = vmax.f32 %v195_v32, 0.0 }
  0x4b   :  { %v209_v42 = vadd.f32 %v942_v13, %v153_v47 }
  0x4c   :  { %v281_v37 = vpack.c.bf16 %v254_v30, %v251_v29 }
  0x4d   :  { %v257_v45 = vmax.f32 %v209_v42, 0.0 }
  0x4e   :  { %832 = vmatmul.msk.bf16.gmra.mxu2 %vm429_vm0, %v275_v39  ;;  %v100_v39 = vunpack.c.l.bf16 %v52_v35 }
  0x50   :  { %v156_v41 = vmul.f32 %v940_v12, %v100_v39 }
  0x51   :  { %477 = vmatmul.bf16.gmra.mxu0 %v270_v53 }
  0x52   :  { %526 = vmatmul.bf16.gmra.mxu1 %v271_v58  ;;  %546 = vmatmul.bf16.gmra.mxu3 %v283_v59  ;;  %v212_v43 = vadd.f32 %v942_v13, %v156_v41 }
  0x54   :  { %v260_v46 = vmax.f32 %v212_v43, 0.0 }
  0x56   :  { %v284_v48 = vpack.c.bf16 %v260_v46, %v257_v45 }
  0x5e   :  { %833 = vmatmul.msk.bf16.gmra.mxu2 %vm429_vm0, %v278_v15 }
  0x61   :  { %482 = vmatmul.bf16.gmra.mxu0 %v273_v19 }
  0x62   :  { %531 = vmatmul.bf16.gmra.mxu1 %v1173_v27  ;;  %v246_v27 = vmax.f32 %v198_v33, 0.0 }
  0x64   :  { %v276_v40 = vpack.c.bf16 %v246_v27, %v243_v36 }
  0x6e   :  { %834 = vmatmul.msk.bf16.gmra.mxu2 %vm429_vm0, %v281_v37 }
  0x71   :  { %487 = vmatmul.bf16.gmra.mxu0 %v276_v40 }
  0x72   :  { %536 = vmatmul.bf16.gmra.mxu1 %v277_v7 }
  0x7e   :  { %835 = vmatmul.msk.bf16.gmra.mxu2 %vm429_vm0, %v284_v48 }
  0x91   :  { %v561_v56 = vpop.f32.mrf.mxu2 }
  0x99   :  { %v563_v49 = vpop.f32.mrf.mxu2 }
  0x9e   :  { %v463_v51 = vpop.f32.mrf.mxu0 }
  0x9f   :  { %v512_v1 = vpop.f32.mrf.mxu1 }
  0xa0   :  { %v513_v52 = vadd.f32 %v512_v1, %v463_v51 }
  0xa1   :  { %v566_v53 = vpop.f32.mrf.mxu2 }
  0xa2   :  { %v562_v54 = vadd.f32 %v561_v56, %v513_v52 }
  0xa4   :  { %v601_v12 = vpack.c.bf16 %v562_v54, %v562_v54 }
  0xa5   :  { %v493_v20 = vpop.f32.mrf.mxu3 }
  0xa6   :  { %618 = vst.msk [vmem:[%s1357_s4] sm:$0xf] %vm617_vm1, %v601_v12  ;;  %v465_v13 = vpop.f32.mrf.mxu0  ;;  %v634_v60 = vunpack.c.l.bf16 %v601_v12 }
  0xa7   :  { %v514_v55 = vpop.f32.mrf.mxu1 }
  0xa8   :  { %v515_v58 = vadd.f32 %v514_v55, %v465_v13  ;;  %v690_v62 = vmul.f32 %v634_v60, %v634_v60  ;;  %v651_v3 = vsel %vm650_vm2, %v634_v60, 0.0 }
  0xa9   :  { %v568_v59 = vpop.f32.mrf.mxu2 }
  0xaa   :  { %v564_v4 = vadd.f32 %v563_v49, %v515_v58  ;;  %v706_v8 = vsel %vm650_vm2, %v690_v62, 0.0 }
  0xac   :  { %v602_v61 = vpack.c.bf16 %v564_v4, %v564_v4 }
  0xad   :  { %v1264_v33 = vpop.f32.mrf.mxu3 }
  0xae   :  { %619 = vst.msk [vmem:[%s1357_s4 + $0x4] sm:$0xf] %vm617_vm1, %v602_v61  ;;  %v635_v63 = vunpack.c.l.bf16 %v602_v61  ;;  %v468_v0 = vpop.f32.mrf.mxu0 }
  0xaf   :  { %v517_v2 = vpop.f32.mrf.mxu1 }
  0xb0   :  { %v652_v38 = vsel %vm650_vm2, %v635_v63, 0.0  ;;  %v691_v5 = vmul.f32 %v635_v63, %v635_v63  ;;  %v518_v57 = vadd.f32 %v517_v2, %v468_v0 }
  0xb1   :  { %v1246_v6 = vadd.f32 %v652_v38, %v651_v3  ;;  %v571_v7 = vpop.f32.mrf.mxu2 }
  0xb2   :  { %v707_v9 = vsel %vm650_vm2, %v691_v5, 0.0  ;;  %v567_v10 = vadd.f32 %v566_v53, %v518_v57 }
  0xb3   :  { %v1250_v50 = vadd.f32 %v707_v9, %v706_v8 }
  0xb4   :  { %v603_v11 = vpack.c.bf16 %v567_v10, %v567_v10 }
  0xb5   :  { %v1270_v39 = vpop.f32.mrf.mxu3 }
  0xb6   :  { %620 = vst.msk [vmem:[%s1357_s4 + $0x8] sm:$0xf] %vm617_vm1, %v603_v11  ;;  %v470_v14 = vpop.f32.mrf.mxu0  ;;  %v636_v12 = vunpack.c.l.bf16 %v603_v11 }
  0xb7   :  { %v519_v17 = vpop.f32.mrf.mxu1 }
  0xb8   :  { %v520_v23 = vadd.f32 %v519_v17, %v470_v14  ;;  %v692_v61 = vmul.f32 %v636_v12, %v636_v12  ;;  %v654_v2 = vsel %vm650_vm2, %v636_v12, 0.0 }
  0xb9   :  { %v573_v15 = vpop.f32.mrf.mxu2  ;;  %v655_v14 = vadd.f32 %v654_v2, %v1246_v6 }
  0xba   :  { %v569_v16 = vadd.f32 %v568_v59, %v520_v23  ;;  %v709_v5 = vsel %vm650_vm2, %v692_v61, 0.0 }
  0xbc   :  { %v604_v18 = vpack.c.bf16 %v569_v16, %v569_v16 }
  0xbd   :  { %v1276_v48 = vpop.f32.mrf.mxu3 }
  0xbe   :  { %621 = vst.msk [vmem:[%s1357_s4 + $0xc] sm:$0xf] %vm617_vm1, %v604_v18  ;;  %v473_v19 = vpop.f32.mrf.mxu0  ;;  %v637_v59 = vunpack.c.l.bf16 %v604_v18 }
  0xbf   :  { %v522_v22 = vpop.f32.mrf.mxu1 }
  0xc0   :  { %v523_v24 = vadd.f32 %v522_v22, %v473_v19  ;;  %v693_v0 = vmul.f32 %v637_v59, %v637_v59  ;;  %v656_v8 = vsel %vm650_vm2, %v637_v59, 0.0 }
  0xc1   :  { %v576_v21 = vpop.f32.mrf.mxu2 }
  0xc2   :  { %v572_v25 = vadd.f32 %v571_v7, %v523_v24  ;;  %v711_v17 = vsel %vm650_vm2, %v693_v0, 0.0 }
  0xc4   :  { %v605_v26 = vpack.c.bf16 %v572_v25, %v572_v25  ;;  %v657_v25 = vadd.f32 %v656_v8, %v655_v14 }
  0xc5   :  { %v542_v13 = vpop.f32.mrf.mxu3 }
  0xc6   :  { %622 = vst.msk [vmem:[%s1357_s4 + $0x10] sm:$0xf] %vm617_vm1, %v605_v26  ;;  %v475_v28 = vpop.f32.mrf.mxu0  ;;  %v638_v62 = vunpack.c.l.bf16 %v605_v26  ;;  %v543_v9 = vadd.f32 %v542_v13, %v493_v20 }
  0xc7   :  { %v524_v31 = vpop.f32.mrf.mxu1 }
  0xc8   :  { %v525_v32 = vadd.f32 %v524_v31, %v475_v28  ;;  %v694_v57 = vmul.f32 %v638_v62, %v638_v62  ;;  %v658_v23 = vsel %vm650_vm2, %v638_v62, 0.0 }
  0xc9   :  { %v578_v29 = vpop.f32.mrf.mxu2 }
  0xca   :  { %v574_v30 = vadd.f32 %v573_v15, %v525_v32  ;;  %v713_v26 = vsel %vm650_vm2, %v694_v57, 0.0 }
  0xcc   :  { %v606_v34 = vpack.c.bf16 %v574_v30, %v574_v30  ;;  %v659_v30 = vadd.f32 %v658_v23, %v657_v25 }
  0xcd   :  { %v544_v15 = vpop.f32.mrf.mxu3 }
  0xce   :  { %623 = vst.msk [vmem:[%s1357_s4 + $0x14] sm:$0xf] %vm617_vm1, %v606_v34  ;;  %v478_v35 = vpop.f32.mrf.mxu0  ;;  %v639_v3 = vunpack.c.l.bf16 %v606_v34 }
  0xcf   :  { %v527_v36 = vpop.f32.mrf.mxu1 }
  0xd0   :  { %v528_v27 = vadd.f32 %v527_v36, %v478_v35  ;;  %v695_v18 = vmul.f32 %v639_v3, %v639_v3  ;;  %v660_v20 = vsel %vm650_vm2, %v639_v3, 0.0 }
  0xd1   :  { %v581_v37 = vpop.f32.mrf.mxu2 }
  0xd2   :  { %v577_v44 = vadd.f32 %v576_v21, %v528_v27  ;;  %v710_v21 = vadd.f32 %v709_v5, %v1250_v50  ;;  %v715_v34 = vsel %vm650_vm2, %v695_v18, 0.0 }
  0xd4   :  { %v607_v40 = vpack.c.bf16 %v577_v44, %v577_v44  ;;  %v661_v44 = vadd.f32 %v660_v20, %v659_v30 }
  0xd5   :  { %v547_v12 = vpop.f32.mrf.mxu3 }
  0xd6   :  { %624 = vst.msk [vmem:[%s1357_s4 + $0x18] sm:$0xf] %vm617_vm1, %v607_v40  ;;  %v480_v47 = vpop.f32.mrf.mxu0  ;;  %v640_v10 = vunpack.c.l.bf16 %v607_v40  ;;  %v545_v40 = vadd.f32 %v544_v15, %v1264_v33  ;;  %v548_v57 = vadd.f32 %v547_v12, %v1270_v39 }
  0xd7   :  { %v529_v41 = vpop.f32.mrf.mxu1 }
  0xd8   :  { %v530_v42 = vadd.f32 %v529_v41, %v480_v47  ;;  %v696_v28 = vmul.f32 %v640_v10, %v640_v10  ;;  %v662_v35 = vsel %vm650_vm2, %v640_v10, 0.0 }
  0xd9   :  { %v583_v43 = vpop.f32.mrf.mxu2 }
  0xda   :  { %v579_v45 = vadd.f32 %v578_v29, %v530_v42  ;;  %v712_v29 = vadd.f32 %v711_v17, %v710_v21  ;;  %v717_v41 = vsel %vm650_vm2, %v696_v28, 0.0 }
  0xdc   :  { %v608_v46 = vpack.c.bf16 %v579_v45, %v579_v45 }
  0xdd   :  { %v549_v21 = vpop.f32.mrf.mxu3 }
  0xde   :  { %625 = vst.msk [vmem:[%s1357_s4 + $0x1c] sm:$0xf] %vm617_vm1, %v608_v46  ;;  %v483_v56 = vpop.f32.mrf.mxu0  ;;  %v641_v19 = vunpack.c.l.bf16 %v608_v46  ;;  %v550_v28 = vadd.f32 %v549_v21, %v1276_v48 }
  0xdf   :  { %v532_v49 = vpop.f32.mrf.mxu1 }
  0xe0   :  { %v533_v51 = vadd.f32 %v532_v49, %v483_v56  ;;  %v697_v36 = vmul.f32 %v641_v19, %v641_v19  ;;  %v664_v42 = vsel %vm650_vm2, %v641_v19, 0.0  ;;  %v663_v56 = vadd.f32 %v662_v35, %v661_v44 }
  0xe1   :  { %v586_v1 = vpop.f32.mrf.mxu2 }
  0xe2   :  { %v582_v52 = vadd.f32 %v581_v37, %v533_v51  ;;  %v714_v37 = vadd.f32 %v713_v26, %v712_v29  ;;  %v665_v13 = vadd.f32 %v664_v42, %v663_v56 }
  0xe4   :  { %v609_v53 = vpack.c.bf16 %v582_v52, %v582_v52  ;;  %v716_v46 = vadd.f32 %v715_v34, %v714_v37 }
  0xe6   :  { %626 = vst.msk [vmem:[%s1357_s4 + $0x20] sm:$0xf] %vm617_vm1, %v609_v53  ;;  %v485_v54 = vpop.f32.mrf.mxu0  ;;  %v642_v31 = vunpack.c.l.bf16 %v609_v53 }
  0xe7   :  { %v534_v55 = vpop.f32.mrf.mxu1 }
  0xe8   :  { %v535_v58 = vadd.f32 %v534_v55, %v485_v54  ;;  %v666_v33 = vsel %vm650_vm2, %v642_v31, 0.0  ;;  %v718_v54 = vadd.f32 %v717_v41, %v716_v46 }
  0xe9   :  { %v588_v60 = vpop.f32.mrf.mxu2 }
  0xea   :  { %v584_v4 = vadd.f32 %v583_v43, %v535_v58  ;;  %v698_v43 = vmul.f32 %v642_v31, %v642_v31 }
  0xec   :  { %v610_v63 = vpack.c.bf16 %v584_v4, %v584_v4  ;;  %v721_v58 = vsel %vm650_vm2, %v698_v43, 0.0 }
  0xee   :  { %627 = vst.msk [vmem:[%s1357_s4 + $0x24] sm:$0xf] %vm617_vm1, %v610_v63  ;;  %v488_v38 = vpop.f32.mrf.mxu0  ;;  %v643_v27 = vunpack.c.l.bf16 %v610_v63  ;;  %v667_v63 = vadd.f32 %v666_v33, %v665_v13 }
  0xef   :  { %v537_v7 = vpop.f32.mrf.mxu1 }
  0xf0   :  { %v538_v11 = vadd.f32 %v537_v7, %v488_v38  ;;  %v699_v52 = vmul.f32 %v643_v27, %v643_v27  ;;  %v668_v59 = vsel %vm650_vm2, %v643_v27, 0.0 }
  0xf1   :  { %v591_v16 = vpop.f32.mrf.mxu2 }
  0xf2   :  { %v592_v22 = vadd.f32 %v591_v16, %v543_v9  ;;  %v587_v24 = vadd.f32 %v586_v1, %v538_v11  ;;  %v719_v1 = vsel %vm650_vm2, %v697_v36, 0.0  ;;  %v723_v2 = vsel %vm650_vm2, %v699_v52, 0.0 }
  0xf3   :  { %v720_v62 = vadd.f32 %v719_v1, %v718_v54 }
  0xf4   :  { %v613_v6 = vpack.c.bf16 %v592_v22, %v592_v22  ;;  %v611_v32 = vpack.c.bf16 %v587_v24, %v587_v24 }
  0xf5   :  { %v722_v38 = vadd.f32 %v721_v58, %v720_v62 }
  0xf6   :  { %630 = vst.msk [vmem:[%s1357_s4 + $0x30] sm:$0xf] %vm617_vm1, %v613_v6  ;;  %v490_v50 = vpop.f32.mrf.mxu0  ;;  %v644_v45 = vunpack.c.l.bf16 %v611_v32  ;;  %v646_v7 = vunpack.c.l.bf16 %v613_v6 }
  0xf7   :  { %628 = vst.msk [vmem:[%s1357_s4 + $0x28] sm:$0xf] %vm617_vm1, %v611_v32  ;;  %v539_v47 = vpop.f32.mrf.mxu1  ;;  %v724_v9 = vadd.f32 %v723_v2, %v722_v38 }
  0xf8   :  { %v540_v51 = vadd.f32 %v539_v47, %v490_v50  ;;  %v700_v4 = vmul.f32 %v644_v45, %v644_v45  ;;  %v670_v3 = vsel %vm650_vm2, %v644_v45, 0.0  ;;  %v702_v19 = vmul.f32 %v646_v7, %v646_v7 }
  0xf9   :  { %v593_v49 = vpop.f32.mrf.mxu2  ;;  %v674_v39 = vsel %vm650_vm2, %v646_v7, 0.0 }
  0xfa   :  { %v594_v53 = vadd.f32 %v593_v49, %v545_v40  ;;  %v589_v55 = vadd.f32 %v588_v60, %v540_v51  ;;  %v669_v60 = vadd.f32 %v668_v59, %v667_v63  ;;  %v725_v8 = vsel %vm650_vm2, %v700_v4, 0.0 }
  0xfb   :  { %v726_v15 = vadd.f32 %v725_v8, %v724_v9  ;;  %v729_v31 = vsel %vm650_vm2, %v702_v19, 0.0 }
  0xfc   :  { %v614_v61 = vpack.c.bf16 %v594_v53, %v594_v53  ;;  %v612_v0 = vpack.c.bf16 %v589_v55, %v589_v55  ;;  %v671_v10 = vadd.f32 %v670_v3, %v669_v60 }
  0xfe   :  { %631 = vst.msk [vmem:[%s1357_s4 + $0x34] sm:$0xf] %vm617_vm1, %v614_v61  ;;  %v645_v5 = vunpack.c.l.bf16 %v612_v0  ;;  %v647_v22 = vunpack.c.l.bf16 %v614_v61 }
  0xff   :  { %629 = vst.msk [vmem:[%s1357_s4 + $0x2c] sm:$0xf] %vm617_vm1, %v612_v0 }
 0x100   :  { %v672_v11 = vsel %vm650_vm2, %v645_v5, 0.0  ;;  %v701_v14 = vmul.f32 %v645_v5, %v645_v5  ;;  %v703_v6 = vmul.f32 %v647_v22, %v647_v22  ;;  %v676_v30 = vsel %vm650_vm2, %v647_v22, 0.0 }
 0x101   :  { %v596_v17 = vpop.f32.mrf.mxu2  ;;  %v673_v16 = vadd.f32 %v672_v11, %v671_v10 }
 0x102   :  { %v597_v23 = vadd.f32 %v596_v17, %v548_v57  ;;  %v727_v18 = vsel %vm650_vm2, %v701_v14, 0.0  ;;  %v731_v27 = vsel %vm650_vm2, %v703_v6, 0.0 }
 0x103   :  { %v728_v25 = vadd.f32 %v727_v18, %v726_v15  ;;  %v675_v20 = vadd.f32 %v674_v39, %v673_v16 }
 0x104   :  { %v615_v24 = vpack.c.bf16 %v597_v23, %v597_v23 }
 0x105   :  { %v730_v32 = vadd.f32 %v729_v31, %v728_v25  ;;  %v677_v36 = vadd.f32 %v676_v30, %v675_v20 }
 0x106   :  { %632 = vst.msk [vmem:[%s1357_s4 + $0x38] sm:$0xf] %vm617_vm1, %v615_v24  ;;  %v648_v26 = vunpack.c.l.bf16 %v615_v24 }
 0x107   :  { %v732_v44 = vadd.f32 %v731_v27, %v730_v32 }
 0x108   :  { %v704_v34 = vmul.f32 %v648_v26, %v648_v26  ;;  %v678_v50 = vsel %vm650_vm2, %v648_v26, 0.0 }
 0x109   :  { %v598_v29 = vpop.f32.mrf.mxu2  ;;  %v679_v47 = vadd.f32 %v678_v50, %v677_v36 }
 0x10a   :  { %v599_v35 = vadd.f32 %v598_v29, %v550_v28  ;;  %v733_v40 = vsel %vm650_vm2, %v704_v34, 0.0 }
 0x10b   :  { %v734_v43 = vadd.f32 %v733_v40, %v732_v44 }
 0x10c   :  { %v616_v37 = vpack.c.bf16 %v599_v35, %v599_v35 }
 0x10e   :  { %633 = vst.msk [vmem:[%s1357_s4 + $0x3c] sm:$0xf] %vm617_vm1, %v616_v37  ;;  %v649_v48 = vunpack.c.l.bf16 %v616_v37 }
 0x110   :  { %v680_v41 = vsel %vm650_vm2, %v649_v48, 0.0  ;;  %v705_v42 = vmul.f32 %v649_v48, %v649_v48 }
 0x111   :  { %v681_v45 = vadd.f32 %v680_v41, %v679_v47 }
 0x112   :  { %v735_v46 = vsel %vm650_vm2, %v705_v42, 0.0 }
 0x113   :  { %v682_v56 = vrot.slane %v681_v45, 4  ;;  %v736_v49 = vadd.f32 %v735_v46, %v734_v43 }
 0x115   :  { %v683_v51 = vadd.f32 %v682_v56, %v681_v45  ;;  %v737_v1 = vrot.slane %v736_v49, 4 }
 0x117   :  { %v684_v33 = vrot.slane %v683_v51, 2  ;;  %v738_v52 = vadd.f32 %v737_v1, %v736_v49 }
 0x119   :  { %v685_v53 = vadd.f32 %v684_v33, %v683_v51  ;;  %v739_v54 = vrot.slane %v738_v52, 2 }
 0x11b   :  { %v686_v12 = vrot.slane %v685_v53, 1  ;;  %v740_v13 = vadd.f32 %v739_v54, %v738_v52 }
 0x11d   :  { %v687_v55 = vadd.f32 %v686_v12, %v685_v53  ;;  %v741_v58 = vrot.slane %v740_v13, 1 }
 0x11f   :  { %689 = vst.msk [vmem:[%s1358_s5] sm:$0x1] %vm688_vm3, %v687_v55  ;;  %v742_v59 = vadd.f32 %v741_v58, %v740_v13 }
 0x121   :  { %743 = vst.msk [vmem:[%s1359_s6] sm:$0x1] %vm688_vm3, %v742_v59 }

// kernel: tile.78
= control target key start
LH: loop header
LB: loop body
LE: loop exit
PB: predicated region body
PF: predicated region fallthrough
CT: control target
= control target key end

     0   :  { %s28_s0 = inlined_call_operand.vmem [shape: f32[8], index: 0, kind: input, shape index: {}]   ;;  %s29_s1 = inlined_call_operand.vmem [shape: f32[9,8], index: 1, kind: output, shape index: {}]  }
   0x1   :  { %v4_v0 = vld [vmem:[%s28_s0] ss:$0 sm:$0xff] }
   0x2   :  { %5 = vst [vmem:[%s29_s1] sm:$0xff] %v4_v0 }
   0x3   :  { %8 = vst [vmem:[%s29_s1 + $0x8] sm:$0xff] %v4_v0 }

// kernel: tile.0
= control target key start
LH: loop header
LB: loop body
LE: loop exit
PB: predicated region body
PF: predicated region fallthrough
CT: control target
= control target key end

     0   :  { %s153_s8 = smov 126   ;;  %s154_s9 = smov 127   ;;  %vm3_vm0 = vcmask 7168   ;;  %s293_s0 = inlined_call_operand.vmem [shape: f32[9,8], index: 0, kind: input, shape index: {}]   ;;  %s294_s1 = inlined_call_operand.vmem [shape: f32[72,1], index: 1, kind: output, shape index: {}]  }
   0x1   :  { %v26_v0 = vld [vmem:[%s293_s0] sm:$0xff]   ;;  %s155_s10 = smov 125   ;;  %v124_v1 = vld [vmem:[%s293_s0 + $0x8] sm:$0x1]   ;;  %s156_s23 = smov 124  }
   0x2   :  { %27 = vrot.lane.b32.xlu1 %v26_v0, %s153_s8  ;;  %12 = vrot.lane.b32.xlu0 %v26_v0, %s154_s9  ;;  %4 = vst.msk [vmem:[%s294_s1] ss:$8 sm:$0xf] %vm3_vm0, %v26_v0   ;;  %v120_v2 = vld [vmem:[%s293_s0 + $0x8] sm:$0x1]   ;;  %s157_s24 = smov 123  }
   0x3   :  { %42 = vrot.lane.b32.xlu2 %v26_v0, %s155_s10  ;;  %5 = vst.msk [vmem:[%s294_s1] ss:$8 sm:$0xf0] %vm3_vm0, %v26_v0   ;;  %v128_v3 = vld [vmem:[%s293_s0 + $0x8] sm:$0x1]   ;;  %s158_s29 = smov 122  }
   0x4   :  { %v132_v4 = vld [vmem:[%s293_s0 + $0x8] sm:$0x1]   ;;  %s159_s3 = smov 121  }
   0x5   :  { %v136_v5 = vld [vmem:[%s293_s0 + $0x8] sm:$0x1]  }
   0x6   :  { %v140_v6 = vld [vmem:[%s293_s0 + $0x8] sm:$0x1]  }
   0x7   :  { %v144_v7 = vld [vmem:[%s293_s0 + $0x8] sm:$0x1]  }
   0x8   :  { %v116_v14 = vld [vmem:[%s293_s0 + $0x8] sm:$0x1]  }
   0x9   :  { %117 = vst.msk [vmem:[%s294_s1 + $0x40] sm:$0x1] %vm3_vm0, %v116_v14  }
   0xa   :  { %36 = vrot.lane.b32.xlu1 %v124_v1, %s153_s8  ;;  %21 = vrot.lane.b32.xlu0 %v120_v2, %s154_s9 }
   0xb   :  { %51 = vrot.lane.b32.xlu2 %v128_v3, %s155_s10 }
  0x12   :  { %66 = vrot.lane.b32.xlu1 %v132_v4, %s156_s23  ;;  %57 = vrot.lane.b32.xlu0 %v26_v0, %s156_s23 }
  0x13   :  { %72 = vrot.lane.b32.xlu2 %v26_v0, %s157_s24 }
  0x1a   :  { %87 = vrot.lane.b32.xlu1 %v26_v0, %s158_s29  ;;  %81 = vrot.lane.b32.xlu0 %v136_v5, %s157_s24 }
  0x1b   :  { %96 = vrot.lane.b32.xlu2 %v140_v6, %s158_s29 }
  0x22   :  { %111 = vrot.lane.b32.xlu1 %v144_v7, %s159_s3  ;;  %102 = vrot.lane.b32.xlu0 %v26_v0, %s159_s3 }
  0x5d   :  { %v43_v8 = vpop.permute.xlu2 %42  }
  0x5e   :  { %126 = vst.msk [vmem:[%s294_s1 + $0x3] ss:$8 sm:$0xf] %vm3_vm0, %v43_v8  }
  0x5f   :  { %127 = vst.msk [vmem:[%s294_s1 + $0x3] ss:$8 sm:$0xf0] %vm3_vm0, %v43_v8  }
  0x65   :  { %v52_v9 = vpop.permute.xlu2 %51  }
  0x66   :  { %129 = vst.msk [vmem:[%s294_s1 + $0x43] sm:$0x1] %vm3_vm0, %v52_v9  }
  0x6d   :  { %v73_v10 = vpop.permute.xlu2 %72  }
  0x6e   :  { %134 = vst.msk [vmem:[%s294_s1 + $0x5] ss:$8 sm:$0xf] %vm3_vm0, %v73_v10  }
  0x6f   :  { %135 = vst.msk [vmem:[%s294_s1 + $0x5] ss:$8 sm:$0xf0] %vm3_vm0, %v73_v10  }
  0x74   :  { %v28_v11 = vpop.permute.xlu1 %27   ;;  %v13_v12 = vpop.permute.xlu0 %12  }
  0x75   :  { %122 = vst.msk [vmem:[%s294_s1 + $0x2] ss:$8 sm:$0xf] %vm3_vm0, %v28_v11   ;;  %v97_v13 = vpop.permute.xlu2 %96  }
  0x76   :  { %123 = vst.msk [vmem:[%s294_s1 + $0x2] ss:$8 sm:$0xf0] %vm3_vm0, %v28_v11  }
  0x77   :  { %118 = vst.msk [vmem:[%s294_s1 + $0x1] ss:$8 sm:$0xf] %vm3_vm0, %v13_v12  }
  0x78   :  { %119 = vst.msk [vmem:[%s294_s1 + $0x1] ss:$8 sm:$0xf0] %vm3_vm0, %v13_v12  }
  0x79   :  { %141 = vst.msk [vmem:[%s294_s1 + $0x46] sm:$0x1] %vm3_vm0, %v97_v13  }
  0x7c   :  { %v37_v15 = vpop.permute.xlu1 %36   ;;  %v22_v16 = vpop.permute.xlu0 %21  }
  0x7d   :  { %125 = vst.msk [vmem:[%s294_s1 + $0x42] sm:$0x1] %vm3_vm0, %v37_v15  }
  0x7e   :  { %121 = vst.msk [vmem:[%s294_s1 + $0x41] sm:$0x1] %vm3_vm0, %v22_v16  }
  0x84   :  { %v67_v17 = vpop.permute.xlu1 %66   ;;  %v58_v18 = vpop.permute.xlu0 %57  }
  0x85   :  { %133 = vst.msk [vmem:[%s294_s1 + $0x44] sm:$0x1] %vm3_vm0, %v67_v17  }
  0x86   :  { %130 = vst.msk [vmem:[%s294_s1 + $0x4] ss:$8 sm:$0xf] %vm3_vm0, %v58_v18  }
  0x87   :  { %131 = vst.msk [vmem:[%s294_s1 + $0x4] ss:$8 sm:$0xf0] %vm3_vm0, %v58_v18  }
  0x8c   :  { %v88_v19 = vpop.permute.xlu1 %87   ;;  %v82_v20 = vpop.permute.xlu0 %81  }
  0x8d   :  { %138 = vst.msk [vmem:[%s294_s1 + $0x6] ss:$8 sm:$0xf] %vm3_vm0, %v88_v19  }
  0x8e   :  { %139 = vst.msk [vmem:[%s294_s1 + $0x6] ss:$8 sm:$0xf0] %vm3_vm0, %v88_v19  }
  0x8f   :  { %137 = vst.msk [vmem:[%s294_s1 + $0x45] sm:$0x1] %vm3_vm0, %v82_v20  }
  0x94   :  { %v112_v21 = vpop.permute.xlu1 %111   ;;  %v103_v22 = vpop.permute.xlu0 %102  }
  0x95   :  { %145 = vst.msk [vmem:[%s294_s1 + $0x47] sm:$0x1] %vm3_vm0, %v112_v21  }
  0x96   :  { %142 = vst.msk [vmem:[%s294_s1 + $0x7] ss:$8 sm:$0xf] %vm3_vm0, %v103_v22  }
  0x97   :  { %143 = vst.msk [vmem:[%s294_s1 + $0x7] ss:$8 sm:$0xf0] %vm3_vm0, %v103_v22  }

// kernel: generator_forward.8
= control target key start
LH: loop header
LB: loop body
LE: loop exit
PB: predicated region body
PF: predicated region fallthrough
CT: control target
= control target key end

     0   :  { %vm745_vm0 = vcmask 130048   ;;  %vm1244_vm1 = vcmask 257024   ;;  %vm1373_vm2 = vcmask 261120   ;;  %vm1507_vm3 = vcmask 253952   ;;  %s3071_s1 = inlined_call_operand.vmem [shape: bf16[144,32], index: 1, kind: input, shape index: {}]   ;;  %s3072_s0 = inlined_call_operand.vmem [shape: bf16[512,144], index: 0, kind: input, shape index: {}]   ;;  %s3073_s2 = inlined_call_operand.vmem [shape: f32[1,144], index: 2, kind: input, shape index: {}]   ;;  %s3074_s3 = inlined_call_operand.vmem [shape: f32[1,144], index: 3, kind: input, shape index: {}]   ;;  %s3075_s4 = inlined_call_operand.vmem [shape: bf16[512,32], index: 4, kind: output, shape index: {0}]   ;;  %s3076_s5 = inlined_call_operand.vmem [shape: f32[1,1,32], index: 5, kind: output, shape index: {1}]   ;;  %s3077_s6 = inlined_call_operand.vmem [shape: f32[1,1,32], index: 6, kind: output, shape index: {2}]  }
   0x1   :  { %v1794_v0 = vld [vmem:[%s3071_s1 + $0x38] sm:$0xff]  ;;  %v1795_v1 = vld [vmem:[%s3071_s1 + $0x40] sm:$0xff]  ;;  %v22_v3 = vld [vmem:[%s3072_s0 + $0x8] sm:$0xff] }
   0x2   :  { %v21_v2 = vld [vmem:[%s3072_s0] sm:$0xff]  ;;  %842 = vmatpush.bf16.msra.mxu0 %v1794_v0  ;;  %v1793_v4 = vld [vmem:[%s3071_s1 + $0x30] sm:$0xff]  ;;  %1018 = vmatpush.bf16.msra.mxu1 %v1795_v1  ;;  %v88_v6 = vunpack.c.h.bf16 %v22_v3  ;;  %v1792_v13 = vld [vmem:[%s3071_s1 + $0x28] sm:$0xff]  ;;  %v87_v27 = vunpack.c.l.bf16 %v22_v3 }
   0x3   :  { %v86_v5 = vunpack.c.h.bf16 %v21_v2  ;;  %v213_v7 = vld [vmem:[%s3073_s2] sm:$0x3]  ;;  %1796 = vmatpush.bf16.msra.mxu2 %v1794_v0  ;;  %1804 = vmatpush.bf16.msra.mxu3 %v1795_v1  ;;  %v23_v14 = vld [vmem:[%s3072_s0 + $0x10] sm:$0xff]  ;;  %v24_v15 = vld [vmem:[%s3072_s0 + $0x18] sm:$0xff]  ;;  %v85_v24 = vunpack.c.l.bf16 %v21_v2 }
   0x4   :  { %v347_v8 = vld [vmem:[%s3074_s3] sm:$0x3]  ;;  %v1863_v9 = vperm.slane %v213_v7, 1  ;;  %v90_v20 = vunpack.c.h.bf16 %v23_v14  ;;  %v92_v21 = vunpack.c.h.bf16 %v24_v15  ;;  %v1886_v28 = vperm.slane %v213_v7, 0  ;;  %v1790_v29 = vld [vmem:[%s3071_s1 + $0x18] sm:$0xff]  ;;  %v1789_v35 = vld [vmem:[%s3071_s1 + $0x10] sm:$0xff] }
   0x5   :  { %v1865_v10 = vperm.slane %v347_v8, 1  ;;  %v1791_v22 = vld [vmem:[%s3071_s1 + $0x20] sm:$0xff]  ;;  %v1891_v30 = vperm.slane %v347_v8, 0  ;;  %v1788_v41 = vld [vmem:[%s3071_s1 + $0x8] sm:$0xff]  ;;  %v89_v49 = vunpack.c.l.bf16 %v23_v14  ;;  %v91_v50 = vunpack.c.l.bf16 %v24_v15  ;;  %v27_v62 = vld [vmem:[%s3072_s0 + $0x30] sm:$0xff] }
   0x6   :  { %v220_v11 = vmul.f32 %v1863_v9, %v86_v5  ;;  %v222_v12 = vmul.f32 %v1863_v9, %v88_v6  ;;  %843 = vmatpush.bf16.msra.mxu0 %v1793_v4  ;;  %v224_v25 = vmul.f32 %v1863_v9, %v90_v20  ;;  %v226_v26 = vmul.f32 %v1863_v9, %v92_v21  ;;  %v25_v40 = vld [vmem:[%s3072_s0 + $0x20] sm:$0xff]  ;;  %v26_v42 = vld [vmem:[%s3072_s0 + $0x28] sm:$0xff]  ;;  %v28_v63 = vld [vmem:[%s3072_s0 + $0x38] sm:$0xff] }
   0x7   :  { %1797 = vmatpush.bf16.msra.mxu2 %v1793_v4  ;;  %v219_v33 = vmul.f32 %v1886_v28, %v85_v24  ;;  %v221_v34 = vmul.f32 %v1886_v28, %v87_v27  ;;  %v94_v43 = vunpack.c.h.bf16 %v25_v40  ;;  %v96_v47 = vunpack.c.h.bf16 %v26_v42  ;;  %v1787_v48 = vld [vmem:[%s3071_s1] sm:$0xff]  ;;  %v54_v6 = vld [vmem:[%s3072_s0 + $0x108] sm:$0xff] }
   0x8   :  { %v354_v16 = vadd.f32 %v1865_v10, %v220_v11  ;;  %v356_v17 = vadd.f32 %v1865_v10, %v222_v12  ;;  %v358_v31 = vadd.f32 %v1865_v10, %v224_v25  ;;  %v360_v32 = vadd.f32 %v1865_v10, %v226_v26  ;;  %v53_v5 = vld [vmem:[%s3072_s0 + $0x100] sm:$0xff] }
   0x9   :  { %v353_v38 = vadd.f32 %v1891_v30, %v219_v33  ;;  %v355_v39 = vadd.f32 %v1891_v30, %v221_v34  ;;  %v228_v52 = vmul.f32 %v1863_v9, %v94_v43  ;;  %v230_v53 = vmul.f32 %v1863_v9, %v96_v47  ;;  %v1951_v33 = vld [vmem:[%s3072_s0 + $0x40] sm:$0xff]  ;;  %v1956_v34 = vld [vmem:[%s3072_s0 + $0x48] sm:$0xff] }
   0xa   :  { %v482_v18 = vmax.f32 %v354_v16, 0.0  ;;  %v484_v19 = vmax.f32 %v356_v17, 0.0  ;;  %844 = vmatpush.bf16.msra.mxu0 %v1792_v13  ;;  %v486_v36 = vmax.f32 %v358_v31, 0.0  ;;  %v488_v37 = vmax.f32 %v360_v32, 0.0 }
   0xb   :  { %1798 = vmatpush.bf16.msra.mxu2 %v1792_v13  ;;  %v481_v45 = vmax.f32 %v353_v38, 0.0  ;;  %v483_v46 = vmax.f32 %v355_v39, 0.0  ;;  %v223_v54 = vmul.f32 %v1886_v28, %v89_v49  ;;  %v225_v55 = vmul.f32 %v1886_v28, %v91_v50 }
   0xc   :  { %v610_v23 = vpack.c.bf16 %v484_v19, %v482_v18  ;;  %v612_v44 = vpack.c.bf16 %v488_v37, %v486_v36  ;;  %v362_v56 = vadd.f32 %v1865_v10, %v228_v52  ;;  %v364_v57 = vadd.f32 %v1865_v10, %v230_v53 }
   0xd   :  { %v609_v51 = vpack.c.bf16 %v483_v46, %v481_v45  ;;  %v357_v58 = vadd.f32 %v1891_v30, %v223_v54  ;;  %v359_v59 = vadd.f32 %v1891_v30, %v225_v55  ;;  %v98_v3 = vunpack.c.h.bf16 %v27_v62 }
   0xe   :  { %1755 = vmatmul.msk.bf16.vlgmr.msra.gmra.mxu1 %vm745_vm0, %v610_v23  ;;  %845 = vmatpush.bf16.msra.mxu0 %v1791_v22  ;;  %v490_v60 = vmax.f32 %v362_v56, 0.0  ;;  %v492_v61 = vmax.f32 %v364_v57, 0.0  ;;  %v100_v4 = vunpack.c.h.bf16 %v28_v63  ;;  %v93_v7 = vunpack.c.l.bf16 %v25_v40  ;;  %v55_v40 = vld [vmem:[%s3072_s0 + $0x110] sm:$0xff] }
   0xf   :  { %1799 = vmatpush.bf16.msra.mxu2 %v1791_v22  ;;  %v485_v0 = vmax.f32 %v357_v58, 0.0  ;;  %v487_v1 = vmax.f32 %v359_v59, 0.0  ;;  %v95_v8 = vunpack.c.l.bf16 %v26_v42  ;;  %v149_v11 = vunpack.c.l.bf16 %v53_v5 }
  0x10   :  { %v614_v2 = vpack.c.bf16 %v492_v61, %v490_v60  ;;  %v151_v12 = vunpack.c.l.bf16 %v54_v6  ;;  %v232_v14 = vmul.f32 %v1863_v9, %v98_v3  ;;  %v234_v15 = vmul.f32 %v1863_v9, %v100_v4 }
  0x11   :  { %v611_v13 = vpack.c.bf16 %v487_v1, %v485_v0  ;;  %v283_v16 = vmul.f32 %v1886_v28, %v149_v11  ;;  %v227_v18 = vmul.f32 %v1886_v28, %v93_v7  ;;  %v229_v19 = vmul.f32 %v1886_v28, %v95_v8  ;;  %v1986_v11 = vld [vmem:[%s3072_s0 + $0x50] sm:$0xff] }
  0x12   :  { %846 = vmatpush.bf16.msra.mxu0 %v1790_v29  ;;  %v285_v17 = vmul.f32 %v1886_v28, %v151_v12  ;;  %v366_v22 = vadd.f32 %v1865_v10, %v232_v14  ;;  %v368_v23 = vadd.f32 %v1865_v10, %v234_v15  ;;  %v102_v38 = vunpack.c.h.bf16 %v1951_v33  ;;  %v1991_v12 = vld [vmem:[%s3072_s0 + $0x58] sm:$0xff] }
  0x13   :  { %1800 = vmatpush.bf16.msra.mxu2 %v1790_v29  ;;  %v417_v20 = vadd.f32 %v1891_v30, %v283_v16  ;;  %v361_v26 = vadd.f32 %v1891_v30, %v227_v18  ;;  %v363_v27 = vadd.f32 %v1891_v30, %v229_v19  ;;  %v104_v39 = vunpack.c.h.bf16 %v1956_v34  ;;  %v57_v18 = vld [vmem:[%s3072_s0 + $0x120] sm:$0xff]  ;;  %v58_v19 = vld [vmem:[%s3072_s0 + $0x128] sm:$0xff] }
  0x14   :  { %v419_v21 = vadd.f32 %v1891_v30, %v285_v17  ;;  %v494_v31 = vmax.f32 %v366_v22, 0.0  ;;  %v496_v32 = vmax.f32 %v368_v23, 0.0  ;;  %v153_v43 = vunpack.c.l.bf16 %v55_v40 }
  0x15   :  { %v545_v24 = vmax.f32 %v417_v20, 0.0  ;;  %v491_v36 = vmax.f32 %v363_v27, 0.0  ;;  %v97_v45 = vunpack.c.l.bf16 %v27_v62  ;;  %v99_v46 = vunpack.c.l.bf16 %v28_v63 }
  0x16   :  { %847 = vmatpush.bf16.msra.mxu0 %v1789_v35  ;;  %v547_v25 = vmax.f32 %v419_v21, 0.0  ;;  %v616_v37 = vpack.c.bf16 %v496_v32, %v494_v31  ;;  %v236_v49 = vmul.f32 %v1863_v9, %v102_v38  ;;  %v238_v50 = vmul.f32 %v1863_v9, %v104_v39 }
  0x17   :  { %1801 = vmatpush.bf16.msra.mxu2 %v1789_v35  ;;  %v489_v35 = vmax.f32 %v361_v26, 0.0  ;;  %v231_v57 = vmul.f32 %v1886_v28, %v97_v45  ;;  %v233_v58 = vmul.f32 %v1886_v28, %v99_v46  ;;  %v106_v16 = vunpack.c.h.bf16 %v1986_v11 }
  0x18   :  { %v641_v29 = vpack.c.bf16 %v547_v25, %v545_v24  ;;  %v370_v61 = vadd.f32 %v1865_v10, %v236_v49  ;;  %v372_v62 = vadd.f32 %v1865_v10, %v238_v50  ;;  %v108_v17 = vunpack.c.h.bf16 %v1991_v12 }
  0x19   :  { %v613_v42 = vpack.c.bf16 %v491_v36, %v489_v35  ;;  %v365_v3 = vadd.f32 %v1891_v30, %v231_v57  ;;  %v367_v4 = vadd.f32 %v1891_v30, %v233_v58  ;;  %v101_v20 = vunpack.c.l.bf16 %v1951_v33 }
  0x1a   :  { %848 = vmatpush.bf16.msra.mxu0 %v1788_v41  ;;  %v498_v7 = vmax.f32 %v370_v61, 0.0  ;;  %v500_v8 = vmax.f32 %v372_v62, 0.0  ;;  %v103_v21 = vunpack.c.l.bf16 %v1956_v34  ;;  %v157_v22 = vunpack.c.l.bf16 %v57_v18  ;;  %v60_v61 = vld [vmem:[%s3072_s0 + $0x138] sm:$0xff] }
  0x1b   :  { %1802 = vmatpush.bf16.msra.mxu2 %v1788_v41  ;;  %v56_v41 = vld [vmem:[%s3072_s0 + $0x118] sm:$0xff]  ;;  %v495_v14 = vmax.f32 %v367_v4, 0.0  ;;  %v158_v23 = vunpack.c.h.bf16 %v57_v18  ;;  %v159_v25 = vunpack.c.l.bf16 %v58_v19  ;;  %v160_v26 = vunpack.c.h.bf16 %v58_v19 }
  0x1c   :  { %v155_v47 = vunpack.c.l.bf16 %v56_v41  ;;  %v618_v15 = vpack.c.bf16 %v500_v8, %v498_v7  ;;  %v240_v27 = vmul.f32 %v1863_v9, %v106_v16  ;;  %v291_v31 = vmul.f32 %v1886_v28, %v157_v22 }
  0x1d   :  { %v292_v32 = vmul.f32 %v1863_v9, %v158_v23  ;;  %v293_v35 = vmul.f32 %v1886_v28, %v159_v25  ;;  %v294_v33 = vmul.f32 %v1863_v9, %v160_v26  ;;  %v235_v34 = vmul.f32 %v1886_v28, %v101_v20 }
  0x1e   :  { %1756 = vmatmul.msk.bf16.gmra.mxu1 %vm745_vm0, %v612_v44  ;;  %849 = vmatpush.bf16.msra.mxu0 %v1787_v48  ;;  %v154_v44 = vunpack.c.h.bf16 %v55_v40  ;;  %v289_v53 = vmul.f32 %v1886_v28, %v155_v47  ;;  %v237_v36 = vmul.f32 %v1886_v28, %v103_v21  ;;  %v164_v4 = vunpack.c.h.bf16 %v60_v61 }
  0x1f   :  { %1803 = vmatpush.bf16.msra.mxu2 %v1787_v48  ;;  %v156_v48 = vunpack.c.h.bf16 %v56_v41  ;;  %v426_v38 = vadd.f32 %v1865_v10, %v292_v32  ;;  %v427_v39 = vadd.f32 %v1891_v30, %v293_v35  ;;  %v428_v40 = vadd.f32 %v1865_v10, %v294_v33  ;;  %v2062_v35 = vld [vmem:[%s3072_s0 + $0x70] sm:$0xff]  ;;  %v2067_v33 = vld [vmem:[%s3072_s0 + $0x78] sm:$0xff] }
  0x20   :  { %v288_v52 = vmul.f32 %v1863_v9, %v154_v44  ;;  %v423_v59 = vadd.f32 %v1891_v30, %v289_v53  ;;  %v374_v41 = vadd.f32 %v1865_v10, %v240_v27  ;;  %v369_v47 = vadd.f32 %v1891_v30, %v235_v34  ;;  %v2024_v53 = vld [vmem:[%s3072_s0 + $0x60] sm:$0xff] }
  0x21   :  { %850 = vmatmul.bf16.vlgmr.msra.gmra.mxu0 %v609_v51  ;;  %v287_v51 = vmul.f32 %v1886_v28, %v153_v43  ;;  %v290_v54 = vmul.f32 %v1863_v9, %v156_v48  ;;  %v554_v44 = vmax.f32 %v426_v38, 0.0  ;;  %v555_v45 = vmax.f32 %v427_v39, 0.0 }
  0x22   :  { %930 = vmatmul.bf16.vlgmr.msra.gmra.mxu2 %v641_v29  ;;  %v422_v56 = vadd.f32 %v1865_v10, %v288_v52  ;;  %v551_v1 = vmax.f32 %v423_v59, 0.0  ;;  %v242_v29 = vmul.f32 %v1863_v9, %v108_v17  ;;  %v556_v46 = vmax.f32 %v428_v40, 0.0  ;;  %v61_v40 = vld [vmem:[%s3072_s0 + $0x140] sm:$0xff] }
  0x23   :  { %v421_v55 = vadd.f32 %v1891_v30, %v287_v51  ;;  %v424_v60 = vadd.f32 %v1865_v10, %v290_v54  ;;  %v371_v48 = vadd.f32 %v1891_v30, %v237_v36  ;;  %v502_v51 = vmax.f32 %v374_v41, 0.0  ;;  %v2029_v54 = vld [vmem:[%s3072_s0 + $0x68] sm:$0xff] }
  0x24   :  { %v550_v0 = vmax.f32 %v422_v56, 0.0  ;;  %v646_v50 = vpack.c.bf16 %v556_v46, %v554_v44  ;;  %v110_v57 = vunpack.c.h.bf16 %v2024_v53  ;;  %v112_v58 = vunpack.c.h.bf16 %v2029_v54  ;;  %v62_v41 = vld [vmem:[%s3072_s0 + $0x148] sm:$0xff] }
  0x25   :  { %v549_v63 = vmax.f32 %v421_v55, 0.0  ;;  %v497_v55 = vmax.f32 %v369_v47, 0.0  ;;  %v499_v56 = vmax.f32 %v371_v48, 0.0  ;;  %v114_v38 = vunpack.c.h.bf16 %v2062_v35 }
  0x26   :  { %v116_v39 = vunpack.c.h.bf16 %v2067_v33  ;;  %v165_v44 = vunpack.c.l.bf16 %v61_v40  ;;  %v167_v46 = vunpack.c.l.bf16 %v62_v41  ;;  %v168_v47 = vunpack.c.h.bf16 %v62_v41 }
  0x27   :  { %v643_v5 = vpack.c.bf16 %v551_v1, %v549_v63  ;;  %v617_v62 = vpack.c.bf16 %v499_v56, %v497_v55  ;;  %v244_v1 = vmul.f32 %v1863_v9, %v110_v57 }
  0x29   :  { %v378_v17 = vadd.f32 %v1865_v10, %v244_v1 }
  0x2b   :  { %v506_v25 = vmax.f32 %v378_v17, 0.0 }
  0x2e   :  { %1757 = vmatmul.msk.bf16.gmra.mxu1 %vm745_vm0, %v614_v2  ;;  %v552_v2 = vmax.f32 %v424_v60, 0.0  ;;  %v59_v60 = vld [vmem:[%s3072_s0 + $0x130] sm:$0xff] }
  0x2f   :  { %v161_v63 = vunpack.c.l.bf16 %v59_v60 }
  0x30   :  { %v644_v6 = vpack.c.bf16 %v552_v2, %v550_v0  ;;  %v162_v0 = vunpack.c.h.bf16 %v59_v60  ;;  %v246_v2 = vmul.f32 %v1863_v9, %v112_v58 }
  0x31   :  { %855 = vmatmul.bf16.gmra.mxu0 %v611_v13  ;;  %v493_v13 = vmax.f32 %v365_v3, 0.0  ;;  %v163_v3 = vunpack.c.l.bf16 %v60_v61  ;;  %v295_v7 = vmul.f32 %v1886_v28, %v161_v63 }
  0x32   :  { %935 = vmatmul.bf16.gmra.mxu2 %v643_v5  ;;  %1772 = vmatmul.msk.bf16.vlgmr.msra.gmra.mxu3 %vm745_vm0, %v644_v6  ;;  %v105_v5 = vunpack.c.l.bf16 %v1986_v11  ;;  %v107_v6 = vunpack.c.l.bf16 %v1991_v12  ;;  %v296_v8 = vmul.f32 %v1863_v9, %v162_v0  ;;  %v380_v18 = vadd.f32 %v1865_v10, %v246_v2 }
  0x33   :  { %v615_v24 = vpack.c.bf16 %v495_v14, %v493_v13  ;;  %v297_v13 = vmul.f32 %v1886_v28, %v163_v3  ;;  %v298_v14 = vmul.f32 %v1863_v9, %v164_v4 }
  0x34   :  { %v430_v16 = vadd.f32 %v1865_v10, %v296_v8  ;;  %v239_v19 = vmul.f32 %v1886_v28, %v105_v5  ;;  %v241_v20 = vmul.f32 %v1886_v28, %v107_v6  ;;  %v508_v26 = vmax.f32 %v380_v18, 0.0 }
  0x35   :  { %v431_v11 = vadd.f32 %v1891_v30, %v297_v13  ;;  %v432_v12 = vadd.f32 %v1865_v10, %v298_v14  ;;  %v2100_v13 = vld [vmem:[%s3072_s0 + $0x80] sm:$0xff]  ;;  %v2105_v14 = vld [vmem:[%s3072_s0 + $0x88] sm:$0xff] }
  0x36   :  { %v558_v22 = vmax.f32 %v430_v16, 0.0  ;;  %v375_v32 = vadd.f32 %v1891_v30, %v241_v20  ;;  %v622_v34 = vpack.c.bf16 %v508_v26, %v506_v25  ;;  %v118_v17 = vunpack.c.h.bf16 %v2100_v13 }
  0x37   :  { %v559_v23 = vmax.f32 %v431_v11, 0.0  ;;  %v120_v11 = vunpack.c.h.bf16 %v2105_v14 }
  0x39   :  { %v254_v26 = vmul.f32 %v1863_v9, %v120_v11 }
  0x3e   :  { %1758 = vmatmul.msk.bf16.gmra.mxu1 %vm745_vm0, %v616_v37  ;;  %v425_v37 = vadd.f32 %v1891_v30, %v291_v31  ;;  %v373_v31 = vadd.f32 %v1891_v30, %v239_v19  ;;  %v64_v19 = vld [vmem:[%s3072_s0 + $0x158] sm:$0xff] }
  0x3f   :  { %v172_v25 = vunpack.c.h.bf16 %v64_v19 }
  0x40   :  { %v553_v43 = vmax.f32 %v425_v37, 0.0  ;;  %v501_v36 = vmax.f32 %v373_v31, 0.0  ;;  %v503_v37 = vmax.f32 %v375_v32, 0.0 }
  0x41   :  { %860 = vmatmul.bf16.gmra.mxu0 %v613_v42  ;;  %v376_v42 = vadd.f32 %v1865_v10, %v242_v29 }
  0x42   :  { %v645_v49 = vpack.c.bf16 %v555_v45, %v553_v43  ;;  %1773 = vmatmul.msk.bf16.gmra.mxu3 %vm745_vm0, %v646_v50  ;;  %v111_v43 = vunpack.c.l.bf16 %v2029_v54  ;;  %v166_v45 = vunpack.c.h.bf16 %v61_v40  ;;  %v619_v48 = vpack.c.bf16 %v503_v37, %v501_v36 }
  0x43   :  { %v504_v52 = vmax.f32 %v376_v42, 0.0  ;;  %v109_v42 = vunpack.c.l.bf16 %v2024_v53  ;;  %v250_v50 = vmul.f32 %v1863_v9, %v116_v39  ;;  %v302_v53 = vmul.f32 %v1863_v9, %v168_v47  ;;  %v2136_v47 = vld [vmem:[%s3072_s0 + $0x90] sm:$0xff] }
  0x44   :  { %940 = vmatmul.bf16.gmra.mxu2 %v645_v49  ;;  %v248_v49 = vmul.f32 %v1863_v9, %v114_v38  ;;  %v300_v55 = vmul.f32 %v1863_v9, %v166_v45  ;;  %v245_v56 = vmul.f32 %v1886_v28, %v111_v43  ;;  %v306_v36 = vmul.f32 %v1863_v9, %v172_v25 }
  0x45   :  { %v620_v59 = vpack.c.bf16 %v504_v52, %v502_v51  ;;  %v299_v51 = vmul.f32 %v1886_v28, %v165_v44  ;;  %v301_v52 = vmul.f32 %v1886_v28, %v167_v46  ;;  %v243_v54 = vmul.f32 %v1886_v28, %v109_v42 }
  0x46   :  { %v436_v60 = vadd.f32 %v1865_v10, %v302_v53  ;;  %v382_v61 = vadd.f32 %v1865_v10, %v248_v49  ;;  %v379_v4 = vadd.f32 %v1891_v30, %v245_v56  ;;  %v2143_v53 = vld [vmem:[%s3072_s0 + $0x98] sm:$0xff] }
  0x47   :  { %v433_v57 = vadd.f32 %v1891_v30, %v299_v51  ;;  %v435_v58 = vadd.f32 %v1891_v30, %v301_v52  ;;  %v377_v3 = vadd.f32 %v1891_v30, %v243_v54  ;;  %v122_v54 = vunpack.c.h.bf16 %v2136_v47 }
  0x48   :  { %v564_v2 = vmax.f32 %v436_v60, 0.0  ;;  %v507_v16 = vmax.f32 %v379_v4, 0.0  ;;  %v124_v56 = vunpack.c.h.bf16 %v2143_v53 }
  0x49   :  { %v561_v63 = vmax.f32 %v433_v57, 0.0  ;;  %v563_v0 = vmax.f32 %v435_v58, 0.0 }
  0x4b   :  { %v649_v5 = vpack.c.bf16 %v563_v0, %v561_v63  ;;  %v256_v63 = vmul.f32 %v1863_v9, %v122_v54 }
  0x4e   :  { %1759 = vmatmul.msk.bf16.gmra.mxu1 %vm745_vm0, %v618_v15  ;;  %v429_v15 = vadd.f32 %v1891_v30, %v295_v7  ;;  %v510_v7 = vmax.f32 %v382_v61, 0.0  ;;  %v65_v61 = vld [vmem:[%s3072_s0 + $0x160] sm:$0xff] }
  0x4f   :  { %v173_v0 = vunpack.c.l.bf16 %v65_v61 }
  0x50   :  { %v557_v21 = vmax.f32 %v429_v15, 0.0  ;;  %v505_v15 = vmax.f32 %v377_v3, 0.0 }
  0x51   :  { %865 = vmatmul.bf16.gmra.mxu0 %v615_v24  ;;  %v560_v24 = vmax.f32 %v432_v12, 0.0  ;;  %v63_v12 = vld [vmem:[%s3072_s0 + $0x150] sm:$0xff] }
  0x52   :  { %v647_v27 = vpack.c.bf16 %v559_v23, %v557_v21  ;;  %v621_v20 = vpack.c.bf16 %v507_v16, %v505_v15  ;;  %v169_v21 = vunpack.c.l.bf16 %v63_v12  ;;  %v170_v23 = vunpack.c.h.bf16 %v63_v12 }
  0x53   :  { %v648_v29 = vpack.c.bf16 %v560_v24, %v558_v22  ;;  %v252_v22 = vmul.f32 %v1863_v9, %v118_v17  ;;  %v171_v24 = vunpack.c.l.bf16 %v64_v19 }
  0x54   :  { %945 = vmatmul.bf16.gmra.mxu2 %v647_v27  ;;  %v113_v27 = vunpack.c.l.bf16 %v2062_v35  ;;  %v303_v31 = vmul.f32 %v1886_v28, %v169_v21  ;;  %v440_v35 = vadd.f32 %v1865_v10, %v306_v36 }
  0x55   :  { %1774 = vmatmul.msk.bf16.gmra.mxu3 %vm745_vm0, %v648_v29  ;;  %v115_v29 = vunpack.c.l.bf16 %v2067_v33  ;;  %v305_v32 = vmul.f32 %v1886_v28, %v171_v24  ;;  %v386_v38 = vadd.f32 %v1865_v10, %v252_v22  ;;  %v388_v33 = vadd.f32 %v1865_v10, %v254_v26 }
  0x56   :  { %v437_v37 = vadd.f32 %v1891_v30, %v303_v31  ;;  %v247_v41 = vmul.f32 %v1886_v28, %v113_v27  ;;  %v568_v46 = vmax.f32 %v440_v35, 0.0 }
  0x57   :  { %v439_v39 = vadd.f32 %v1891_v30, %v305_v32  ;;  %v249_v42 = vmul.f32 %v1886_v28, %v115_v29  ;;  %v516_v51 = vmax.f32 %v388_v33, 0.0 }
  0x58   :  { %v565_v43 = vmax.f32 %v437_v37, 0.0  ;;  %v381_v52 = vadd.f32 %v1891_v30, %v247_v41  ;;  %v2180_v37 = vld [vmem:[%s3072_s0 + $0xa0] sm:$0xff] }
  0x59   :  { %v567_v44 = vmax.f32 %v439_v39, 0.0 }
  0x5a   :  { %v509_v58 = vmax.f32 %v381_v52, 0.0 }
  0x5e   :  { %1760 = vmatmul.msk.bf16.gmra.mxu1 %vm745_vm0, %v620_v59  ;;  %v434_v59 = vadd.f32 %v1865_v10, %v300_v55  ;;  %v383_v55 = vadd.f32 %v1891_v30, %v249_v42  ;;  %v121_v42 = vunpack.c.l.bf16 %v2136_v47 }
  0x60   :  { %v562_v1 = vmax.f32 %v434_v59, 0.0  ;;  %v511_v59 = vmax.f32 %v383_v55, 0.0 }
  0x61   :  { %870 = vmatmul.bf16.gmra.mxu0 %v617_v62  ;;  %v384_v62 = vadd.f32 %v1865_v10, %v250_v50  ;;  %v514_v50 = vmax.f32 %v386_v38, 0.0  ;;  %v2185_v38 = vld [vmem:[%s3072_s0 + $0xa8] sm:$0xff] }
  0x62   :  { %v650_v6 = vpack.c.bf16 %v564_v2, %v562_v1  ;;  %v258_v1 = vmul.f32 %v1863_v9, %v124_v56  ;;  %v174_v2 = vunpack.c.h.bf16 %v65_v61  ;;  %v128_v41 = vunpack.c.h.bf16 %v2185_v38 }
  0x63   :  { %v512_v8 = vmax.f32 %v384_v62, 0.0  ;;  %v626_v57 = vpack.c.bf16 %v516_v51, %v514_v50  ;;  %v66_v62 = vld [vmem:[%s3072_s0 + $0x168] sm:$0xff] }
  0x64   :  { %950 = vmatmul.bf16.gmra.mxu2 %v649_v5  ;;  %v175_v3 = vunpack.c.l.bf16 %v66_v62  ;;  %v176_v4 = vunpack.c.h.bf16 %v66_v62  ;;  %v623_v5 = vpack.c.bf16 %v511_v59, %v509_v58  ;;  %v308_v16 = vmul.f32 %v1863_v9, %v174_v2 }
  0x65   :  { %1775 = vmatmul.msk.bf16.gmra.mxu3 %vm745_vm0, %v650_v6  ;;  %v624_v18 = vpack.c.bf16 %v512_v8, %v510_v7  ;;  %v117_v6 = vunpack.c.l.bf16 %v2100_v13  ;;  %v119_v7 = vunpack.c.l.bf16 %v2105_v14  ;;  %v307_v8 = vmul.f32 %v1886_v28, %v173_v0 }
  0x66   :  { %v309_v15 = vmul.f32 %v1886_v28, %v175_v3  ;;  %v310_v17 = vmul.f32 %v1863_v9, %v176_v4  ;;  %v392_v12 = vadd.f32 %v1865_v10, %v258_v1  ;;  %v442_v13 = vadd.f32 %v1865_v10, %v308_v16 }
  0x67   :  { %v441_v11 = vadd.f32 %v1891_v30, %v307_v8  ;;  %v253_v21 = vmul.f32 %v1886_v28, %v119_v7  ;;  %v262_v55 = vmul.f32 %v1863_v9, %v128_v41 }
  0x68   :  { %v443_v19 = vadd.f32 %v1891_v30, %v309_v15  ;;  %v444_v14 = vadd.f32 %v1865_v10, %v310_v17  ;;  %v570_v25 = vmax.f32 %v442_v13, 0.0  ;;  %v520_v29 = vmax.f32 %v392_v12, 0.0 }
  0x69   :  { %v569_v22 = vmax.f32 %v441_v11, 0.0  ;;  %v387_v36 = vadd.f32 %v1891_v30, %v253_v21  ;;  %v2232_v11 = vld [vmem:[%s3072_s0 + $0xb8] sm:$0xff] }
  0x6a   :  { %v571_v24 = vmax.f32 %v443_v19, 0.0  ;;  %v572_v26 = vmax.f32 %v444_v14, 0.0 }
  0x6b   :  { %v515_v33 = vmax.f32 %v387_v36, 0.0 }
  0x6c   :  { %v653_v31 = vpack.c.bf16 %v571_v24, %v569_v22  ;;  %v654_v32 = vpack.c.bf16 %v572_v26, %v570_v25 }
  0x6e   :  { %1761 = vmatmul.msk.bf16.gmra.mxu1 %vm745_vm0, %v622_v34  ;;  %v304_v34 = vmul.f32 %v1863_v9, %v170_v23 }
  0x70   :  { %v438_v40 = vadd.f32 %v1865_v10, %v304_v34 }
  0x71   :  { %875 = vmatmul.bf16.gmra.mxu0 %v619_v48  ;;  %v651_v48 = vpack.c.bf16 %v567_v44, %v565_v43  ;;  %v123_v44 = vunpack.c.l.bf16 %v2143_v53  ;;  %v255_v53 = vmul.f32 %v1886_v28, %v121_v42 }
  0x72   :  { %v566_v45 = vmax.f32 %v438_v40, 0.0  ;;  %v126_v40 = vunpack.c.h.bf16 %v2180_v37 }
  0x74   :  { %v652_v49 = vpack.c.bf16 %v568_v46, %v566_v45  ;;  %955 = vmatmul.bf16.gmra.mxu2 %v651_v48  ;;  %v67_v45 = vld [vmem:[%s3072_s0 + $0x170] sm:$0xff]  ;;  %v68_v46 = vld [vmem:[%s3072_s0 + $0x178] sm:$0xff] }
  0x75   :  { %v177_v48 = vunpack.c.l.bf16 %v67_v45  ;;  %v178_v50 = vunpack.c.h.bf16 %v67_v45  ;;  %v179_v51 = vunpack.c.l.bf16 %v68_v46  ;;  %v180_v52 = vunpack.c.h.bf16 %v68_v46 }
  0x76   :  { %1776 = vmatmul.msk.bf16.gmra.mxu3 %vm745_vm0, %v652_v49  ;;  %v260_v49 = vmul.f32 %v1863_v9, %v126_v40  ;;  %v127_v40 = vunpack.c.l.bf16 %v2185_v38 }
  0x77   :  { %v311_v54 = vmul.f32 %v1886_v28, %v177_v48  ;;  %v313_v58 = vmul.f32 %v1886_v28, %v179_v51  ;;  %v312_v59 = vmul.f32 %v1863_v9, %v178_v50  ;;  %v314_v61 = vmul.f32 %v1863_v9, %v180_v52 }
  0x78   :  { %v394_v0 = vadd.f32 %v1865_v10, %v260_v49 }
  0x79   :  { %v447_v1 = vadd.f32 %v1891_v30, %v313_v58  ;;  %v446_v2 = vadd.f32 %v1865_v10, %v312_v59  ;;  %v448_v3 = vadd.f32 %v1865_v10, %v314_v61 }
  0x7a   :  { %v522_v13 = vmax.f32 %v394_v0, 0.0 }
  0x7b   :  { %v575_v15 = vmax.f32 %v447_v1, 0.0  ;;  %v574_v16 = vmax.f32 %v446_v2, 0.0  ;;  %v576_v17 = vmax.f32 %v448_v3, 0.0 }
  0x7d   :  { %v656_v19 = vpack.c.bf16 %v576_v17, %v574_v16 }
  0x7e   :  { %1762 = vmatmul.msk.bf16.gmra.mxu1 %vm745_vm0, %v624_v18  ;;  %v390_v18 = vadd.f32 %v1865_v10, %v256_v63  ;;  %v445_v63 = vadd.f32 %v1891_v30, %v311_v54 }
  0x80   :  { %v518_v27 = vmax.f32 %v390_v18, 0.0  ;;  %v573_v7 = vmax.f32 %v445_v63, 0.0  ;;  %v2227_v18 = vld [vmem:[%s3072_s0 + $0xb0] sm:$0xff] }
  0x81   :  { %880 = vmatmul.bf16.gmra.mxu0 %v621_v20  ;;  %v251_v20 = vmul.f32 %v1886_v28, %v117_v6  ;;  %v389_v6 = vadd.f32 %v1891_v30, %v255_v53  ;;  %v130_v24 = vunpack.c.h.bf16 %v2227_v18 }
  0x82   :  { %v628_v39 = vpack.c.bf16 %v520_v29, %v518_v27  ;;  %v655_v12 = vpack.c.bf16 %v575_v15, %v573_v7  ;;  %v132_v27 = vunpack.c.h.bf16 %v2232_v11  ;;  %v125_v29 = vunpack.c.l.bf16 %v2180_v37 }
  0x83   :  { %v385_v34 = vadd.f32 %v1891_v30, %v251_v20  ;;  %v517_v21 = vmax.f32 %v389_v6, 0.0 }
  0x84   :  { %960 = vmatmul.bf16.gmra.mxu2 %v653_v31  ;;  %v266_v41 = vmul.f32 %v1863_v9, %v132_v27  ;;  %v259_v38 = vmul.f32 %v1886_v28, %v125_v29 }
  0x85   :  { %v513_v35 = vmax.f32 %v385_v34, 0.0 }
  0x86   :  { %1777 = vmatmul.msk.bf16.gmra.mxu3 %vm745_vm0, %v654_v32  ;;  %v400_v2 = vadd.f32 %v1865_v10, %v266_v41  ;;  %v129_v41 = vunpack.c.l.bf16 %v2227_v18 }
  0x87   :  { %v625_v47 = vpack.c.bf16 %v515_v33, %v513_v35  ;;  %v69_v35 = vld [vmem:[%s3072_s0 + $0x180] sm:$0xff] }
  0x88   :  { %v181_v42 = vunpack.c.l.bf16 %v69_v35 }
  0x8a   :  { %v315_v51 = vmul.f32 %v1886_v28, %v181_v42  ;;  %v72_v42 = vld [vmem:[%s3072_s0 + $0x198] sm:$0xff] }
  0x8b   :  { %v2148_v60 = vpop.f32.mrf.mxu1 }
  0x8c   :  { %v449_v59 = vadd.f32 %v1891_v30, %v315_v51 }
  0x8e   :  { %1763 = vmatmul.msk.bf16.gmra.mxu1 %vm745_vm0, %v626_v57  ;;  %v257_v57 = vmul.f32 %v1886_v28, %v123_v44  ;;  %v182_v44 = vunpack.c.h.bf16 %v69_v35  ;;  %v577_v3 = vmax.f32 %v449_v59, 0.0 }
  0x90   :  { %v316_v54 = vmul.f32 %v1863_v9, %v182_v44 }
  0x91   :  { %885 = vmatmul.bf16.gmra.mxu0 %v623_v5  ;;  %v396_v5 = vadd.f32 %v1865_v10, %v262_v55  ;;  %v261_v55 = vmul.f32 %v1886_v28, %v127_v40 }
  0x93   :  { %v2173_v23 = vpop.f32.mrf.mxu1  ;;  %v524_v14 = vmax.f32 %v396_v5, 0.0  ;;  %v395_v15 = vadd.f32 %v1891_v30, %v261_v55 }
  0x94   :  { %965 = vmatmul.bf16.gmra.mxu2 %v655_v12 }
  0x95   :  { %v630_v32 = vpack.c.bf16 %v524_v14, %v522_v13 }
  0x96   :  { %1778 = vmatmul.msk.bf16.gmra.mxu3 %vm745_vm0, %v656_v19 }
  0x9b   :  { %v2191_v43 = vpop.f32.mrf.mxu1 }
  0x9e   :  { %1764 = vmatmul.msk.bf16.gmra.mxu1 %vm745_vm0, %v628_v39  ;;  %v851_v56 = vpop.f32.mrf.mxu0  ;;  %v264_v39 = vmul.f32 %v1863_v9, %v130_v24 }
  0x9f   :  { %v1021_v62 = vadd.f32 %v2148_v60, %v851_v56  ;;  %v391_v60 = vadd.f32 %v1891_v30, %v257_v57 }
  0xa1   :  { %v1180_v4 = vpack.c.bf16 %v1021_v62, %v1021_v62  ;;  %890 = vmatmul.bf16.gmra.mxu0 %v625_v47  ;;  %v519_v22 = vmax.f32 %v391_v60, 0.0  ;;  %v398_v62 = vadd.f32 %v1865_v10, %v264_v39  ;;  %v393_v60 = vadd.f32 %v1891_v30, %v259_v38 }
  0xa3   :  { %v2217_v8 = vpop.f32.mrf.mxu1  ;;  %1245 = vst.msk [vmem:[%s3075_s4] sm:$0xf] %vm1244_vm1, %v1180_v4  ;;  %v1309_v25 = vunpack.c.l.bf16 %v1180_v4  ;;  %v627_v36 = vpack.c.bf16 %v519_v22, %v517_v21  ;;  %v450_v4 = vadd.f32 %v1865_v10, %v316_v54  ;;  %v526_v14 = vmax.f32 %v398_v62, 0.0  ;;  %v2284_v21 = vld [vmem:[%s3072_s0 + $0xc0] sm:$0xff] }
  0xa4   :  { %v134_v39 = vunpack.c.h.bf16 %v2284_v21 }
  0xa5   :  { %v1509_v33 = vmul.f32 %v1309_v25, %v1309_v25  ;;  %v1374_v48 = vsel %vm1373_vm2, %v1309_v25, 0.0  ;;  %v578_v16 = vmax.f32 %v450_v4, 0.0  ;;  %v2289_v25 = vld [vmem:[%s3072_s0 + $0xc8] sm:$0xff] }
  0xa6   :  { %v853_v20 = vpop.f32.mrf.mxu0  ;;  %v268_v18 = vmul.f32 %v1863_v9, %v134_v39 }
  0xa7   :  { %v1023_v26 = vadd.f32 %v2173_v23, %v853_v20  ;;  %v70_v23 = vld [vmem:[%s3072_s0 + $0x188] sm:$0xff]  ;;  %v1573_v56 = vsel %vm1373_vm2, %v1509_v33, 0.0  ;;  %v528_v20 = vmax.f32 %v400_v2, 0.0  ;;  %v2296_v33 = vpop.f32.mrf.mxu2 }
  0xa8   :  { %v183_v45 = vunpack.c.l.bf16 %v70_v23  ;;  %v184_v46 = vunpack.c.h.bf16 %v70_v23  ;;  %v136_v23 = vunpack.c.h.bf16 %v2289_v25 }
  0xa9   :  { %v1181_v31 = vpack.c.bf16 %v1023_v26, %v1023_v26  ;;  %v632_v35 = vpack.c.bf16 %v528_v20, %v526_v14 }
  0xaa   :  { %v317_v53 = vmul.f32 %v1886_v28, %v183_v45  ;;  %v318_v0 = vmul.f32 %v1863_v9, %v184_v46  ;;  %v131_v45 = vunpack.c.l.bf16 %v2232_v11 }
  0xab   :  { %v2239_v34 = vpop.f32.mrf.mxu1  ;;  %1246 = vst.msk [vmem:[%s3075_s4 + $0x4] sm:$0xf] %vm1244_vm1, %v1181_v31  ;;  %v1310_v37 = vunpack.c.l.bf16 %v1181_v31  ;;  %v521_v31 = vmax.f32 %v393_v60, 0.0 }
  0xac   :  { %v451_v63 = vadd.f32 %v1891_v30, %v317_v53 }
  0xad   :  { %v1375_v49 = vsel %vm1373_vm2, %v1310_v37, 0.0  ;;  %v1510_v50 = vmul.f32 %v1310_v37, %v1310_v37 }
  0xae   :  { %1765 = vmatmul.msk.bf16.gmra.mxu1 %vm745_vm0, %v630_v32  ;;  %v1376_v52 = vadd.f32 %v1375_v49, %v1374_v48  ;;  %v856_v47 = vpop.f32.mrf.mxu0  ;;  %v579_v6 = vmax.f32 %v451_v63, 0.0  ;;  %v523_v32 = vmax.f32 %v395_v15, 0.0  ;;  %v187_v49 = vunpack.c.l.bf16 %v72_v42 }
  0xaf   :  { %v1574_v57 = vsel %vm1373_vm2, %v1510_v50, 0.0  ;;  %v1026_v58 = vadd.f32 %v2191_v43, %v856_v47  ;;  %v452_v43 = vadd.f32 %v1865_v10, %v318_v0  ;;  %v188_v50 = vunpack.c.h.bf16 %v72_v42 }
  0xb0   :  { %v1575_v61 = vadd.f32 %v1574_v57, %v1573_v56  ;;  %v657_v17 = vpack.c.bf16 %v579_v6, %v577_v3  ;;  %v629_v44 = vpack.c.bf16 %v523_v32, %v521_v31  ;;  %v270_v47 = vmul.f32 %v1863_v9, %v136_v23  ;;  %v2331_v6 = vld [vmem:[%s3072_s0 + $0xd0] sm:$0xff] }
  0xb1   :  { %v1182_v1 = vpack.c.bf16 %v1026_v58, %v1026_v58  ;;  %895 = vmatmul.bf16.gmra.mxu0 %v627_v36  ;;  %v580_v12 = vmax.f32 %v452_v43, 0.0  ;;  %v263_v56 = vmul.f32 %v1886_v28, %v129_v41  ;;  %v321_v11 = vmul.f32 %v1886_v28, %v187_v49 }
  0xb2   :  { %970 = vmatmul.bf16.gmra.mxu2 %v657_v17  ;;  %v402_v0 = vadd.f32 %v1865_v10, %v268_v18  ;;  %v322_v2 = vmul.f32 %v1863_v9, %v188_v50  ;;  %v404_v4 = vadd.f32 %v1865_v10, %v270_v47  ;;  %v138_v20 = vunpack.c.h.bf16 %v2331_v6  ;;  %v73_v50 = vld [vmem:[%s3072_s0 + $0x1a0] sm:$0xff] }
  0xb3   :  { %v2271_v5 = vpop.f32.mrf.mxu1  ;;  %1247 = vst.msk [vmem:[%s3075_s4 + $0x8] sm:$0xf] %vm1244_vm1, %v1182_v1  ;;  %v1311_v7 = vunpack.c.l.bf16 %v1182_v1  ;;  %v658_v26 = vpack.c.bf16 %v580_v12, %v578_v16  ;;  %v455_v1 = vadd.f32 %v1891_v30, %v321_v11  ;;  %v397_v12 = vadd.f32 %v1891_v30, %v263_v56 }
  0xb4   :  { %v456_v16 = vadd.f32 %v1865_v10, %v322_v2  ;;  %v532_v31 = vmax.f32 %v404_v4, 0.0  ;;  %v133_v47 = vunpack.c.l.bf16 %v2284_v21  ;;  %v190_v56 = vunpack.c.h.bf16 %v73_v50 }
  0xb5   :  { %v1377_v19 = vsel %vm1373_vm2, %v1311_v7, 0.0  ;;  %v1511_v13 = vmul.f32 %v1311_v7, %v1311_v7  ;;  %1779 = vmatmul.msk.bf16.gmra.mxu3 %vm745_vm0, %v658_v26  ;;  %v583_v15 = vmax.f32 %v455_v1, 0.0  ;;  %v525_v41 = vmax.f32 %v397_v12, 0.0  ;;  %v1105_v18 = vpop.f32.mrf.mxu3 }
  0xb6   :  { %v1378_v22 = vadd.f32 %v1377_v19, %v1376_v52  ;;  %v858_v24 = vpop.f32.mrf.mxu0  ;;  %v324_v1 = vmul.f32 %v1863_v9, %v190_v56 }
  0xb7   :  { %v1576_v27 = vsel %vm1373_vm2, %v1511_v13, 0.0  ;;  %v1028_v29 = vadd.f32 %v2217_v8, %v858_v24  ;;  %v71_v8 = vld [vmem:[%s3072_s0 + $0x190] sm:$0xff]  ;;  %v2348_v13 = vld [vmem:[%s3072_s0 + $0xd8] sm:$0xff]  ;;  %v584_v24 = vmax.f32 %v456_v16, 0.0 }
  0xb8   :  { %v1577_v36 = vadd.f32 %v1576_v27, %v1575_v61  ;;  %v185_v46 = vunpack.c.l.bf16 %v71_v8  ;;  %v186_v48 = vunpack.c.h.bf16 %v71_v8  ;;  %v265_v61 = vmul.f32 %v1886_v28, %v131_v45 }
  0xb9   :  { %v1183_v40 = vpack.c.bf16 %v1028_v29, %v1028_v29  ;;  %v530_v29 = vmax.f32 %v402_v0, 0.0  ;;  %v140_v39 = vunpack.c.h.bf16 %v2348_v13 }
  0xba   :  { %v319_v55 = vmul.f32 %v1886_v28, %v185_v46  ;;  %v320_v57 = vmul.f32 %v1863_v9, %v186_v48  ;;  %v399_v19 = vadd.f32 %v1891_v30, %v265_v61 }
  0xbb   :  { %v2298_v37 = vpop.f32.mrf.mxu1  ;;  %1248 = vst.msk [vmem:[%s3075_s4 + $0xc] sm:$0xf] %vm1244_vm1, %v1183_v40  ;;  %v1312_v38 = vunpack.c.l.bf16 %v1183_v40  ;;  %v634_v45 = vpack.c.bf16 %v532_v31, %v530_v29  ;;  %v274_v49 = vmul.f32 %v1863_v9, %v140_v39 }
  0xbc   :  { %v453_v62 = vadd.f32 %v1891_v30, %v319_v55  ;;  %v454_v7 = vadd.f32 %v1865_v10, %v320_v57  ;;  %v527_v8 = vmax.f32 %v399_v19, 0.0  ;;  %v189_v55 = vunpack.c.l.bf16 %v73_v50 }
  0xbd   :  { %v1379_v51 = vsel %vm1373_vm2, %v1312_v38, 0.0  ;;  %v1512_v52 = vmul.f32 %v1312_v38, %v1312_v38  ;;  %v272_v38 = vmul.f32 %v1863_v9, %v138_v20  ;;  %v408_v21 = vadd.f32 %v1865_v10, %v274_v49  ;;  %v1107_v19 = vpop.f32.mrf.mxu3 }
  0xbe   :  { %1766 = vmatmul.msk.bf16.gmra.mxu1 %vm745_vm0, %v632_v35  ;;  %v1380_v53 = vadd.f32 %v1379_v51, %v1378_v22  ;;  %v861_v54 = vpop.f32.mrf.mxu0  ;;  %v581_v43 = vmax.f32 %v453_v62, 0.0  ;;  %v582_v14 = vmax.f32 %v454_v7, 0.0  ;;  %v323_v61 = vmul.f32 %v1886_v28, %v189_v55 }
  0xbf   :  { %v1578_v58 = vsel %vm1373_vm2, %v1512_v52, 0.0  ;;  %v1031_v59 = vadd.f32 %v2239_v34, %v861_v54  ;;  %v2333_v34 = vpop.f32.mrf.mxu2  ;;  %v631_v52 = vpack.c.bf16 %v527_v8, %v525_v41  ;;  %v135_v54 = vunpack.c.l.bf16 %v2289_v25  ;;  %v2414_v41 = vld [vmem:[%s3072_s0 + $0xe8] sm:$0xff] }
  0xc0   :  { %v1579_v63 = vadd.f32 %v1578_v58, %v1577_v36  ;;  %v659_v22 = vpack.c.bf16 %v583_v15, %v581_v43  ;;  %v660_v40 = vpack.c.bf16 %v584_v24, %v582_v14  ;;  %v457_v4 = vadd.f32 %v1891_v30, %v323_v61 }
  0xc1   :  { %v1184_v3 = vpack.c.bf16 %v1031_v59, %v1031_v59  ;;  %900 = vmatmul.bf16.gmra.mxu0 %v629_v44  ;;  %v269_v7 = vmul.f32 %v1886_v28, %v135_v54  ;;  %v137_v54 = vunpack.c.l.bf16 %v2331_v6  ;;  %v76_v6 = vld [vmem:[%s3072_s0 + $0x1b8] sm:$0xff] }
  0xc2   :  { %975 = vmatmul.bf16.gmra.mxu2 %v659_v22  ;;  %v585_v14 = vmax.f32 %v457_v4, 0.0  ;;  %v458_v22 = vadd.f32 %v1865_v10, %v324_v1 }
  0xc3   :  { %v2336_v60 = vpop.f32.mrf.mxu1  ;;  %1249 = vst.msk [vmem:[%s3075_s4 + $0x10] sm:$0xf] %vm1244_vm1, %v1184_v3  ;;  %v1313_v17 = vunpack.c.l.bf16 %v1184_v3  ;;  %v267_v3 = vmul.f32 %v1886_v28, %v133_v47 }
  0xc5   :  { %v1381_v26 = vsel %vm1373_vm2, %v1313_v17, 0.0  ;;  %v1513_v27 = vmul.f32 %v1313_v17, %v1313_v17  ;;  %1780 = vmatmul.msk.bf16.gmra.mxu3 %vm745_vm0, %v660_v40  ;;  %v586_v40 = vmax.f32 %v458_v22, 0.0 }
  0xc6   :  { %v1382_v32 = vadd.f32 %v1381_v26, %v1380_v53  ;;  %v863_v36 = vpop.f32.mrf.mxu0  ;;  %v2372_v53 = vadd.f32 %v1865_v10, %v272_v38 }
  0xc7   :  { %v1580_v35 = vsel %vm1373_vm2, %v1513_v27, 0.0  ;;  %v1033_v23 = vadd.f32 %v2271_v5, %v863_v36  ;;  %v936_v46 = vpop.f32.mrf.mxu2  ;;  %v74_v5 = vld [vmem:[%s3072_s0 + $0x1a8] sm:$0xff]  ;;  %v2397_v27 = vld [vmem:[%s3072_s0 + $0xe0] sm:$0xff]  ;;  %v536_v36 = vmax.f32 %v408_v21, 0.0 }
  0xc8   :  { %v1581_v42 = vadd.f32 %v1580_v35, %v1579_v63  ;;  %v191_v11 = vunpack.c.l.bf16 %v74_v5  ;;  %v192_v59 = vunpack.c.h.bf16 %v74_v5  ;;  %v1106_v15 = vadd.f32 %v1105_v18, %v936_v46 }
  0xc9   :  { %v1185_v44 = vpack.c.bf16 %v1033_v23, %v1033_v23  ;;  %v534_v24 = vmax.f32 %v2372_v53, 0.0  ;;  %v401_v35 = vadd.f32 %v1891_v30, %v267_v3  ;;  %v403_v23 = vadd.f32 %v1891_v30, %v269_v7 }
  0xca   :  { %v325_v0 = vmul.f32 %v1886_v28, %v191_v11  ;;  %v326_v20 = vmul.f32 %v1863_v9, %v192_v59  ;;  %v2392_v26 = vpack.c.bf16 %v1106_v15, %v1106_v15  ;;  %v1110_v59 = vpop.f32.mrf.mxu3  ;;  %v271_v3 = vmul.f32 %v1886_v28, %v137_v54 }
  0xcb   :  { %v2357_v48 = vpop.f32.mrf.mxu1  ;;  %1250 = vst.msk [vmem:[%s3075_s4 + $0x14] sm:$0xf] %vm1244_vm1, %v1185_v44  ;;  %v1314_v51 = vunpack.c.l.bf16 %v1185_v44  ;;  %v529_v55 = vmax.f32 %v401_v35, 0.0  ;;  %v531_v53 = vmax.f32 %v403_v23, 0.0  ;;  %v636_v11 = vpack.c.bf16 %v536_v36, %v534_v24 }
  0xcc   :  { %v459_v16 = vadd.f32 %v1891_v30, %v325_v0  ;;  %v460_v39 = vadd.f32 %v1865_v10, %v326_v20  ;;  %1279 = vst.msk [vmem:[%s3075_s4 + $0x88] sm:$0xf] %vm1244_vm1, %v2392_v26  ;;  %v2449_v0 = vld [vmem:[%s3072_s0 + $0x108] sm:$0xff]  ;;  %v196_v20 = vunpack.c.h.bf16 %v76_v6 }
  0xcd   :  { %v1383_v57 = vsel %vm1373_vm2, %v1314_v51, 0.0  ;;  %v1514_v58 = vmul.f32 %v1314_v51, %v1314_v51  ;;  %v144_v51 = vunpack.c.h.bf16 %v2414_v41 }
  0xce   :  { %1767 = vmatmul.msk.bf16.gmra.mxu1 %vm745_vm0, %v634_v45  ;;  %v1384_v62 = vadd.f32 %v1383_v57, %v1382_v32  ;;  %v866_v63 = vpop.f32.mrf.mxu0  ;;  %v587_v31 = vmax.f32 %v459_v16, 0.0  ;;  %v142_v45 = vunpack.c.h.bf16 %v2397_v27  ;;  %v588_v46 = vmax.f32 %v460_v39, 0.0 }
  0xcf   :  { %v1582_v25 = vsel %vm1373_vm2, %v1514_v58, 0.0  ;;  %v1036_v2 = vadd.f32 %v2298_v37, %v866_v63  ;;  %v938_v12 = vpop.f32.mrf.mxu2  ;;  %v2443_v63 = vld [vmem:[%s3072_s0 + $0x100] sm:$0xff]  ;;  %v405_v39 = vadd.f32 %v1891_v30, %v271_v3 }
  0xd0   :  { %v1583_v43 = vadd.f32 %v1582_v25, %v1581_v42  ;;  %v1108_v29 = vadd.f32 %v1107_v19, %v938_v12  ;;  %v661_v42 = vpack.c.bf16 %v587_v31, %v585_v14  ;;  %v276_v57 = vmul.f32 %v1863_v9, %v142_v45 }
  0xd1   :  { %v1186_v17 = vpack.c.bf16 %v1036_v2, %v1036_v2  ;;  %905 = vmatmul.bf16.gmra.mxu0 %v631_v52  ;;  %v662_v52 = vpack.c.bf16 %v588_v46, %v586_v40  ;;  %v150_v21 = vunpack.c.h.bf16 %v2443_v63  ;;  %v278_v25 = vmul.f32 %v1863_v9, %v144_v51 }
  0xd2   :  { %v2416_v8 = vpack.c.bf16 %v1108_v29, %v1108_v29  ;;  %980 = vmatmul.bf16.gmra.mxu2 %v661_v42  ;;  %v633_v2 = vpack.c.bf16 %v531_v53, %v529_v55  ;;  %v410_v16 = vadd.f32 %v1865_v10, %v276_v57  ;;  %v2472_v42 = vld [vmem:[%s3072_s0 + $0xf0] sm:$0xff]  ;;  %v330_v46 = vmul.f32 %v1863_v9, %v196_v20 }
  0xd3   :  { %v2389_v37 = vpop.f32.mrf.mxu1  ;;  %1251 = vst.msk [vmem:[%s3075_s4 + $0x18] sm:$0xf] %vm1244_vm1, %v1186_v17  ;;  %v1315_v32 = vunpack.c.l.bf16 %v1186_v17  ;;  %v412_v31 = vadd.f32 %v1865_v10, %v278_v25  ;;  %v146_v57 = vunpack.c.h.bf16 %v2472_v42 }
  0xd4   :  { %1280 = vst.msk [vmem:[%s3075_s4 + $0x8c] sm:$0xf] %vm1244_vm1, %v2416_v8  ;;  %v464_v54 = vadd.f32 %v1865_v10, %v330_v46 }
  0xd5   :  { %v1385_v38 = vsel %vm1373_vm2, %v1315_v32, 0.0  ;;  %v1515_v44 = vmul.f32 %v1315_v32, %v1315_v32  ;;  %1781 = vmatmul.msk.bf16.gmra.mxu3 %vm745_vm0, %v662_v52 }
  0xd6   :  { %v1386_v18 = vadd.f32 %v1385_v38, %v1384_v62  ;;  %v868_v49 = vpop.f32.mrf.mxu0  ;;  %v75_v62 = vld [vmem:[%s3072_s0 + $0x1b0] sm:$0xff] }
  0xd7   :  { %v1584_v50 = vsel %vm1373_vm2, %v1515_v44, 0.0  ;;  %v1038_v5 = vadd.f32 %v2336_v60, %v868_v49  ;;  %v941_v58 = vpop.f32.mrf.mxu2  ;;  %v139_v60 = vunpack.c.l.bf16 %v2348_v13  ;;  %v152_v13 = vunpack.c.h.bf16 %v2449_v0  ;;  %v1112_v44 = vpop.f32.mrf.mxu3 }
  0xd8   :  { %v1585_v47 = vadd.f32 %v1584_v50, %v1583_v43  ;;  %v193_v4 = vunpack.c.l.bf16 %v75_v62  ;;  %v195_v43 = vunpack.c.l.bf16 %v76_v6  ;;  %v194_v17 = vunpack.c.h.bf16 %v75_v62 }
  0xd9   :  { %v1187_v56 = vpack.c.bf16 %v1038_v5, %v1038_v5  ;;  %v273_v14 = vmul.f32 %v1886_v28, %v139_v60  ;;  %v1111_v40 = vadd.f32 %v1110_v59, %v941_v58 }
  0xda   :  { %v327_v22 = vmul.f32 %v1886_v28, %v193_v4  ;;  %v329_v32 = vmul.f32 %v1886_v28, %v195_v43  ;;  %v328_v45 = vmul.f32 %v1863_v9, %v194_v17 }
  0xdb   :  { %v2431_v61 = vpop.f32.mrf.mxu1  ;;  %1252 = vst.msk [vmem:[%s3075_s4 + $0x1c] sm:$0xf] %vm1244_vm1, %v1187_v56  ;;  %v1316_v1 = vunpack.c.l.bf16 %v1187_v56  ;;  %v407_v49 = vadd.f32 %v1891_v30, %v273_v14  ;;  %v2480_v50 = vpack.c.bf16 %v1111_v40, %v1111_v40  ;;  %v538_v56 = vmax.f32 %v410_v16, 0.0 }
  0xdc   :  { %v461_v35 = vadd.f32 %v1891_v30, %v327_v22  ;;  %v462_v53 = vadd.f32 %v1865_v10, %v328_v45  ;;  %v284_v16 = vmul.f32 %v1863_v9, %v150_v21  ;;  %v77_v21 = vld [vmem:[%s3072_s0 + $0x1c0] sm:$0xff] }
  0xdd   :  { %v1387_v7 = vsel %vm1373_vm2, %v1316_v1, 0.0  ;;  %v1516_v15 = vmul.f32 %v1316_v1, %v1316_v1  ;;  %1281 = vst.msk [vmem:[%s3075_s4 + $0x90] sm:$0xf] %vm1244_vm1, %v2480_v50  ;;  %v535_v3 = vmax.f32 %v407_v49, 0.0  ;;  %v197_v40 = vunpack.c.l.bf16 %v77_v21 }
  0xde   :  { %1768 = vmatmul.msk.bf16.gmra.mxu1 %vm745_vm0, %v636_v11  ;;  %v1388_v12 = vadd.f32 %v1387_v7, %v1386_v18  ;;  %v871_v19 = vpop.f32.mrf.mxu0  ;;  %v589_v51 = vmax.f32 %v461_v35, 0.0  ;;  %v540_v11 = vmax.f32 %v412_v31, 0.0  ;;  %v590_v6 = vmax.f32 %v462_v53, 0.0 }
  0xdf   :  { %v1586_v24 = vsel %vm1373_vm2, %v1516_v15, 0.0  ;;  %v1041_v29 = vadd.f32 %v2357_v48, %v871_v19  ;;  %v943_v38 = vpop.f32.mrf.mxu2  ;;  %v463_v48 = vadd.f32 %v1891_v30, %v329_v32  ;;  %v592_v15 = vmax.f32 %v464_v54, 0.0 }
  0xe0   :  { %v1587_v36 = vadd.f32 %v1586_v24, %v1585_v47  ;;  %v1113_v5 = vadd.f32 %v1112_v44, %v943_v38  ;;  %v2489_v47 = vld [vmem:[%s3072_s0 + $0xf8] sm:$0xff]  ;;  %v280_v19 = vmul.f32 %v1863_v9, %v146_v57  ;;  %v1115_v24 = vpop.f32.mrf.mxu3  ;;  %v143_v38 = vunpack.c.l.bf16 %v2414_v41 }
  0xe1   :  { %v1188_v23 = vpack.c.bf16 %v1041_v29, %v1041_v29  ;;  %910 = vmatmul.bf16.gmra.mxu0 %v633_v2  ;;  %v591_v55 = vmax.f32 %v463_v48, 0.0  ;;  %v533_v2 = vmax.f32 %v405_v39, 0.0  ;;  %v148_v4 = vunpack.c.h.bf16 %v2489_v47 }
  0xe2   :  { %v2499_v58 = vpack.c.bf16 %v1113_v5, %v1113_v5  ;;  %v664_v20 = vpack.c.bf16 %v592_v15, %v590_v6  ;;  %v286_v29 = vmul.f32 %v1863_v9, %v152_v13  ;;  %v414_v35 = vadd.f32 %v1865_v10, %v280_v19 }
  0xe3   :  { %v2477_v18 = vpop.f32.mrf.mxu1  ;;  %1253 = vst.msk [vmem:[%s3075_s4 + $0x20] sm:$0xf] %vm1244_vm1, %v1188_v23  ;;  %v1317_v52 = vunpack.c.l.bf16 %v1188_v23  ;;  %v663_v62 = vpack.c.bf16 %v591_v55, %v589_v51  ;;  %v635_v32 = vpack.c.bf16 %v535_v3, %v533_v2  ;;  %v282_v63 = vmul.f32 %v1863_v9, %v148_v4 }
  0xe4   :  { %1282 = vst.msk [vmem:[%s3075_s4 + $0x94] sm:$0xf] %vm1244_vm1, %v2499_v58  ;;  %v420_v13 = vadd.f32 %v1865_v10, %v286_v29  ;;  %v141_v23 = vunpack.c.l.bf16 %v2397_v27  ;;  %v331_v49 = vmul.f32 %v1886_v28, %v197_v40  ;;  %v198_v53 = vunpack.c.h.bf16 %v77_v21 }
  0xe5   :  { %v1389_v59 = vsel %vm1373_vm2, %v1317_v52, 0.0  ;;  %v1517_v60 = vmul.f32 %v1317_v52, %v1317_v52  ;;  %985 = vmatmul.bf16.gmra.mxu2 %v663_v62  ;;  %1782 = vmatmul.msk.bf16.gmra.mxu3 %vm745_vm0, %v664_v20  ;;  %v416_v52 = vadd.f32 %v1865_v10, %v282_v63 }
  0xe6   :  { %v1390_v1 = vadd.f32 %v1389_v59, %v1388_v12  ;;  %v873_v25 = vpop.f32.mrf.mxu0  ;;  %v638_v12 = vpack.c.bf16 %v540_v11, %v538_v56  ;;  %v548_v46 = vmax.f32 %v420_v13, 0.0  ;;  %v465_v56 = vadd.f32 %v1891_v30, %v331_v49 }
  0xe7   :  { %v1588_v43 = vsel %vm1373_vm2, %v1517_v60, 0.0  ;;  %v1043_v7 = vadd.f32 %v2389_v37, %v873_v25  ;;  %v946_v22 = vpop.f32.mrf.mxu2  ;;  %v418_v37 = vadd.f32 %v1865_v10, %v284_v16  ;;  %v275_v57 = vmul.f32 %v1886_v28, %v141_v23 }
  0xe8   :  { %v1589_v17 = vadd.f32 %v1588_v43, %v1587_v36  ;;  %v78_v36 = vld [vmem:[%s3072_s0 + $0x1c8] sm:$0xff]  ;;  %v277_v59 = vmul.f32 %v1886_v28, %v143_v38  ;;  %v1116_v60 = vadd.f32 %v1115_v24, %v946_v22  ;;  %v593_v2 = vmax.f32 %v465_v56, 0.0 }
  0xe9   :  { %v1189_v14 = vpack.c.bf16 %v1043_v7, %v1043_v7  ;;  %v546_v39 = vmax.f32 %v418_v37, 0.0  ;;  %v199_v44 = vunpack.c.l.bf16 %v78_v36  ;;  %v200_v3 = vunpack.c.h.bf16 %v78_v36 }
  0xea   :  { %v2551_v43 = vpack.c.bf16 %v1116_v60, %v1116_v60  ;;  %v332_v15 = vmul.f32 %v1863_v9, %v198_v53  ;;  %v411_v20 = vadd.f32 %v1891_v30, %v277_v59 }
  0xeb   :  { %v2518_v31 = vpop.f32.mrf.mxu1  ;;  %1254 = vst.msk [vmem:[%s3075_s4 + $0x24] sm:$0xf] %vm1244_vm1, %v1189_v14  ;;  %v1318_v0 = vunpack.c.l.bf16 %v1189_v14  ;;  %v333_v55 = vmul.f32 %v1886_v28, %v199_v44  ;;  %v2543_v54 = vpack.c.bf16 %v548_v46, %v546_v39  ;;  %v334_v19 = vmul.f32 %v1863_v9, %v200_v3 }
  0xec   :  { %v409_v14 = vadd.f32 %v1891_v30, %v275_v57  ;;  %1283 = vst.msk [vmem:[%s3075_s4 + $0x98] sm:$0xf] %vm1244_vm1, %v2551_v43  ;;  %v466_v24 = vadd.f32 %v1865_v10, %v332_v15  ;;  %v539_v38 = vmax.f32 %v411_v20, 0.0  ;;  %v145_v44 = vunpack.c.l.bf16 %v2472_v42 }
  0xed   :  { %v1391_v48 = vsel %vm1373_vm2, %v1318_v0, 0.0  ;;  %v1518_v45 = vmul.f32 %v1318_v0, %v1318_v0  ;;  %v467_v25 = vadd.f32 %v1891_v30, %v333_v55  ;;  %v468_v63 = vadd.f32 %v1865_v10, %v334_v19  ;;  %v80_v55 = vld [vmem:[%s3072_s0 + $0x1d8] sm:$0xff] }
  0xee   :  { %1769 = vmatmul.msk.bf16.gmra.mxu1 %vm745_vm0, %v638_v12  ;;  %v1392_v5 = vadd.f32 %v1391_v48, %v1390_v1  ;;  %v876_v51 = vpop.f32.mrf.mxu0  ;;  %v1117_v1 = vpop.f32.mrf.mxu3  ;;  %v594_v39 = vmax.f32 %v466_v24, 0.0  ;;  %v537_v23 = vmax.f32 %v409_v14, 0.0  ;;  %v279_v56 = vmul.f32 %v1886_v28, %v145_v44 }
  0xef   :  { %v1590_v27 = vsel %vm1373_vm2, %v1518_v45, 0.0  ;;  %v1046_v41 = vadd.f32 %v2431_v61, %v876_v51  ;;  %v948_v6 = vpop.f32.mrf.mxu2  ;;  %v542_v61 = vmax.f32 %v414_v35, 0.0  ;;  %v595_v12 = vmax.f32 %v467_v25, 0.0 }
  0xf0   :  { %v1591_v11 = vadd.f32 %v1590_v27, %v1589_v17  ;;  %v1118_v7 = vadd.f32 %v1117_v1, %v948_v6  ;;  %v544_v17 = vmax.f32 %v416_v52, 0.0  ;;  %v596_v40 = vmax.f32 %v468_v63, 0.0 }
  0xf1   :  { %v1190_v62 = vpack.c.bf16 %v1046_v41, %v1046_v41  ;;  %915 = vmatmul.bf16.gmra.mxu0 %v635_v32  ;;  %v665_v32 = vpack.c.bf16 %v595_v12, %v593_v2  ;;  %v147_v52 = vunpack.c.l.bf16 %v2489_v47  ;;  %v203_v41 = vunpack.c.l.bf16 %v80_v55 }
  0xf2   :  { %v2566_v22 = vpack.c.bf16 %v1118_v7, %v1118_v7  ;;  %v640_v45 = vpack.c.bf16 %v544_v17, %v542_v61  ;;  %v666_v46 = vpack.c.bf16 %v596_v40, %v594_v39  ;;  %v637_v47 = vpack.c.bf16 %v539_v38, %v537_v23 }
  0xf3   :  { %v2549_v4 = vpop.f32.mrf.mxu1  ;;  %1255 = vst.msk [vmem:[%s3075_s4 + $0x28] sm:$0xf] %vm1244_vm1, %v1190_v62  ;;  %v1319_v16 = vunpack.c.l.bf16 %v1190_v62  ;;  %v337_v62 = vmul.f32 %v1886_v28, %v203_v41  ;;  %v281_v25 = vmul.f32 %v1886_v28, %v147_v52  ;;  %v413_v40 = vadd.f32 %v1891_v30, %v279_v56  ;;  %v82_v56 = vld [vmem:[%s3072_s0 + $0x1e8] sm:$0xff] }
  0xf4   :  { %1284 = vst.msk [vmem:[%s3075_s4 + $0x9c] sm:$0xf] %vm1244_vm1, %v2566_v22 }
  0xf5   :  { %v1393_v29 = vsel %vm1373_vm2, %v1319_v16, 0.0  ;;  %v1519_v37 = vmul.f32 %v1319_v16, %v1319_v16  ;;  %990 = vmatmul.bf16.gmra.mxu2 %v665_v32  ;;  %1783 = vmatmul.msk.bf16.gmra.mxu3 %vm745_vm0, %v666_v46  ;;  %v471_v16 = vadd.f32 %v1891_v30, %v337_v62  ;;  %v208_v62 = vunpack.c.h.bf16 %v82_v56 }
  0xf6   :  { %v1394_v21 = vadd.f32 %v1393_v29, %v1392_v5  ;;  %v878_v36 = vpop.f32.mrf.mxu0  ;;  %v1120_v5 = vpop.f32.mrf.mxu3 }
  0xf7   :  { %v1592_v0 = vsel %vm1373_vm2, %v1519_v37, 0.0  ;;  %v1048_v13 = vadd.f32 %v2477_v18, %v878_v36  ;;  %v951_v49 = vpop.f32.mrf.mxu2  ;;  %v79_v18 = vld [vmem:[%s3072_s0 + $0x1d0] sm:$0xff]  ;;  %v599_v32 = vmax.f32 %v471_v16, 0.0 }
  0xf8   :  { %v1593_v35 = vadd.f32 %v1592_v0, %v1591_v11  ;;  %v201_v53 = vunpack.c.l.bf16 %v79_v18  ;;  %v202_v27 = vunpack.c.h.bf16 %v79_v18  ;;  %v204_v11 = vunpack.c.h.bf16 %v80_v55 }
  0xf9   :  { %v1191_v48 = vpack.c.bf16 %v1048_v13, %v1048_v13  ;;  %v1121_v12 = vadd.f32 %v1120_v5, %v951_v49  ;;  %v541_v18 = vmax.f32 %v413_v40, 0.0 }
  0xfa   :  { %v335_v60 = vmul.f32 %v1886_v28, %v201_v53  ;;  %v336_v2 = vmul.f32 %v1863_v9, %v202_v27  ;;  %v338_v3 = vmul.f32 %v1863_v9, %v204_v11 }
  0xfb   :  { %v2579_v51 = vpop.f32.mrf.mxu1  ;;  %1256 = vst.msk [vmem:[%s3075_s4 + $0x2c] sm:$0xf] %vm1244_vm1, %v1191_v48  ;;  %v1320_v42 = vunpack.c.l.bf16 %v1191_v48 }
  0xfc   :  { %v469_v15 = vadd.f32 %v1891_v30, %v335_v60  ;;  %v470_v19 = vadd.f32 %v1865_v10, %v336_v2  ;;  %v472_v14 = vadd.f32 %v1865_v10, %v338_v3 }
  0xfd   :  { %v1395_v57 = vsel %vm1373_vm2, %v1320_v42, 0.0  ;;  %v1520_v59 = vmul.f32 %v1320_v42, %v1320_v42 }
  0xfe   :  { %1770 = vmatmul.msk.bf16.gmra.mxu1 %vm745_vm0, %v640_v45  ;;  %v1396_v6 = vadd.f32 %v1395_v57, %v1394_v21  ;;  %v881_v1 = vpop.f32.mrf.mxu0  ;;  %v1122_v29 = vpop.f32.mrf.mxu3  ;;  %v597_v37 = vmax.f32 %v469_v15, 0.0  ;;  %v2609_v21 = vpack.c.bf16 %v1121_v12, %v1121_v12  ;;  %v598_v13 = vmax.f32 %v470_v19, 0.0 }
  0xff   :  { %v1594_v61 = vsel %vm1373_vm2, %v1520_v59, 0.0  ;;  %v1051_v7 = vadd.f32 %v2518_v31, %v881_v1  ;;  %v953_v24 = vpop.f32.mrf.mxu2  ;;  %v600_v39 = vmax.f32 %v472_v14, 0.0  ;;  %v207_v59 = vunpack.c.l.bf16 %v82_v56  ;;  %v83_v56 = vld [vmem:[%s3072_s0 + $0x1f0] sm:$0xff] }
 0x100   :  { %v1595_v17 = vadd.f32 %v1594_v61, %v1593_v35  ;;  %v1123_v31 = vadd.f32 %v1122_v29, %v953_v24  ;;  %v667_v0 = vpack.c.bf16 %v599_v32, %v597_v37  ;;  %v415_v35 = vadd.f32 %v1891_v30, %v281_v25  ;;  %1285 = vst.msk [vmem:[%s3075_s4 + $0xa0] sm:$0xf] %vm1244_vm1, %v2609_v21 }
 0x101   :  { %v1192_v20 = vpack.c.bf16 %v1051_v7, %v1051_v7  ;;  %920 = vmatmul.bf16.gmra.mxu0 %v637_v47  ;;  %v668_v5 = vpack.c.bf16 %v600_v39, %v598_v13  ;;  %v81_v47 = vld [vmem:[%s3072_s0 + $0x1e0] sm:$0xff]  ;;  %v341_v2 = vmul.f32 %v1886_v28, %v207_v59  ;;  %v342_v15 = vmul.f32 %v1863_v9, %v208_v62 }
 0x102   :  { %v2622_v23 = vpack.c.bf16 %v1123_v31, %v1123_v31  ;;  %v543_v55 = vmax.f32 %v415_v35, 0.0  ;;  %v205_v11 = vunpack.c.l.bf16 %v81_v47  ;;  %v206_v57 = vunpack.c.h.bf16 %v81_v47 }
 0x103   :  { %v2607_v63 = vpop.f32.mrf.mxu1  ;;  %1257 = vst.msk [vmem:[%s3075_s4 + $0x30] sm:$0xf] %vm1244_vm1, %v1192_v20  ;;  %v1321_v36 = vunpack.c.l.bf16 %v1192_v20  ;;  %v475_v19 = vadd.f32 %v1891_v30, %v341_v2  ;;  %v476_v24 = vadd.f32 %v1865_v10, %v342_v15 }
 0x104   :  { %1286 = vst.msk [vmem:[%s3075_s4 + $0xa4] sm:$0xf] %vm1244_vm1, %v2622_v23  ;;  %v639_v60 = vpack.c.bf16 %v543_v55, %v541_v18  ;;  %v339_v25 = vmul.f32 %v1886_v28, %v205_v11  ;;  %v340_v7 = vmul.f32 %v1863_v9, %v206_v57  ;;  %v209_v11 = vunpack.c.l.bf16 %v83_v56 }
 0x105   :  { %v1397_v38 = vsel %vm1373_vm2, %v1321_v36, 0.0  ;;  %v1521_v44 = vmul.f32 %v1321_v36, %v1321_v36  ;;  %995 = vmatmul.bf16.gmra.mxu2 %v667_v0  ;;  %1784 = vmatmul.msk.bf16.gmra.mxu3 %vm745_vm0, %v668_v5  ;;  %v603_v36 = vmax.f32 %v475_v19, 0.0  ;;  %v210_v57 = vunpack.c.h.bf16 %v83_v56 }
 0x106   :  { %v1398_v48 = vadd.f32 %v1397_v38, %v1396_v6  ;;  %v883_v45 = vpop.f32.mrf.mxu0  ;;  %v1125_v27 = vpop.f32.mrf.mxu3  ;;  %v473_v12 = vadd.f32 %v1891_v30, %v339_v25  ;;  %v474_v20 = vadd.f32 %v1865_v10, %v340_v7  ;;  %v604_v38 = vmax.f32 %v476_v24, 0.0 }
 0x107   :  { %v1596_v46 = vsel %vm1373_vm2, %v1521_v44, 0.0  ;;  %v1053_v49 = vadd.f32 %v2549_v4, %v883_v45  ;;  %v956_v53 = vpop.f32.mrf.mxu2 }
 0x108   :  { %v1597_v52 = vadd.f32 %v1596_v46, %v1595_v17  ;;  %v601_v31 = vmax.f32 %v473_v12, 0.0  ;;  %v602_v35 = vmax.f32 %v474_v20, 0.0 }
 0x109   :  { %v1193_v42 = vpack.c.bf16 %v1053_v49, %v1053_v49 }
 0x10a   :  { %v669_v40 = vpack.c.bf16 %v603_v36, %v601_v31  ;;  %v670_v18 = vpack.c.bf16 %v604_v38, %v602_v35 }
 0x10b   :  { %v2632_v41 = vpop.f32.mrf.mxu1  ;;  %1258 = vst.msk [vmem:[%s3075_s4 + $0x34] sm:$0xf] %vm1244_vm1, %v1193_v42  ;;  %v1322_v4 = vunpack.c.l.bf16 %v1193_v42 }
 0x10d   :  { %v1399_v6 = vsel %vm1373_vm2, %v1322_v4, 0.0  ;;  %v1522_v1 = vmul.f32 %v1322_v4, %v1322_v4  ;;  %v84_v4 = vld [vmem:[%s3072_s0 + $0x1f8] sm:$0xff] }
 0x10e   :  { %1771 = vmatmul.msk.bf16.gmra.mxu1 %vm745_vm0, %v2543_v54  ;;  %v1400_v3 = vadd.f32 %v1399_v6, %v1398_v48  ;;  %v886_v61 = vpop.f32.mrf.mxu0  ;;  %v1126_v54 = vadd.f32 %v1125_v27, %v956_v53  ;;  %v1127_v32 = vpop.f32.mrf.mxu3  ;;  %v211_v59 = vunpack.c.l.bf16 %v84_v4 }
 0x10f   :  { %v1598_v16 = vsel %vm1373_vm2, %v1522_v1, 0.0  ;;  %v1056_v17 = vadd.f32 %v2579_v51, %v886_v61  ;;  %v958_v37 = vpop.f32.mrf.mxu2  ;;  %v343_v1 = vmul.f32 %v1886_v28, %v209_v11  ;;  %v344_v61 = vmul.f32 %v1863_v9, %v210_v57 }
 0x110   :  { %v1599_v14 = vadd.f32 %v1598_v16, %v1597_v52  ;;  %v2660_v13 = vpack.c.bf16 %v1126_v54, %v1126_v54  ;;  %v1128_v51 = vadd.f32 %v1127_v32, %v958_v37  ;;  %v345_v25 = vmul.f32 %v1886_v28, %v211_v59 }
 0x111   :  { %v1194_v29 = vpack.c.bf16 %v1056_v17, %v1056_v17  ;;  %925 = vmatmul.bf16.gmra.mxu0 %v639_v60  ;;  %v212_v60 = vunpack.c.h.bf16 %v84_v4  ;;  %v477_v17 = vadd.f32 %v1891_v30, %v343_v1  ;;  %v478_v54 = vadd.f32 %v1865_v10, %v344_v61 }
 0x112   :  { %1287 = vst.msk [vmem:[%s3075_s4 + $0xa8] sm:$0xf] %vm1244_vm1, %v2660_v13  ;;  %v2671_v44 = vpack.c.bf16 %v1128_v51, %v1128_v51  ;;  %v479_v12 = vadd.f32 %v1891_v30, %v345_v25 }
 0x113   :  { %v2658_v0 = vpop.f32.mrf.mxu1  ;;  %1259 = vst.msk [vmem:[%s3075_s4 + $0x38] sm:$0xf] %vm1244_vm1, %v1194_v29  ;;  %v1323_v39 = vunpack.c.l.bf16 %v1194_v29  ;;  %v346_v7 = vmul.f32 %v1863_v9, %v212_v60  ;;  %v605_v37 = vmax.f32 %v477_v17, 0.0  ;;  %v606_v51 = vmax.f32 %v478_v54, 0.0 }
 0x114   :  { %1288 = vst.msk [vmem:[%s3075_s4 + $0xac] sm:$0xf] %vm1244_vm1, %v2671_v44  ;;  %v607_v32 = vmax.f32 %v479_v12, 0.0 }
 0x115   :  { %v1401_v48 = vsel %vm1373_vm2, %v1323_v39, 0.0  ;;  %v1523_v45 = vmul.f32 %v1323_v39, %v1323_v39  ;;  %1000 = vmatmul.bf16.gmra.mxu2 %v669_v40  ;;  %1785 = vmatmul.msk.bf16.gmra.mxu3 %vm745_vm0, %v670_v18  ;;  %v480_v28 = vadd.f32 %v1865_v10, %v346_v7 }
 0x116   :  { %v1402_v46 = vadd.f32 %v1401_v48, %v1400_v3  ;;  %v888_v49 = vpop.f32.mrf.mxu0  ;;  %v1130_v27 = vpop.f32.mrf.mxu3 }
 0x117   :  { %v1600_v5 = vsel %vm1373_vm2, %v1523_v45, 0.0  ;;  %v1058_v52 = vadd.f32 %v2607_v63, %v888_v49  ;;  %v961_v53 = vpop.f32.mrf.mxu2  ;;  %v608_v39 = vmax.f32 %v480_v28, 0.0 }
 0x118   :  { %v1601_v55 = vadd.f32 %v1600_v5, %v1599_v14  ;;  %v1131_v14 = vadd.f32 %v1130_v27, %v961_v53 }
 0x119   :  { %v1195_v42 = vpack.c.bf16 %v1058_v52, %v1058_v52  ;;  %v672_v49 = vpack.c.bf16 %v608_v39, %v606_v51 }
 0x11a   :  { %v2705_v31 = vpack.c.bf16 %v1131_v14, %v1131_v14 }
 0x11b   :  { %v2681_v47 = vpop.f32.mrf.mxu1  ;;  %1260 = vst.msk [vmem:[%s3075_s4 + $0x3c] sm:$0xf] %vm1244_vm1, %v1195_v42  ;;  %v1324_v63 = vunpack.c.l.bf16 %v1195_v42 }
 0x11c   :  { %1289 = vst.msk [vmem:[%s3075_s4 + $0xb0] sm:$0xf] %vm1244_vm1, %v2705_v31 }
 0x11d   :  { %v1403_v62 = vsel %vm1373_vm2, %v1324_v63, 0.0  ;;  %v1524_v6 = vmul.f32 %v1324_v63, %v1324_v63 }
 0x11e   :  { %v1404_v2 = vadd.f32 %v1403_v62, %v1402_v46  ;;  %v891_v3 = vpop.f32.mrf.mxu0  ;;  %v1132_v29 = vpop.f32.mrf.mxu3 }
 0x11f   :  { %v1602_v15 = vsel %vm1373_vm2, %v1524_v6, 0.0  ;;  %v1061_v16 = vadd.f32 %v2632_v41, %v891_v3  ;;  %v963_v24 = vpop.f32.mrf.mxu2  ;;  %v671_v41 = vpack.c.bf16 %v607_v32, %v605_v37 }
 0x120   :  { %v1603_v19 = vadd.f32 %v1602_v15, %v1601_v55  ;;  %v1133_v36 = vadd.f32 %v1132_v29, %v963_v24 }
 0x121   :  { %v1196_v20 = vpack.c.bf16 %v1061_v16, %v1061_v16 }
 0x122   :  { %v2716_v10 = vpack.c.bf16 %v1133_v36, %v1133_v36 }
 0x123   :  { %v1067_v9 = vpop.f32.mrf.mxu1  ;;  %1261 = vst.msk [vmem:[%s3075_s4 + $0x40] sm:$0xf] %vm1244_vm1, %v1196_v20  ;;  %v1325_v30 = vunpack.c.l.bf16 %v1196_v20 }
 0x124   :  { %1290 = vst.msk [vmem:[%s3075_s4 + $0xb4] sm:$0xf] %vm1244_vm1, %v2716_v10 }
 0x125   :  { %v1405_v40 = vsel %vm1373_vm2, %v1325_v30, 0.0  ;;  %v1525_v35 = vmul.f32 %v1325_v30, %v1325_v30  ;;  %1005 = vmatmul.bf16.gmra.mxu2 %v671_v41  ;;  %1786 = vmatmul.msk.bf16.gmra.mxu3 %vm745_vm0, %v672_v49 }
 0x126   :  { %v1406_v38 = vadd.f32 %v1405_v40, %v1404_v2  ;;  %v893_v48 = vpop.f32.mrf.mxu0  ;;  %v1135_v55 = vpop.f32.mrf.mxu3 }
 0x127   :  { %v1604_v45 = vsel %vm1373_vm2, %v1525_v35, 0.0  ;;  %v1063_v46 = vadd.f32 %v2658_v0, %v893_v48  ;;  %v966_v18 = vpop.f32.mrf.mxu2 }
 0x128   :  { %v1605_v5 = vadd.f32 %v1604_v45, %v1603_v19  ;;  %v1136_v59 = vadd.f32 %v1135_v55, %v966_v18 }
 0x129   :  { %v1197_v52 = vpack.c.bf16 %v1063_v46, %v1063_v46 }
 0x12a   :  { %v2734_v25 = vpack.c.bf16 %v1136_v59, %v1136_v59 }
 0x12b   :  { %v1070_v42 = vpop.f32.mrf.mxu1  ;;  %1262 = vst.msk [vmem:[%s3075_s4 + $0x44] sm:$0xf] %vm1244_vm1, %v1197_v52  ;;  %v1326_v53 = vunpack.c.l.bf16 %v1197_v52 }
 0x12c   :  { %1291 = vst.msk [vmem:[%s3075_s4 + $0xb8] sm:$0xf] %vm1244_vm1, %v2734_v25 }
 0x12d   :  { %v1407_v27 = vsel %vm1373_vm2, %v1326_v53, 0.0  ;;  %v1526_v56 = vmul.f32 %v1326_v53, %v1326_v53 }
 0x12e   :  { %v1408_v4 = vadd.f32 %v1407_v27, %v1406_v38  ;;  %v896_v0 = vpop.f32.mrf.mxu0  ;;  %v1137_v6 = vpop.f32.mrf.mxu3 }
 0x12f   :  { %v1606_v63 = vsel %vm1373_vm2, %v1526_v56, 0.0  ;;  %v1066_v11 = vadd.f32 %v2681_v47, %v896_v0  ;;  %v968_v62 = vpop.f32.mrf.mxu2 }
 0x130   :  { %v1607_v57 = vadd.f32 %v1606_v63, %v1605_v5  ;;  %v1138_v2 = vadd.f32 %v1137_v6, %v968_v62 }
 0x131   :  { %v1198_v60 = vpack.c.bf16 %v1066_v11, %v1066_v11 }
 0x132   :  { %v2745_v47 = vpack.c.bf16 %v1138_v2, %v1138_v2 }
 0x133   :  { %v1072_v1 = vpop.f32.mrf.mxu1  ;;  %1263 = vst.msk [vmem:[%s3075_s4 + $0x48] sm:$0xf] %vm1244_vm1, %v1198_v60  ;;  %v1327_v3 = vunpack.c.l.bf16 %v1198_v60 }
 0x134   :  { %1292 = vst.msk [vmem:[%s3075_s4 + $0xbc] sm:$0xf] %vm1244_vm1, %v2745_v47 }
 0x135   :  { %v1409_v61 = vsel %vm1373_vm2, %v1327_v3, 0.0  ;;  %v1527_v7 = vmul.f32 %v1327_v3, %v1327_v3 }
 0x136   :  { %v1410_v15 = vadd.f32 %v1409_v61, %v1408_v4  ;;  %v898_v16 = vpop.f32.mrf.mxu0 }
 0x137   :  { %v1608_v17 = vsel %vm1373_vm2, %v1527_v7, 0.0  ;;  %v1068_v12 = vadd.f32 %v1067_v9, %v898_v16  ;;  %v971_v54 = vpop.f32.mrf.mxu2 }
 0x138   :  { %v1609_v19 = vadd.f32 %v1608_v17, %v1607_v57  ;;  %v1140_v24 = vpop.f32.mrf.mxu3 }
 0x139   :  { %v1199_v14 = vpack.c.bf16 %v1068_v12, %v1068_v12  ;;  %v1141_v51 = vadd.f32 %v1140_v24, %v971_v54 }
 0x13b   :  { %v1075_v28 = vpop.f32.mrf.mxu1  ;;  %1264 = vst.msk [vmem:[%s3075_s4 + $0x4c] sm:$0xf] %vm1244_vm1, %v1199_v14  ;;  %v1328_v20 = vunpack.c.l.bf16 %v1199_v14  ;;  %v2760_v38 = vpack.c.bf16 %v1141_v51, %v1141_v51 }
 0x13d   :  { %v1411_v29 = vsel %vm1373_vm2, %v1328_v20, 0.0  ;;  %v1528_v37 = vmul.f32 %v1328_v20, %v1328_v20  ;;  %1293 = vst.msk [vmem:[%s3075_s4 + $0xc0] sm:$0xf] %vm1244_vm1, %v2760_v38 }
 0x13e   :  { %v1412_v32 = vadd.f32 %v1411_v29, %v1410_v15  ;;  %v901_v36 = vpop.f32.mrf.mxu0 }
 0x13f   :  { %v1610_v30 = vsel %vm1373_vm2, %v1528_v37, 0.0  ;;  %v1071_v41 = vadd.f32 %v1070_v42, %v901_v36  ;;  %v973_v40 = vpop.f32.mrf.mxu2 }
 0x140   :  { %v1611_v9 = vadd.f32 %v1610_v30, %v1609_v19  ;;  %v1142_v45 = vpop.f32.mrf.mxu3 }
 0x141   :  { %v1200_v39 = vpack.c.bf16 %v1071_v41, %v1071_v41  ;;  %v1143_v46 = vadd.f32 %v1142_v45, %v973_v40 }
 0x143   :  { %v1077_v35 = vpop.f32.mrf.mxu1  ;;  %1265 = vst.msk [vmem:[%s3075_s4 + $0x50] sm:$0xf] %vm1244_vm1, %v1200_v39  ;;  %v1329_v48 = vunpack.c.l.bf16 %v1200_v39  ;;  %v2774_v55 = vpack.c.bf16 %v1143_v46, %v1143_v46 }
 0x145   :  { %v1413_v49 = vsel %vm1373_vm2, %v1329_v48, 0.0  ;;  %v1529_v5 = vmul.f32 %v1329_v48, %v1329_v48  ;;  %1294 = vst.msk [vmem:[%s3075_s4 + $0xc4] sm:$0xf] %vm1244_vm1, %v2774_v55 }
 0x146   :  { %v2772_v52 = vadd.f32 %v1413_v49, %v1412_v32  ;;  %v903_v18 = vpop.f32.mrf.mxu0 }
 0x147   :  { %v1612_v42 = vsel %vm1373_vm2, %v1529_v5, 0.0  ;;  %v1073_v53 = vadd.f32 %v1072_v1, %v903_v18  ;;  %v976_v4 = vpop.f32.mrf.mxu2 }
 0x148   :  { %v2777_v27 = vadd.f32 %v1612_v42, %v1611_v9  ;;  %v1145_v63 = vpop.f32.mrf.mxu3 }
 0x149   :  { %v2784_v56 = vpack.c.bf16 %v1073_v53, %v1073_v53  ;;  %v1146_v59 = vadd.f32 %v1145_v63, %v976_v4 }
 0x14b   :  { %v1080_v0 = vpop.f32.mrf.mxu1  ;;  %1266 = vst.msk [vmem:[%s3075_s4 + $0x54] sm:$0xf] %vm1244_vm1, %v2784_v56  ;;  %v2793_v1 = vpack.c.bf16 %v1146_v59, %v1146_v59 }
 0x14d   :  { %1295 = vst.msk [vmem:[%s3075_s4 + $0xc8] sm:$0xf] %vm1244_vm1, %v2793_v1 }
 0x14e   :  { %v906_v11 = vpop.f32.mrf.mxu0 }
 0x14f   :  { %v1076_v57 = vadd.f32 %v1075_v28, %v906_v11  ;;  %v978_v62 = vpop.f32.mrf.mxu2 }
 0x150   :  { %v1147_v2 = vpop.f32.mrf.mxu3 }
 0x151   :  { %v2791_v60 = vpack.c.bf16 %v1076_v57, %v1076_v57  ;;  %v1148_v3 = vadd.f32 %v1147_v2, %v978_v62 }
 0x153   :  { %v1082_v6 = vpop.f32.mrf.mxu1  ;;  %1267 = vst.msk [vmem:[%s3075_s4 + $0x58] sm:$0xf] %vm1244_vm1, %v2791_v60  ;;  %v2805_v7 = vpack.c.bf16 %v1148_v3, %v1148_v3 }
 0x155   :  { %1296 = vst.msk [vmem:[%s3075_s4 + $0xcc] sm:$0xf] %vm1244_vm1, %v2805_v7 }
 0x156   :  { %v908_v61 = vpop.f32.mrf.mxu0 }
 0x157   :  { %v1078_v15 = vadd.f32 %v1077_v35, %v908_v61  ;;  %v981_v17 = vpop.f32.mrf.mxu2  ;;  %v1330_v61 = vunpack.c.l.bf16 %v2784_v56 }
 0x158   :  { %v1150_v19 = vpop.f32.mrf.mxu3 }
 0x159   :  { %v1203_v16 = vpack.c.bf16 %v1078_v15, %v1078_v15  ;;  %v1151_v28 = vadd.f32 %v1150_v19, %v981_v17 }
 0x15b   :  { %v1085_v12 = vpop.f32.mrf.mxu1  ;;  %1268 = vst.msk [vmem:[%s3075_s4 + $0x5c] sm:$0xf] %vm1244_vm1, %v1203_v16  ;;  %v2816_v37 = vpack.c.bf16 %v1151_v28, %v1151_v28  ;;  %v1530_v28 = vmul.f32 %v1330_v61, %v1330_v61 }
 0x15d   :  { %1297 = vst.msk [vmem:[%s3075_s4 + $0xd0] sm:$0xf] %vm1244_vm1, %v2816_v37 }
 0x15e   :  { %v911_v14 = vpop.f32.mrf.mxu0 }
 0x15f   :  { %v1081_v54 = vadd.f32 %v1080_v0, %v911_v14  ;;  %v983_v24 = vpop.f32.mrf.mxu2  ;;  %v1331_v14 = vunpack.c.l.bf16 %v2791_v60 }
 0x160   :  { %v1152_v32 = vpop.f32.mrf.mxu3 }
 0x161   :  { %v1204_v20 = vpack.c.bf16 %v1081_v54, %v1081_v54  ;;  %v1153_v36 = vadd.f32 %v1152_v32, %v983_v24  ;;  %v1332_v24 = vunpack.c.l.bf16 %v1203_v16  ;;  %v1415_v32 = vsel %vm1373_vm2, %v1330_v61, 0.0 }
 0x162   :  { %v1531_v60 = vmul.f32 %v1331_v14, %v1331_v14 }
 0x163   :  { %v1087_v29 = vpop.f32.mrf.mxu1  ;;  %1269 = vst.msk [vmem:[%s3075_s4 + $0x60] sm:$0xf] %vm1244_vm1, %v1204_v20  ;;  %v2827_v9 = vpack.c.bf16 %v1153_v36, %v1153_v36  ;;  %v1333_v36 = vunpack.c.l.bf16 %v1204_v20  ;;  %v1532_v16 = vmul.f32 %v1332_v24, %v1332_v24  ;;  %v1419_v20 = vsel %vm1373_vm2, %v1332_v24, 0.0 }
 0x165   :  { %1298 = vst.msk [vmem:[%s3075_s4 + $0xd4] sm:$0xf] %vm1244_vm1, %v2827_v9 }
 0x166   :  { %v913_v30 = vpop.f32.mrf.mxu0 }
 0x167   :  { %v1083_v41 = vadd.f32 %v1082_v6, %v913_v30 }
 0x168   :  { %v986_v40 = vpop.f32.mrf.mxu2  ;;  %v1155_v48 = vpop.f32.mrf.mxu3 }
 0x169   :  { %v1205_v51 = vpack.c.bf16 %v1083_v41, %v1083_v41  ;;  %v1156_v46 = vadd.f32 %v1155_v48, %v986_v40  ;;  %v1614_v40 = vsel %vm1373_vm2, %v1530_v28, 0.0 }
 0x16b   :  { %v1090_v39 = vpop.f32.mrf.mxu1  ;;  %1270 = vst.msk [vmem:[%s3075_s4 + $0x64] sm:$0xf] %vm1244_vm1, %v1205_v51  ;;  %v2838_v18 = vpack.c.bf16 %v1156_v46, %v1156_v46  ;;  %v1334_v41 = vunpack.c.l.bf16 %v1205_v51 }
 0x16d   :  { %1299 = vst.msk [vmem:[%s3075_s4 + $0xd8] sm:$0xf] %vm1244_vm1, %v2838_v18  ;;  %v1423_v28 = vsel %vm1373_vm2, %v1334_v41, 0.0 }
 0x16e   :  { %v916_v35 = vpop.f32.mrf.mxu0 }
 0x16f   :  { %v1086_v45 = vadd.f32 %v1085_v12, %v916_v35  ;;  %v1417_v35 = vsel %vm1373_vm2, %v1331_v14, 0.0 }
 0x170   :  { %v988_v42 = vpop.f32.mrf.mxu2  ;;  %v1157_v4 = vpop.f32.mrf.mxu3 }
 0x171   :  { %v1206_v49 = vpack.c.bf16 %v1086_v45, %v1086_v45  ;;  %v1158_v63 = vadd.f32 %v1157_v4, %v988_v42  ;;  %v1416_v45 = vadd.f32 %v1415_v32, %v2772_v52 }
 0x173   :  { %v1092_v5 = vpop.f32.mrf.mxu1  ;;  %1271 = vst.msk [vmem:[%s3075_s4 + $0x68] sm:$0xf] %vm1244_vm1, %v1206_v49  ;;  %v2849_v57 = vpack.c.bf16 %v1158_v63, %v1158_v63  ;;  %v1335_v46 = vunpack.c.l.bf16 %v1206_v49  ;;  %v1615_v63 = vadd.f32 %v1614_v40, %v2777_v27  ;;  %v1418_v52 = vadd.f32 %v1417_v35, %v1416_v45 }
 0x174   :  { %v1534_v49 = vmul.f32 %v1334_v41, %v1334_v41 }
 0x175   :  { %1300 = vst.msk [vmem:[%s3075_s4 + $0xdc] sm:$0xf] %vm1244_vm1, %v2849_v57 }
 0x176   :  { %v918_v53 = vpop.f32.mrf.mxu0 }
 0x177   :  { %v1088_v0 = vadd.f32 %v1087_v29, %v918_v53 }
 0x178   :  { %v991_v62 = vpop.f32.mrf.mxu2  ;;  %v1160_v2 = vpop.f32.mrf.mxu3 }
 0x179   :  { %v1207_v11 = vpack.c.bf16 %v1088_v0, %v1088_v0  ;;  %v1161_v17 = vadd.f32 %v1160_v2, %v991_v62  ;;  %v1616_v0 = vsel %vm1373_vm2, %v1531_v60, 0.0  ;;  %v1618_v62 = vsel %vm1373_vm2, %v1532_v16, 0.0 }
 0x17a   :  { %v1617_v61 = vadd.f32 %v1616_v0, %v1615_v63  ;;  %v1425_v60 = vsel %vm1373_vm2, %v1335_v46, 0.0 }
 0x17b   :  { %v1095_v59 = vpop.f32.mrf.mxu1  ;;  %1272 = vst.msk [vmem:[%s3075_s4 + $0x6c] sm:$0xf] %vm1244_vm1, %v1207_v11  ;;  %v2868_v54 = vpack.c.bf16 %v1161_v17, %v1161_v17  ;;  %v1336_v2 = vunpack.c.l.bf16 %v1207_v11  ;;  %v1420_v17 = vadd.f32 %v1419_v20, %v1418_v52  ;;  %v1622_v11 = vsel %vm1373_vm2, %v1534_v49, 0.0 }
 0x17d   :  { %1301 = vst.msk [vmem:[%s3075_s4 + $0xe0] sm:$0xf] %vm1244_vm1, %v2868_v54  ;;  %v1427_v41 = vsel %vm1373_vm2, %v1336_v2, 0.0 }
 0x17e   :  { %v921_v6 = vpop.f32.mrf.mxu0 }
 0x17f   :  { %v1091_v3 = vadd.f32 %v1090_v39, %v921_v6  ;;  %v1421_v6 = vsel %vm1373_vm2, %v1333_v36, 0.0 }
 0x180   :  { %v993_v19 = vpop.f32.mrf.mxu2  ;;  %v1162_v29 = vpop.f32.mrf.mxu3  ;;  %v1422_v32 = vadd.f32 %v1421_v6, %v1420_v17 }
 0x181   :  { %v1208_v15 = vpack.c.bf16 %v1091_v3, %v1091_v3  ;;  %v1163_v39 = vadd.f32 %v1162_v29, %v993_v19  ;;  %v1535_v19 = vmul.f32 %v1335_v46, %v1335_v46  ;;  %v1619_v29 = vadd.f32 %v1618_v62, %v1617_v61 }
 0x182   :  { %v1424_v16 = vadd.f32 %v1423_v28, %v1422_v32 }
 0x183   :  { %v2861_v12 = vpop.f32.mrf.mxu1  ;;  %1273 = vst.msk [vmem:[%s3075_s4 + $0x70] sm:$0xf] %vm1244_vm1, %v1208_v15  ;;  %v2879_v53 = vpack.c.bf16 %v1163_v39, %v1163_v39  ;;  %v1337_v24 = vunpack.c.l.bf16 %v1208_v15  ;;  %v1624_v15 = vsel %vm1373_vm2, %v1535_v19, 0.0 }
 0x184   :  { %v1426_v20 = vadd.f32 %v1425_v60, %v1424_v16 }
 0x185   :  { %1302 = vst.msk [vmem:[%s3075_s4 + $0xe4] sm:$0xf] %vm1244_vm1, %v2879_v53  ;;  %v1537_v0 = vmul.f32 %v1337_v24, %v1337_v24 }
 0x186   :  { %v923_v56 = vpop.f32.mrf.mxu0  ;;  %v1428_v62 = vadd.f32 %v1427_v41, %v1426_v20 }
 0x187   :  { %v1093_v30 = vadd.f32 %v1092_v5, %v923_v56  ;;  %v1533_v5 = vmul.f32 %v1333_v36, %v1333_v36  ;;  %v1536_v36 = vmul.f32 %v1336_v2, %v1336_v2  ;;  %v1628_v2 = vsel %vm1373_vm2, %v1537_v0, 0.0 }
 0x188   :  { %v996_v4 = vpop.f32.mrf.mxu2  ;;  %v1165_v14 = vpop.f32.mrf.mxu3 }
 0x189   :  { %v1209_v48 = vpack.c.bf16 %v1093_v30, %v1093_v30  ;;  %v1620_v27 = vsel %vm1373_vm2, %v1533_v5, 0.0  ;;  %v1166_v40 = vadd.f32 %v1165_v14, %v996_v4  ;;  %v1626_v5 = vsel %vm1373_vm2, %v1536_v36, 0.0 }
 0x18a   :  { %v1621_v35 = vadd.f32 %v1620_v27, %v1619_v29 }
 0x18b   :  { %v1100_v42 = vpop.f32.mrf.mxu1  ;;  %1274 = vst.msk [vmem:[%s3075_s4 + $0x74] sm:$0xf] %vm1244_vm1, %v1209_v48  ;;  %v1338_v30 = vunpack.c.l.bf16 %v1209_v48  ;;  %v2911_v48 = vpack.c.bf16 %v1166_v40, %v1166_v40 }
 0x18c   :  { %v1101_v51 = vadd.f32 %v1100_v42, %v2296_v33  ;;  %v1623_v4 = vadd.f32 %v1622_v11, %v1621_v35 }
 0x18d   :  { %v1538_v63 = vmul.f32 %v1338_v30, %v1338_v30  ;;  %1303 = vst.msk [vmem:[%s3075_s4 + $0xe8] sm:$0xf] %vm1244_vm1, %v2911_v48  ;;  %v1431_v61 = vsel %vm1373_vm2, %v1338_v30, 0.0 }
 0x18e   :  { %v1212_v3 = vpack.c.bf16 %v1101_v51, %v1101_v51  ;;  %v926_v33 = vpop.f32.mrf.mxu0  ;;  %v1429_v51 = vsel %vm1373_vm2, %v1337_v24, 0.0  ;;  %v1625_v49 = vadd.f32 %v1624_v15, %v1623_v4 }
 0x18f   :  { %v1096_v56 = vadd.f32 %v1095_v59, %v926_v33  ;;  %v1430_v14 = vadd.f32 %v1429_v51, %v1428_v62  ;;  %v1630_v28 = vsel %vm1373_vm2, %v1538_v63, 0.0 }
 0x190   :  { %1277 = vst.msk [vmem:[%s3075_s4 + $0x80] sm:$0xf] %vm1244_vm1, %v1212_v3  ;;  %v998_v42 = vpop.f32.mrf.mxu2  ;;  %v1627_v33 = vadd.f32 %v1626_v5, %v1625_v49  ;;  %v1341_v24 = vunpack.c.l.bf16 %v1212_v3  ;;  %v1343_v3 = vunpack.c.l.bf16 %v2392_v26  ;;  %v1345_v5 = vunpack.c.l.bf16 %v2480_v50 }
 0x191   :  { %v1210_v39 = vpack.c.bf16 %v1096_v56, %v1096_v56  ;;  %v1432_v11 = vadd.f32 %v1431_v61, %v1430_v14 }
 0x192   :  { %v1629_v32 = vadd.f32 %v1628_v2, %v1627_v33  ;;  %v1541_v16 = vmul.f32 %v1341_v24, %v1341_v24  ;;  %v1441_v61 = vsel %vm1373_vm2, %v1343_v3, 0.0  ;;  %v1545_v50 = vmul.f32 %v1345_v5, %v1345_v5 }
 0x193   :  { %v1102_v45 = vpop.f32.mrf.mxu1  ;;  %1275 = vst.msk [vmem:[%s3075_s4 + $0x78] sm:$0xf] %vm1244_vm1, %v1210_v39  ;;  %v1339_v59 = vunpack.c.l.bf16 %v1210_v39 }
 0x194   :  { %v1103_v46 = vadd.f32 %v1102_v45, %v2333_v34  ;;  %v1167_v34 = vpop.f32.mrf.mxu3  ;;  %v1631_v40 = vadd.f32 %v1630_v28, %v1629_v32  ;;  %v1344_v45 = vunpack.c.l.bf16 %v2416_v8  ;;  %v1636_v26 = vsel %vm1373_vm2, %v1541_v16, 0.0 }
 0x195   :  { %v1539_v17 = vmul.f32 %v1339_v59, %v1339_v59  ;;  %v1168_v27 = vadd.f32 %v1167_v34, %v998_v42  ;;  %v1433_v56 = vsel %vm1373_vm2, %v1339_v59, 0.0 }
 0x196   :  { %v1213_v52 = vpack.c.bf16 %v1103_v46, %v1103_v46  ;;  %v928_v6 = vpop.f32.mrf.mxu0  ;;  %v1434_v35 = vadd.f32 %v1433_v56, %v1432_v11  ;;  %v1437_v46 = vsel %vm1373_vm2, %v1341_v24, 0.0  ;;  %v1443_v24 = vsel %vm1373_vm2, %v1344_v45, 0.0 }
 0x197   :  { %v1098_v19 = vadd.f32 %v2861_v12, %v928_v6  ;;  %v2929_v60 = vpack.c.bf16 %v1168_v27, %v1168_v27  ;;  %v1632_v30 = vsel %vm1373_vm2, %v1539_v17, 0.0  ;;  %v1544_v6 = vmul.f32 %v1344_v45, %v1344_v45 }
 0x198   :  { %1278 = vst.msk [vmem:[%s3075_s4 + $0x84] sm:$0xf] %vm1244_vm1, %v1213_v52  ;;  %v1001_v36 = vpop.f32.mrf.mxu2  ;;  %v1342_v39 = vunpack.c.l.bf16 %v1213_v52  ;;  %v1633_v42 = vadd.f32 %v1632_v30, %v1631_v40  ;;  %v1543_v52 = vmul.f32 %v1343_v3, %v1343_v3  ;;  %v1346_v17 = vunpack.c.l.bf16 %v2499_v58 }
 0x199   :  { %v1211_v29 = vpack.c.bf16 %v1098_v19, %v1098_v19  ;;  %1304 = vst.msk [vmem:[%s3075_s4 + $0xec] sm:$0xf] %vm1244_vm1, %v2929_v60  ;;  %v1347_v56 = vunpack.c.l.bf16 %v2551_v43  ;;  %v1642_v58 = vsel %vm1373_vm2, %v1544_v6, 0.0  ;;  %v1644_v40 = vsel %vm1373_vm2, %v1545_v50, 0.0 }
 0x19a   :  { %v1542_v4 = vmul.f32 %v1342_v39, %v1342_v39  ;;  %v1439_v49 = vsel %vm1373_vm2, %v1342_v39, 0.0  ;;  %v1640_v28 = vsel %vm1373_vm2, %v1543_v52, 0.0  ;;  %v1546_v30 = vmul.f32 %v1346_v17, %v1346_v17 }
 0x19b   :  { %1276 = vst.msk [vmem:[%s3075_s4 + $0x7c] sm:$0xf] %vm1244_vm1, %v1211_v29  ;;  %v1340_v12 = vunpack.c.l.bf16 %v1211_v29  ;;  %v1348_v39 = vunpack.c.l.bf16 %v2566_v22  ;;  %v1447_v3 = vsel %vm1373_vm2, %v1346_v17, 0.0  ;;  %v1547_v16 = vmul.f32 %v1347_v56, %v1347_v56 }
 0x19c   :  { %v1170_v59 = vpop.f32.mrf.mxu3  ;;  %v1638_v19 = vsel %vm1373_vm2, %v1542_v4, 0.0  ;;  %v1350_v4 = vunpack.c.l.bf16 %v2622_v23  ;;  %v1351_v52 = vunpack.c.l.bf16 %v2660_v13 }
 0x19d   :  { %v1435_v15 = vsel %vm1373_vm2, %v1340_v12, 0.0  ;;  %v1540_v41 = vmul.f32 %v1340_v12, %v1340_v12  ;;  %v1171_v62 = vadd.f32 %v1170_v59, %v1001_v36  ;;  %v1445_v36 = vsel %vm1373_vm2, %v1345_v5, 0.0 }
 0x19e   :  { %v1436_v0 = vadd.f32 %v1435_v15, %v1434_v35  ;;  %v1349_v15 = vunpack.c.l.bf16 %v2609_v21  ;;  %v1646_v59 = vsel %vm1373_vm2, %v1546_v30, 0.0  ;;  %v1548_v22 = vmul.f32 %v1348_v39, %v1348_v39 }
 0x19f   :  { %v1634_v20 = vsel %vm1373_vm2, %v1540_v41, 0.0  ;;  %v2952_v33 = vpack.c.bf16 %v1171_v62, %v1171_v62  ;;  %v1648_v5 = vsel %vm1373_vm2, %v1547_v16, 0.0  ;;  %v1455_v50 = vsel %vm1373_vm2, %v1350_v4, 0.0 }
 0x1a0   :  { %v1438_v51 = vadd.f32 %v1437_v46, %v1436_v0  ;;  %v1635_v63 = vadd.f32 %v1634_v20, %v1633_v42  ;;  %v1003_v2 = vpop.f32.mrf.mxu2  ;;  %v1449_v46 = vsel %vm1373_vm2, %v1347_v56, 0.0  ;;  %v1650_v6 = vsel %vm1373_vm2, %v1548_v22, 0.0 }
 0x1a1   :  { %1305 = vst.msk [vmem:[%s3075_s4 + $0xf0] sm:$0xf] %vm1244_vm1, %v2952_v33  ;;  %v1457_v56 = vsel %vm1373_vm2, %v1351_v52, 0.0  ;;  %v1357_v22 = vunpack.c.l.bf16 %v2760_v38 }
 0x1a2   :  { %v1440_v8 = vadd.f32 %v1439_v49, %v1438_v51  ;;  %v1637_v34 = vadd.f32 %v1636_v26, %v1635_v63  ;;  %v1451_v51 = vsel %vm1373_vm2, %v1348_v39, 0.0  ;;  %v1549_v63 = vmul.f32 %v1349_v15, %v1349_v15 }
 0x1a3   :  { %v1352_v26 = vunpack.c.l.bf16 %v2671_v44 }
 0x1a4   :  { %v1442_v14 = vadd.f32 %v1441_v61, %v1440_v8  ;;  %v1639_v27 = vadd.f32 %v1638_v19, %v1637_v34  ;;  %v1172_v11 = vpop.f32.mrf.mxu3  ;;  %v1453_v8 = vsel %vm1373_vm2, %v1349_v15, 0.0  ;;  %v1550_v34 = vmul.f32 %v1350_v4, %v1350_v4 }
 0x1a5   :  { %v1173_v12 = vadd.f32 %v1172_v11, %v1003_v2  ;;  %v1353_v2 = vunpack.c.l.bf16 %v2705_v31  ;;  %v1652_v19 = vsel %vm1373_vm2, %v1549_v63, 0.0  ;;  %v1459_v39 = vsel %vm1373_vm2, %v1352_v26, 0.0 }
 0x1a6   :  { %v1444_v29 = vadd.f32 %v1443_v24, %v1442_v14  ;;  %v1641_v32 = vadd.f32 %v1640_v28, %v1639_v27  ;;  %v1551_v14 = vmul.f32 %v1351_v52, %v1351_v52  ;;  %v1552_v27 = vmul.f32 %v1352_v26, %v1352_v26 }
 0x1a7   :  { %v2968_v41 = vpack.c.bf16 %v1173_v12, %v1173_v12  ;;  %v1654_v24 = vsel %vm1373_vm2, %v1550_v34, 0.0  ;;  %v1553_v31 = vmul.f32 %v1353_v2, %v1353_v2  ;;  %v1355_v12 = vunpack.c.l.bf16 %v2734_v25 }
 0x1a8   :  { %v1446_v43 = vadd.f32 %v1445_v36, %v1444_v29  ;;  %v1643_v35 = vadd.f32 %v1642_v58, %v1641_v32  ;;  %v1006_v0 = vpop.f32.mrf.mxu2  ;;  %v1354_v58 = vunpack.c.l.bf16 %v2716_v10  ;;  %v1656_v30 = vsel %vm1373_vm2, %v1551_v14, 0.0 }
 0x1a9   :  { %1306 = vst.msk [vmem:[%s3075_s4 + $0xf4] sm:$0xf] %vm1244_vm1, %v2968_v41  ;;  %v1658_v10 = vsel %vm1373_vm2, %v1552_v27, 0.0  ;;  %v1356_v15 = vunpack.c.l.bf16 %v2745_v47  ;;  %v1358_v47 = vunpack.c.l.bf16 %v2774_v55  ;;  %v1469_v55 = vsel %vm1373_vm2, %v1357_v22, 0.0 }
 0x1aa   :  { %v1448_v45 = vadd.f32 %v1447_v3, %v1446_v43  ;;  %v1645_v42 = vadd.f32 %v1644_v40, %v1643_v35  ;;  %v1461_v3 = vsel %vm1373_vm2, %v1353_v2, 0.0  ;;  %v1554_v16 = vmul.f32 %v1354_v58, %v1354_v58 }
 0x1ab   :  { %v1556_v63 = vmul.f32 %v1356_v15, %v1356_v15  ;;  %v1558_v2 = vmul.f32 %v1358_v47, %v1358_v47  ;;  %v1471_v14 = vsel %vm1373_vm2, %v1358_v47, 0.0  ;;  %v1361_v27 = vunpack.c.l.bf16 %v2816_v37 }
 0x1ac   :  { %v1450_v20 = vadd.f32 %v1449_v46, %v1448_v45  ;;  %v1647_v21 = vadd.f32 %v1646_v59, %v1645_v42  ;;  %v1175_v23 = vpop.f32.mrf.mxu3  ;;  %v1660_v42 = vsel %vm1373_vm2, %v1553_v31, 0.0  ;;  %v1463_v59 = vsel %vm1373_vm2, %v1354_v58, 0.0 }
 0x1ad   :  { %v1176_v13 = vadd.f32 %v1175_v23, %v1006_v0  ;;  %v1555_v46 = vmul.f32 %v1355_v12, %v1355_v12  ;;  %v1359_v23 = vunpack.c.l.bf16 %v2793_v1  ;;  %v1666_v34 = vsel %vm1373_vm2, %v1556_v63, 0.0 }
 0x1ae   :  { %v1452_v49 = vadd.f32 %v1451_v51, %v1450_v20  ;;  %v1649_v62 = vadd.f32 %v1648_v5, %v1647_v21  ;;  %v1662_v5 = vsel %vm1373_vm2, %v1554_v16, 0.0  ;;  %v1465_v51 = vsel %vm1373_vm2, %v1355_v12, 0.0 }
 0x1af   :  { %v2990_v29 = vpack.c.bf16 %v1176_v13, %v1176_v13  ;;  %v1664_v38 = vsel %vm1373_vm2, %v1555_v46, 0.0  ;;  %v1559_v13 = vmul.f32 %v1359_v23, %v1359_v23  ;;  %v1362_v58 = vunpack.c.l.bf16 %v2827_v9 }
 0x1b0   :  { %v1454_v61 = vadd.f32 %v1453_v8, %v1452_v49  ;;  %v1651_v17 = vadd.f32 %v1650_v6, %v1649_v62  ;;  %v1008_v36 = vpop.f32.mrf.mxu2  ;;  %v1467_v49 = vsel %vm1373_vm2, %v1356_v15, 0.0  ;;  %v1557_v62 = vmul.f32 %v1357_v22, %v1357_v22 }
 0x1b1   :  { %1307 = vst.msk [vmem:[%s3075_s4 + $0xf8] sm:$0xf] %vm1244_vm1, %v2990_v29  ;;  %v1479_v16 = vsel %vm1373_vm2, %v1362_v58, 0.0  ;;  %v1366_v46 = vunpack.c.l.bf16 %v2879_v53 }
 0x1b2   :  { %v1456_v44 = vadd.f32 %v1455_v50, %v1454_v61  ;;  %v1653_v28 = vadd.f32 %v1652_v19, %v1651_v17  ;;  %v1360_v61 = vunpack.c.l.bf16 %v2805_v7  ;;  %v1668_v50 = vsel %vm1373_vm2, %v1557_v62, 0.0 }
 0x1b4   :  { %v1458_v32 = vadd.f32 %v1457_v56, %v1456_v44  ;;  %v1655_v11 = vadd.f32 %v1654_v24, %v1653_v28  ;;  %v1177_v35 = vpop.f32.mrf.mxu3  ;;  %v1670_v28 = vsel %vm1373_vm2, %v1558_v2, 0.0  ;;  %v1473_v24 = vsel %vm1373_vm2, %v1359_v23, 0.0 }
 0x1b5   :  { %v1178_v45 = vadd.f32 %v1177_v35, %v1008_v36  ;;  %v1560_v56 = vmul.f32 %v1360_v61, %v1360_v61  ;;  %v1561_v36 = vmul.f32 %v1361_v27, %v1361_v27  ;;  %v1487_v23 = vsel %vm1373_vm2, %v1366_v46, 0.0 }
 0x1b6   :  { %v1460_v40 = vadd.f32 %v1459_v39, %v1458_v32  ;;  %v1657_v43 = vadd.f32 %v1656_v30, %v1655_v11  ;;  %v1672_v32 = vsel %vm1373_vm2, %v1559_v13, 0.0  ;;  %v1475_v11 = vsel %vm1373_vm2, %v1360_v61, 0.0 }
 0x1b7   :  { %v3006_v4 = vpack.c.bf16 %v1178_v45, %v1178_v45  ;;  %v1363_v30 = vunpack.c.l.bf16 %v2838_v18  ;;  %v1674_v12 = vsel %vm1373_vm2, %v1560_v56, 0.0  ;;  %v1365_v45 = vunpack.c.l.bf16 %v2868_v54 }
 0x1b8   :  { %v1659_v25 = vadd.f32 %v1658_v10, %v1657_v43  ;;  %v1462_v0 = vadd.f32 %v1461_v3, %v1460_v40  ;;  %v1477_v10 = vsel %vm1373_vm2, %v1361_v27, 0.0  ;;  %v1562_v40 = vmul.f32 %v1362_v58, %v1362_v58 }
 0x1b9   :  { %1308 = vst.msk [vmem:[%s3075_s4 + $0xfc] sm:$0xf] %vm1244_vm1, %v3006_v4  ;;  %v1364_v43 = vunpack.c.l.bf16 %v2849_v57  ;;  %v1676_v3 = vsel %vm1373_vm2, %v1561_v36, 0.0  ;;  %v1563_v15 = vmul.f32 %v1363_v30, %v1363_v30  ;;  %v1371_v27 = vunpack.c.l.bf16 %v2990_v29 }
 0x1ba   :  { %v1464_v20 = vadd.f32 %v1463_v59, %v1462_v0  ;;  %v1661_v21 = vadd.f32 %v1660_v42, %v1659_v25  ;;  %v1678_v25 = vsel %vm1373_vm2, %v1562_v40, 0.0  ;;  %v1481_v0 = vsel %vm1373_vm2, %v1363_v30, 0.0 }
 0x1bb   :  { %v1564_v59 = vmul.f32 %v1364_v43, %v1364_v43  ;;  %v1372_v56 = vunpack.c.l.bf16 %v3006_v4  ;;  %v1497_v30 = vsel %vm1373_vm2, %v1371_v27, 0.0 }
 0x1bc   :  { %v1466_v52 = vadd.f32 %v1465_v51, %v1464_v20  ;;  %v1663_v26 = vadd.f32 %v1662_v5, %v1661_v21  ;;  %v1680_v20 = vsel %vm1373_vm2, %v1563_v15, 0.0  ;;  %v1483_v21 = vsel %vm1373_vm2, %v1364_v43, 0.0 }
 0x1bd   :  { %v1565_v5 = vmul.f32 %v1365_v45, %v1365_v45  ;;  %v1367_v51 = vunpack.c.l.bf16 %v2911_v48  ;;  %v1682_v47 = vsel %vm1373_vm2, %v1564_v59, 0.0  ;;  %v1499_v4 = vsel %vm1373_vm2, %v1372_v56, 0.0 }
 0x1be   :  { %v1468_v6 = vadd.f32 %v1467_v49, %v1466_v52  ;;  %v1665_v8 = vadd.f32 %v1664_v38, %v1663_v26  ;;  %v1485_v52 = vsel %vm1373_vm2, %v1365_v45, 0.0  ;;  %v1566_v26 = vmul.f32 %v1366_v46, %v1366_v46 }
 0x1bf   :  { %v1368_v38 = vunpack.c.l.bf16 %v2929_v60  ;;  %v1684_v62 = vsel %vm1373_vm2, %v1565_v5, 0.0  ;;  %v1489_v2 = vsel %vm1373_vm2, %v1367_v51, 0.0 }
 0x1c0   :  { %v1470_v17 = vadd.f32 %v1469_v55, %v1468_v6  ;;  %v1667_v19 = vadd.f32 %v1666_v34, %v1665_v8  ;;  %v1567_v6 = vmul.f32 %v1367_v51, %v1367_v51  ;;  %v1369_v8 = vunpack.c.l.bf16 %v2952_v33 }
 0x1c1   :  { %v1686_v55 = vsel %vm1373_vm2, %v1566_v26, 0.0  ;;  %v1568_v61 = vmul.f32 %v1368_v38, %v1368_v38 }
 0x1c2   :  { %v1472_v44 = vadd.f32 %v1471_v14, %v1470_v17  ;;  %v1669_v1 = vadd.f32 %v1668_v50, %v1667_v19  ;;  %v1370_v17 = vunpack.c.l.bf16 %v2968_v41  ;;  %v1688_v50 = vsel %vm1373_vm2, %v1567_v6, 0.0 }
 0x1c3   :  { %v1491_v14 = vsel %vm1373_vm2, %v1368_v38, 0.0  ;;  %v1569_v13 = vmul.f32 %v1369_v8, %v1369_v8 }
 0x1c4   :  { %v1474_v31 = vadd.f32 %v1473_v24, %v1472_v44  ;;  %v1671_v7 = vadd.f32 %v1670_v28, %v1669_v1  ;;  %v1690_v1 = vsel %vm1373_vm2, %v1568_v61, 0.0  ;;  %v1493_v28 = vsel %vm1373_vm2, %v1369_v8, 0.0 }
 0x1c5   :  { %v1570_v24 = vmul.f32 %v1370_v17, %v1370_v17 }
 0x1c6   :  { %v1476_v39 = vadd.f32 %v1475_v11, %v1474_v31  ;;  %v1673_v37 = vadd.f32 %v1672_v32, %v1671_v7  ;;  %v1692_v31 = vsel %vm1373_vm2, %v1569_v13, 0.0  ;;  %v1495_v7 = vsel %vm1373_vm2, %v1370_v17, 0.0 }
 0x1c7   :  { %v1571_v32 = vmul.f32 %v1371_v27, %v1371_v27  ;;  %v1694_v29 = vsel %vm1373_vm2, %v1570_v24, 0.0 }
 0x1c8   :  { %v1478_v35 = vadd.f32 %v1477_v10, %v1476_v39  ;;  %v1675_v9 = vadd.f32 %v1674_v12, %v1673_v37  ;;  %v1572_v39 = vmul.f32 %v1372_v56, %v1372_v56 }
 0x1c9   :  { %v1696_v10 = vsel %vm1373_vm2, %v1571_v32, 0.0 }
 0x1ca   :  { %v1480_v42 = vadd.f32 %v1479_v16, %v1478_v35  ;;  %v1677_v18 = vadd.f32 %v1676_v3, %v1675_v9  ;;  %v1698_v35 = vsel %vm1373_vm2, %v1572_v39, 0.0 }
 0x1cc   :  { %v1482_v22 = vadd.f32 %v1481_v0, %v1480_v42  ;;  %v1679_v57 = vadd.f32 %v1678_v25, %v1677_v18 }
 0x1ce   :  { %v1484_v63 = vadd.f32 %v1483_v21, %v1482_v22  ;;  %v1681_v54 = vadd.f32 %v1680_v20, %v1679_v57 }
 0x1d0   :  { %v1486_v49 = vadd.f32 %v1485_v52, %v1484_v63  ;;  %v1683_v53 = vadd.f32 %v1682_v47, %v1681_v54 }
 0x1d2   :  { %v1685_v34 = vadd.f32 %v1684_v62, %v1683_v53  ;;  %v1488_v48 = vadd.f32 %v1487_v23, %v1486_v49 }
 0x1d4   :  { %v1687_v19 = vadd.f32 %v1686_v55, %v1685_v34  ;;  %v1490_v60 = vadd.f32 %v1489_v2, %v1488_v48 }
 0x1d6   :  { %v1689_v44 = vadd.f32 %v1688_v50, %v1687_v19  ;;  %v1492_v33 = vadd.f32 %v1491_v14, %v1490_v60 }
 0x1d8   :  { %v1691_v58 = vadd.f32 %v1690_v1, %v1689_v44  ;;  %v1494_v41 = vadd.f32 %v1493_v28, %v1492_v33 }
 0x1da   :  { %v1693_v11 = vadd.f32 %v1692_v31, %v1691_v58  ;;  %v1496_v36 = vadd.f32 %v1495_v7, %v1494_v41 }
 0x1dc   :  { %v1695_v37 = vadd.f32 %v1694_v29, %v1693_v11  ;;  %v1498_v12 = vadd.f32 %v1497_v30, %v1496_v36 }
 0x1de   :  { %v1697_v40 = vadd.f32 %v1696_v10, %v1695_v37  ;;  %v1500_v43 = vadd.f32 %v1499_v4, %v1498_v12 }
 0x1e0   :  { %v1501_v9 = vrot.slane %v1500_v43, 4  ;;  %v1699_v3 = vadd.f32 %v1698_v35, %v1697_v40 }
 0x1e2   :  { %v1502_v16 = vadd.f32 %v1501_v9, %v1500_v43  ;;  %v1700_v15 = vrot.slane %v1699_v3, 4 }
 0x1e4   :  { %v1503_v45 = vrot.slane %v1502_v16, 2  ;;  %v1701_v42 = vadd.f32 %v1700_v15, %v1699_v3 }
 0x1e6   :  { %v1504_v18 = vadd.f32 %v1503_v45, %v1502_v16  ;;  %v1702_v25 = vrot.slane %v1701_v42, 2 }
 0x1e8   :  { %v1505_v0 = vrot.slane %v1504_v18, 1  ;;  %v1703_v59 = vadd.f32 %v1702_v25, %v1701_v42 }
 0x1ea   :  { %v1506_v46 = vadd.f32 %v1505_v0, %v1504_v18  ;;  %v1704_v22 = vrot.slane %v1703_v59, 1 }
 0x1ec   :  { %1508 = vst.msk [vmem:[%s3076_s5] sm:$0x1] %vm1507_vm3, %v1506_v46  ;;  %v1705_v57 = vadd.f32 %v1704_v22, %v1703_v59 }
 0x1ee   :  { %1706 = vst.msk [vmem:[%s3077_s6] sm:$0x1] %vm1507_vm3, %v1705_v57 }

// kernel: generator_forward.9
= control target key start
LH: loop header
LB: loop body
LE: loop exit
PB: predicated region body
PF: predicated region fallthrough
CT: control target
= control target key end

     0   :  { %s1024_s0 = inlined_call_operand.vmem [shape: bf16[8,72], index: 0, kind: input, shape index: {}]   ;;  %s1025_s1 = inlined_call_operand.vmem [shape: bf16[72,2048], index: 1, kind: input, shape index: {}]   ;;  %s1026_s2 = inlined_call_operand.vmem [shape: f32[72,1], index: 2, kind: input, shape index: {}]   ;;  %s1027_s3 = inlined_call_operand.vmem [shape: f32[72,1], index: 3, kind: input, shape index: {}]   ;;  %s1028_s4 = inlined_call_operand.<no memory space> [shape: f32[1,1], index: 4, kind: input, shape index: {}]   ;;  %s1029_s5 = inlined_call_operand.vmem [shape: f32[8,2048], index: 5, kind: output, shape index: {}]  }
   0x1   :  { %10 = sst [smem:[#allocation2]] %s1028_s4 }
   0x2   :  { %s827_s20 = smov 0   ;;  %s829_s21 = smov 0  }
   0x3   :  { %s831_s22 = smov 0  }
   0x4 LB: > { %s715_s4 = sadd.s32 4294967295, %s791_s22   ;;  %s844_s23 = sadd.s32 1, %s791_s22   ;;  %s791_s22 = sphi %s831_s22, %s1032_s22   ;;  %s787_s21 = sphi %s829_s21, %s1031_s21   ;;  %s783_s20 = sphi %s827_s20, %s1030_s20  }
   0x5   : > { %s41_s24 = ssub.s32 %s791_s22, %s844_s23  ;;  %s44_s25 = sadd.s32 1, %s787_s21 }
   0x6   : > { %p42_p0 = scmp.eq.s32.totalorder %s41_s24, 0  ;;  %p51_p1 = scmp.ne.s32.totalorder %s787_s21, %s783_s20 }
   0x7   : > { %p52_p2 = scmp.eq.s32.totalorder %s791_s22, 0  ;;  %p718_p4 = scmp.ge.s32.totalorder %s791_s22, 4 }
   0x8   : > { %s853_s26 = scalar_select %p42_p0, %s787_s21, %s44_s25  }
   0x9   : > { %p53_p3 = por %p52_p2, %p51_p1  ;;  %178 = sbr.rel (%p718_p4) target bundleno = 36 (0x24), region = 32 }
   0xe   : > { %181 = sbr.rel (!%p53_p3) target bundleno = 36 (0x24), region = 36  ;;  %s183_s27 = sand.u32 (%p53_p3), 1, %s787_s21  }
   0xf   : > { %s730_s28 = sshll.u32 (%p53_p3), %s791_s22, 4  ;;  %s731_s29 = smul.u32 (%p53_p3), 144, %s183_s27 }
  0x10   : > { %s861_s7 = scalar_lea.vmem (%p53_p3), %s1025_s1, %s730_s28 }
  0x11   : > { %v201_v0 = vld [vmem:[%s861_s7] sm:$0xff] (%p53_p3)  ;;  %v203_v1 = vld [vmem:[%s861_s7 + $0x8] sm:$0xff] (%p53_p3)  ;;  %s866_s8 = scalar_lea.vmem (%p53_p3), [#allocation3], %s731_s29 }
  0x12   : > { %v205_v2 = vld [vmem:[%s861_s7 + $0x40] sm:$0xff] (%p53_p3)  ;;  %202 = vst [vmem:[%s866_s8] sm:$0xff] (%p53_p3), %v201_v0  ;;  %v207_v3 = vld [vmem:[%s861_s7 + $0x48] sm:$0xff] (%p53_p3) }
  0x13   : > { %204 = vst [vmem:[%s866_s8 + $0x8] sm:$0xff] %v203_v1  ;;  %v209_v4 = vld [vmem:[%s861_s7 + $0x80] sm:$0xff]  ;;  %v211_v5 = vld [vmem:[%s861_s7 + $0x88] sm:$0xff] }
  0x14   : > { %206 = vst [vmem:[%s866_s8 + $0x10] sm:$0xff] %v205_v2  ;;  %v213_v6 = vld [vmem:[%s861_s7 + $0xc0] sm:$0xff]  ;;  %v215_v7 = vld [vmem:[%s861_s7 + $0xc8] sm:$0xff] }
  0x15   : > { %208 = vst [vmem:[%s866_s8 + $0x18] sm:$0xff] %v207_v3  ;;  %v217_v8 = vld [vmem:[%s861_s7 + $0x100] sm:$0xff]  ;;  %v219_v9 = vld [vmem:[%s861_s7 + $0x108] sm:$0xff] }
  0x16   : > { %210 = vst [vmem:[%s866_s8 + $0x20] sm:$0xff] %v209_v4  ;;  %v221_v10 = vld [vmem:[%s861_s7 + $0x140] sm:$0xff]  ;;  %v223_v11 = vld [vmem:[%s861_s7 + $0x148] sm:$0xff] }
  0x17   : > { %212 = vst [vmem:[%s866_s8 + $0x28] sm:$0xff] %v211_v5  ;;  %v225_v12 = vld [vmem:[%s861_s7 + $0x180] sm:$0xff]  ;;  %v227_v13 = vld [vmem:[%s861_s7 + $0x188] sm:$0xff] }
  0x18   : > { %214 = vst [vmem:[%s866_s8 + $0x30] sm:$0xff] %v213_v6  ;;  %v229_v14 = vld [vmem:[%s861_s7 + $0x1c0] sm:$0xff]  ;;  %v231_v15 = vld [vmem:[%s861_s7 + $0x1c8] sm:$0xff] }
  0x19   : > { %216 = vst [vmem:[%s866_s8 + $0x38] sm:$0xff] %v215_v7  ;;  %v233_v16 = vld [vmem:[%s861_s7 + $0x200] sm:$0xff]  ;;  %v235_v17 = vld [vmem:[%s861_s7 + $0x208] sm:$0xff] }
  0x1a   : > { %218 = vst [vmem:[%s866_s8 + $0x40] sm:$0xff] %v217_v8 }
  0x1b   : > { %220 = vst [vmem:[%s866_s8 + $0x48] sm:$0xff] %v219_v9 }
  0x1c   : > { %222 = vst [vmem:[%s866_s8 + $0x50] sm:$0xff] %v221_v10 }
  0x1d   : > { %224 = vst [vmem:[%s866_s8 + $0x58] sm:$0xff] %v223_v11 }
  0x1e   : > { %226 = vst [vmem:[%s866_s8 + $0x60] sm:$0xff] %v225_v12 }
  0x1f   : > { %228 = vst [vmem:[%s866_s8 + $0x68] sm:$0xff] %v227_v13 }
  0x20   : > { %230 = vst [vmem:[%s866_s8 + $0x70] sm:$0xff] %v229_v14 }
  0x21   : > { %232 = vst [vmem:[%s866_s8 + $0x78] sm:$0xff] %v231_v15 }
  0x22   : > { %234 = vst [vmem:[%s866_s8 + $0x80] sm:$0xff] %v233_v16 }
  0x23   : > { %236 = vst [vmem:[%s866_s8 + $0x88] sm:$0xff] %v235_v17 }
  0x24 PF: > { %p721_p5 = scmp.ge.s32.totalorder %s791_s22, 1  ;;  %p241_p6 = scmp.lt.s32.totalorder %s791_s22, 5 }
  0x26   : > { %p242_p7 = pnand %p721_p5, %p241_p6 }
  0x27   : > { %s248_s30 = sand.u32 (!%p242_p7), 1, %s783_s20   ;;  %s574_s9 = sld [smem:[#allocation2]] (!%p242_p7) }
  0x28   : > { %245 = sbr.rel (%p242_p7) target bundleno = 359 (0x167), region = 59  ;;  %s722_s10 = sshll.u32 (!%p242_p7), %s715_s4, 2 }
  0x29   : > { %s732_s6 = smul.u32 (!%p242_p7), 144, %s248_s30  ;;  %p277_p8 = scmp.lt.s32.totalorder (!%p242_p7), %s722_s10, 15 }
  0x2b   : > { %s960_s7 = scalar_lea.vmem (!%p242_p7), [#allocation3], %s732_s6 }
  0x2d   : > { %v433_v18 = vld [vmem:[%s1027_s3 + $0x30] sm:$0xff]  ;;  %v345_v19 = vld [vmem:[%s1026_s2 + $0x40] sm:$0xff]  ;;  %v793_v21 = vmov 0   ;;  %v434_v22 = vld [vmem:[%s1027_s3 + $0x38] sm:$0xff]  ;;  %vm580_vm0 = vcmask 1043456   ;;  %vm576_vm1 = vcmask 588800  }
  0x2e   : > { %v343_v20 = vld [vmem:[%s1026_s2 + $0x30] sm:$0xff]  ;;  %760 = vset.pattern.permute.xlu2 %v793_v21  ;;  %759 = vset.pattern.permute.xlu1 %v793_v21  ;;  %v435_v23 = vld [vmem:[%s1027_s3 + $0x40] sm:$0xff]  ;;  %v344_v24 = vld [vmem:[%s1026_s2 + $0x38] sm:$0xff]  ;;  %s1034_s10 = smov (!%p277_p8, %s722_s10), 15 }
  0x2f   : > { %758 = vset.pattern.permute.xlu0 %v793_v21  ;;  %468 = vperm.xlu2 %760, %v433_v18   ;;  %v431_v25 = vld [vmem:[%s1027_s3 + $0x20] sm:$0xff]  ;;  %v342_v26 = vld [vmem:[%s1026_s2 + $0x28] sm:$0xff]  ;;  %v340_v28 = vld [vmem:[%s1026_s2 + $0x18] sm:$0xff]  ;;  %s723_s11 = sshll.u32 %s1034_s10, 3 }
  0x30   : > { %388 = vperm.xlu0 %758, %v345_v19   ;;  %378 = vperm.xlu1 %759, %v343_v20   ;;  %v341_v27 = vld [vmem:[%s1026_s2 + $0x20] sm:$0xff]  ;;  %v432_v29 = vld [vmem:[%s1027_s3 + $0x28] sm:$0xff]  ;;  %v339_v30 = vld [vmem:[%s1026_s2 + $0x10] sm:$0xff]  ;;  %s280_s14 = scalar_lea.vmem %s1029_s5, %s723_s11 }
  0x31   : > { %v337_v31 = vld [vmem:[%s1026_s2] sm:$0xff]  ;;  %v429_v32 = vld [vmem:[%s1027_s3 + $0x10] sm:$0xff]  ;;  %v430_v33 = vld [vmem:[%s1027_s3 + $0x18] sm:$0xff] }
  0x32   : > { %v428_v34 = vld [vmem:[%s1027_s3 + $0x8] sm:$0xff]  ;;  %v427_v35 = vld [vmem:[%s1027_s3] sm:$0xff] }
  0x33   : > { %v338_v36 = vld [vmem:[%s1026_s2 + $0x8] sm:$0xff]  ;;  %v295_v41 = vld [vmem:[%s960_s7 + $0x60] sm:$0xff]  ;;  %v297_v45 = vld [vmem:[%s960_s7 + $0x70] sm:$0xff] }
  0x34   : > { %v296_v42 = vld [vmem:[%s960_s7 + $0x68] sm:$0xff]  ;;  %v299_v43 = vld [vmem:[%s960_s7 + $0x80] sm:$0xff]  ;;  %v298_v46 = vld [vmem:[%s960_s7 + $0x78] sm:$0xff]  ;;  %v325_v47 = vunpack.c.l.bf16 %v295_v41  ;;  %v326_v48 = vunpack.c.h.bf16 %v295_v41  ;;  %v329_v57 = vunpack.c.l.bf16 %v297_v45  ;;  %v330_v58 = vunpack.c.h.bf16 %v297_v45 }
  0x35   : > { %v300_v44 = vld [vmem:[%s960_s7 + $0x88] sm:$0xff]  ;;  %v327_v49 = vunpack.c.l.bf16 %v296_v42  ;;  %v328_v50 = vunpack.c.h.bf16 %v296_v42  ;;  %v969_v51 = vld [vmem:[%s960_s7 + $0x40] sm:$0xff]  ;;  %v333_v53 = vunpack.c.l.bf16 %v299_v43  ;;  %v334_v54 = vunpack.c.h.bf16 %v299_v43 }
  0x36   : > { %v972_v52 = vld [vmem:[%s960_s7 + $0x48] sm:$0xff]  ;;  %v335_v55 = vunpack.c.l.bf16 %v300_v44  ;;  %v336_v56 = vunpack.c.h.bf16 %v300_v44  ;;  %v331_v59 = vunpack.c.l.bf16 %v298_v46  ;;  %v332_v60 = vunpack.c.h.bf16 %v298_v46 }
  0x37   : > { %473 = vperm.xlu2 %760, %v434_v22   ;;  %v317_v61 = vunpack.c.l.bf16 %v969_v51  ;;  %v318_v62 = vunpack.c.h.bf16 %v969_v51  ;;  %v319_v63 = vunpack.c.l.bf16 %v972_v52  ;;  %v289_v51 = vld [vmem:[%s960_s7 + $0x30] sm:$0xff] }
  0x38   : > { %478 = vperm.xlu0 %758, %v435_v23   ;;  %383 = vperm.xlu1 %759, %v344_v24  }
  0x3f   : > { %458 = vperm.xlu2 %760, %v431_v25  }
  0x40   : > { %373 = vperm.xlu1 %759, %v342_v26   ;;  %368 = vperm.xlu0 %758, %v341_v27  }
  0x47   : > { %363 = vperm.xlu2 %760, %v340_v28  }
  0x48   : > { %463 = vperm.xlu0 %758, %v432_v29   ;;  %358 = vperm.xlu1 %759, %v339_v30  }
  0x4f   : > { %348 = vperm.xlu2 %760, %v337_v31   ;;  %v293_v31 = vld [vmem:[%s960_s7 + $0x50] sm:$0xff] }
  0x50   : > { %448 = vperm.xlu0 %758, %v429_v32   ;;  %453 = vperm.xlu1 %759, %v430_v33  }
  0x57   : > { %443 = vperm.xlu2 %760, %v428_v34  }
  0x58   : > { %438 = vperm.xlu1 %759, %v427_v35   ;;  %353 = vperm.xlu0 %758, %v338_v36   ;;  %v320_v36 = vunpack.c.h.bf16 %v972_v52 }
  0x89   : > { %v957_v37 = vpop.permute.xlu2 %468 }
  0x91   : > { %v474_v38 = vpop.permute.xlu2 %473 }
  0x99   : > { %v977_v10 = vpop.permute.xlu2 %458 }
  0xa2   : > { %v389_v39 = vpop.permute.xlu0 %388  ;;  %v379_v40 = vpop.permute.xlu1 %378 }
  0xa3   : > { %v415_v0 = vmul.f32 %v379_v40, %v325_v47  ;;  %v416_v1 = vmul.f32 %v379_v40, %v326_v48  ;;  %v417_v2 = vmul.f32 %v379_v40, %v327_v49  ;;  %v418_v3 = vmul.f32 %v379_v40, %v328_v50  ;;  %v294_v47 = vld [vmem:[%s960_s7 + $0x58] sm:$0xff] }
  0xa4   : > { %v423_v6 = vmul.f32 %v389_v39, %v333_v53  ;;  %v424_v7 = vmul.f32 %v389_v39, %v334_v54  ;;  %v425_v8 = vmul.f32 %v389_v39, %v335_v55  ;;  %v426_v9 = vmul.f32 %v389_v39, %v336_v56  ;;  %v364_v55 = vpop.permute.xlu2 %363  ;;  %v290_v56 = vld [vmem:[%s960_s7 + $0x38] sm:$0xff] }
  0xa5   : > { %v505_v19 = vadd.f32 %v957_v37, %v415_v0  ;;  %v506_v21 = vadd.f32 %v957_v37, %v416_v1  ;;  %v507_v28 = vadd.f32 %v957_v37, %v417_v2  ;;  %v508_v41 = vadd.f32 %v957_v37, %v418_v3 }
  0xa6   : > { %v321_v48 = vunpack.c.l.bf16 %v293_v31  ;;  %v322_v0 = vunpack.c.h.bf16 %v293_v31  ;;  %v323_v1 = vunpack.c.l.bf16 %v294_v47  ;;  %v324_v2 = vunpack.c.h.bf16 %v294_v47 }
  0xa7   : > { %v541_v39 = vmax.f32 %v505_v19, 0.0  ;;  %v542_v53 = vmax.f32 %v506_v21, 0.0  ;;  %v543_v54 = vmax.f32 %v507_v28, 0.0 }
  0xaa   : > { %v479_v4 = vpop.permute.xlu0 %478  ;;  %v384_v5 = vpop.permute.xlu1 %383 }
  0xab   : > { %v419_v11 = vmul.f32 %v384_v5, %v329_v57  ;;  %v420_v12 = vmul.f32 %v384_v5, %v330_v58  ;;  %v421_v13 = vmul.f32 %v384_v5, %v331_v59  ;;  %v422_v14 = vmul.f32 %v384_v5, %v332_v60 }
  0xac   : > { %v513_v15 = vadd.f32 %v479_v4, %v423_v6  ;;  %v514_v16 = vadd.f32 %v479_v4, %v424_v7  ;;  %v515_v17 = vadd.f32 %v479_v4, %v425_v8  ;;  %v516_v18 = vadd.f32 %v479_v4, %v426_v9  ;;  %v288_v9 = vld [vmem:[%s960_s7 + $0x28] sm:$0xff] }
  0xad   : > { %v509_v20 = vadd.f32 %v474_v38, %v419_v11  ;;  %v510_v22 = vadd.f32 %v474_v38, %v420_v12  ;;  %v511_v29 = vadd.f32 %v474_v38, %v421_v13  ;;  %v512_v30 = vadd.f32 %v474_v38, %v422_v14 }
  0xae   : > { %v549_v23 = vmax.f32 %v513_v15, 0.0  ;;  %v550_v24 = vmax.f32 %v514_v16, 0.0  ;;  %v551_v25 = vmax.f32 %v515_v17, 0.0  ;;  %v552_v26 = vmax.f32 %v516_v18, 0.0 }
  0xaf   : > { %v545_v27 = vmax.f32 %v509_v20, 0.0  ;;  %v546_v40 = vmax.f32 %v510_v22, 0.0  ;;  %v547_v49 = vmax.f32 %v511_v29, 0.0  ;;  %v548_v50 = vmax.f32 %v512_v30, 0.0 }
  0xb0   : > { %v570_v32 = vpack.c.bf16 %v549_v23, %v549_v23  ;;  %v571_v33 = vpack.c.bf16 %v550_v24, %v550_v24  ;;  %v572_v34 = vpack.c.bf16 %v551_v25, %v551_v25  ;;  %v573_v35 = vpack.c.bf16 %v552_v26, %v552_v26 }
  0xb1   : > { %v566_v37 = vpack.c.bf16 %v545_v27, %v541_v39  ;;  %v544_v60 = vmax.f32 %v508_v41, 0.0  ;;  %v567_v3 = vpack.c.bf16 %v546_v40, %v542_v53  ;;  %v313_v4 = vunpack.c.l.bf16 %v289_v51  ;;  %v349_v41 = vpop.permute.xlu2 %348 }
  0xb2   : > { %v374_v42 = vpop.permute.xlu1 %373  ;;  %v369_v43 = vpop.permute.xlu0 %368  ;;  %v582_v44 = vsel %vm580_vm0, %v570_v32, 0  ;;  %v585_v38 = vsel %vm580_vm0, %v571_v33, 0  ;;  %v588_v45 = vsel %vm580_vm0, %v572_v34, 0  ;;  %v591_v46 = vsel %vm580_vm0, %v573_v35, 0 }
  0xb3   : > { %596 = vmatpush.bf16.msra.mxu0 %v582_v44  ;;  %v407_v52 = vmul.f32 %v369_v43, %v317_v61  ;;  %609 = vmatpush.bf16.msra.mxu1 %v585_v38  ;;  %v408_v57 = vmul.f32 %v369_v43, %v318_v62  ;;  %v409_v58 = vmul.f32 %v369_v43, %v319_v63  ;;  %v993_v61 = vld [vmem:[%s960_s7] sm:$0xff]  ;;  %v314_v7 = vunpack.c.h.bf16 %v289_v51 }
  0xb4   : > { %v410_v59 = vmul.f32 %v369_v43, %v320_v36  ;;  %622 = vmatpush.bf16.msra.mxu2 %v588_v45  ;;  %635 = vmatpush.bf16.msra.mxu3 %v591_v46  ;;  %v568_v5 = vpack.c.bf16 %v547_v49, %v543_v54  ;;  %v569_v6 = vpack.c.bf16 %v548_v50, %v544_v60  ;;  %v315_v8 = vunpack.c.l.bf16 %v290_v56  ;;  %v287_v63 = vld [vmem:[%s960_s7 + $0x20] sm:$0xff] }
  0xb5   : > { %v316_v62 = vunpack.c.h.bf16 %v290_v56  ;;  %v497_v11 = vadd.f32 %v977_v10, %v407_v52  ;;  %v498_v12 = vadd.f32 %v977_v10, %v408_v57  ;;  %v499_v13 = vadd.f32 %v977_v10, %v409_v58 }
  0xb6   : > { %v500_v14 = vadd.f32 %v977_v10, %v410_v59  ;;  %v301_v15 = vunpack.c.l.bf16 %v993_v61  ;;  %v411_v16 = vmul.f32 %v374_v42, %v321_v48  ;;  %v412_v17 = vmul.f32 %v374_v42, %v322_v0 }
  0xb7   : > { %597 = vmatpush.bf16.msra.mxu0 %v566_v37  ;;  %610 = vmatpush.bf16.msra.mxu1 %v567_v3  ;;  %v413_v18 = vmul.f32 %v374_v42, %v323_v1  ;;  %v414_v19 = vmul.f32 %v374_v42, %v324_v2  ;;  %v309_v22 = vunpack.c.l.bf16 %v287_v63  ;;  %v310_v23 = vunpack.c.h.bf16 %v287_v63  ;;  %v284_v42 = vld [vmem:[%s960_s7 + $0x8] sm:$0xff]  ;;  %v285_v3 = vld [vmem:[%s960_s7 + $0x10] sm:$0xff] }
  0xb8   : > { %623 = vmatpush.bf16.msra.mxu2 %v568_v5  ;;  %636 = vmatpush.bf16.msra.mxu3 %v569_v6  ;;  %v311_v24 = vunpack.c.l.bf16 %v288_v9  ;;  %v312_v25 = vunpack.c.h.bf16 %v288_v9  ;;  %v533_v30 = vmax.f32 %v497_v11, 0.0  ;;  %v534_v31 = vmax.f32 %v498_v12, 0.0 }
  0xb9   : > { %v535_v10 = vmax.f32 %v499_v13, 0.0  ;;  %v536_v32 = vmax.f32 %v500_v14, 0.0  ;;  %v403_v39 = vmul.f32 %v364_v55, %v313_v4  ;;  %v404_v40 = vmul.f32 %v364_v55, %v314_v7  ;;  %v286_v7 = vld [vmem:[%s960_s7 + $0x18] sm:$0xff] }
  0xba   : > { %v464_v20 = vpop.permute.xlu0 %463  ;;  %v359_v21 = vpop.permute.xlu1 %358  ;;  %v302_v43 = vunpack.c.h.bf16 %v993_v61  ;;  %v405_v47 = vmul.f32 %v364_v55, %v315_v8  ;;  %v406_v48 = vmul.f32 %v364_v55, %v316_v62  ;;  %v303_v54 = vunpack.c.l.bf16 %v284_v42 }
  0xbb   : > { %v501_v26 = vadd.f32 %v464_v20, %v411_v16  ;;  %v502_v27 = vadd.f32 %v464_v20, %v412_v17  ;;  %v503_v28 = vadd.f32 %v464_v20, %v413_v18  ;;  %v504_v29 = vadd.f32 %v464_v20, %v414_v19 }
  0xbc   : > { %v399_v49 = vmul.f32 %v359_v21, %v309_v22  ;;  %v400_v50 = vmul.f32 %v359_v21, %v310_v23  ;;  %v401_v51 = vmul.f32 %v359_v21, %v311_v24  ;;  %v402_v52 = vmul.f32 %v359_v21, %v312_v25 }
  0xbd   : > { %v537_v33 = vmax.f32 %v501_v26, 0.0  ;;  %v538_v34 = vmax.f32 %v502_v27, 0.0  ;;  %v539_v35 = vmax.f32 %v503_v28, 0.0  ;;  %v540_v36 = vmax.f32 %v504_v29, 0.0 }
  0xbe   : > { %v391_v56 = vmul.f32 %v349_v41, %v301_v15  ;;  %v304_v60 = vunpack.c.h.bf16 %v284_v42  ;;  %v305_v13 = vunpack.c.l.bf16 %v285_v3  ;;  %v306_v14 = vunpack.c.h.bf16 %v285_v3 }
  0xbf   : > { %v562_v44 = vpack.c.bf16 %v537_v33, %v533_v30  ;;  %v563_v38 = vpack.c.bf16 %v538_v34, %v534_v31  ;;  %v564_v45 = vpack.c.bf16 %v539_v35, %v535_v10  ;;  %v565_v46 = vpack.c.bf16 %v540_v36, %v536_v32  ;;  %v444_v32 = vpop.permute.xlu2 %443 }
  0xc0   : > { %v307_v17 = vunpack.c.l.bf16 %v286_v7  ;;  %v308_v18 = vunpack.c.h.bf16 %v286_v7  ;;  %v392_v20 = vmul.f32 %v349_v41, %v302_v43  ;;  %v393_v21 = vmul.f32 %v349_v41, %v303_v54 }
  0xc1   : > { %598 = vmatpush.bf16.msra.mxu0 %v562_v44  ;;  %611 = vmatpush.bf16.msra.mxu1 %v563_v38  ;;  %v394_v22 = vmul.f32 %v349_v41, %v304_v60 }
  0xc2   : > { %v449_v37 = vpop.permute.xlu0 %448  ;;  %v454_v53 = vpop.permute.xlu1 %453  ;;  %624 = vmatpush.bf16.msra.mxu2 %v564_v45  ;;  %637 = vmatpush.bf16.msra.mxu3 %v565_v46 }
  0xc3   : > { %v489_v57 = vadd.f32 %v449_v37, %v399_v49  ;;  %v493_v58 = vadd.f32 %v454_v53, %v403_v39  ;;  %v490_v59 = vadd.f32 %v449_v37, %v400_v50  ;;  %v494_v0 = vadd.f32 %v454_v53, %v404_v40  ;;  %v553_v50 = vld [vmem:[%s1024_s0] sm:$0xf] }
  0xc4   : > { %v491_v55 = vadd.f32 %v449_v37, %v401_v51  ;;  %v495_v1 = vadd.f32 %v454_v53, %v405_v47  ;;  %v492_v2 = vadd.f32 %v449_v37, %v402_v52  ;;  %v496_v6 = vadd.f32 %v454_v53, %v406_v48 }
  0xc5   : > { %v525_v61 = vmax.f32 %v489_v57, 0.0  ;;  %v529_v4 = vmax.f32 %v493_v58, 0.0  ;;  %v526_v5 = vmax.f32 %v490_v59, 0.0  ;;  %v530_v8 = vmax.f32 %v494_v0, 0.0 }
  0xc6   : > { %v527_v62 = vmax.f32 %v491_v55, 0.0  ;;  %v531_v63 = vmax.f32 %v495_v1, 0.0  ;;  %v528_v9 = vmax.f32 %v492_v2, 0.0  ;;  %v532_v12 = vmax.f32 %v496_v6, 0.0 }
  0xc7   : > { %v558_v11 = vpack.c.bf16 %v529_v4, %v525_v61  ;;  %v559_v15 = vpack.c.bf16 %v530_v8, %v526_v5  ;;  %v575_v51 = vstv %s574_s9 }
  0xc8   : > { %v560_v16 = vpack.c.bf16 %v531_v63, %v527_v62  ;;  %v561_v19 = vpack.c.bf16 %v532_v12, %v528_v9 }
  0xc9   : > { %599 = vmatpush.bf16.msra.mxu0 %v558_v11  ;;  %612 = vmatpush.bf16.msra.mxu1 %v559_v15 }
  0xca   : > { %625 = vmatpush.bf16.msra.mxu2 %v560_v16  ;;  %v439_v23 = vpop.permute.xlu1 %438  ;;  %v354_v24 = vpop.permute.xlu0 %353  ;;  %638 = vmatpush.bf16.msra.mxu3 %v561_v19 }
  0xcb   : > { %v481_v25 = vadd.f32 %v439_v23, %v391_v56  ;;  %v482_v26 = vadd.f32 %v439_v23, %v392_v20  ;;  %v483_v27 = vadd.f32 %v439_v23, %v393_v21  ;;  %v484_v28 = vadd.f32 %v439_v23, %v394_v22 }
  0xcc   : > { %v395_v29 = vmul.f32 %v354_v24, %v305_v13  ;;  %v396_v30 = vmul.f32 %v354_v24, %v306_v14  ;;  %v397_v31 = vmul.f32 %v354_v24, %v307_v17  ;;  %v398_v10 = vmul.f32 %v354_v24, %v308_v18 }
  0xcd   : > { %v517_v39 = vmax.f32 %v481_v25, 0.0  ;;  %v518_v40 = vmax.f32 %v482_v26, 0.0  ;;  %v519_v41 = vmax.f32 %v483_v27, 0.0  ;;  %v520_v42 = vmax.f32 %v484_v28, 0.0 }
  0xce   : > { %v485_v33 = vadd.f32 %v444_v32, %v395_v29  ;;  %v486_v34 = vadd.f32 %v444_v32, %v396_v30  ;;  %v487_v35 = vadd.f32 %v444_v32, %v397_v31  ;;  %v488_v36 = vadd.f32 %v444_v32, %v398_v10 }
  0xd0   : > { %v521_v43 = vmax.f32 %v485_v33, 0.0  ;;  %v522_v44 = vmax.f32 %v486_v34, 0.0  ;;  %v523_v38 = vmax.f32 %v487_v35, 0.0  ;;  %v524_v45 = vmax.f32 %v488_v36, 0.0 }
  0xd2   : > { %v554_v46 = vpack.c.bf16 %v521_v43, %v517_v39  ;;  %v555_v47 = vpack.c.bf16 %v522_v44, %v518_v40  ;;  %v556_v48 = vpack.c.bf16 %v523_v38, %v519_v41  ;;  %v557_v49 = vpack.c.bf16 %v524_v45, %v520_v42 }
  0xd4   : > { %600 = vmatpush.bf16.msra.mxu0 %v554_v46  ;;  %613 = vmatpush.bf16.msra.mxu1 %v555_v47 }
  0xd5   : > { %626 = vmatpush.bf16.msra.mxu2 %v556_v48  ;;  %639 = vmatpush.bf16.msra.mxu3 %v557_v49 }
  0xd7   : > { %724 = vmatmul.msk.bf16.vlgmr.msra.gmra.mxu0 %vm576_vm1, %v553_v50  ;;  %725 = vmatmul.msk.bf16.vlgmr.msra.gmra.mxu1 %vm576_vm1, %v553_v50 }
  0xd8   : > { %726 = vmatmul.msk.bf16.vlgmr.msra.gmra.mxu2 %vm576_vm1, %v553_v50  ;;  %727 = vmatmul.msk.bf16.vlgmr.msra.gmra.mxu3 %vm576_vm1, %v553_v50 }
 0x154   : > { %v602_v52 = vpop.f32.mrf.mxu0  ;;  %v615_v37 = vpop.f32.mrf.mxu1 }
 0x155   : > { %v603_v53 = vadd.f32 %v602_v52, %v575_v51  ;;  %v616_v54 = vadd.f32 %v615_v37, %v575_v51 }
 0x157   : > { %761 = vtanh.f32 %v603_v53 }
 0x158   : > { %763 = vtanh.f32 %v616_v54 }
 0x15b   : > { %v628_v56 = vpop.f32.mrf.mxu2  ;;  %v641_v57 = vpop.f32.mrf.mxu3 }
 0x15c   : > { %v629_v58 = vadd.f32 %v628_v56, %v575_v51  ;;  %v642_v59 = vadd.f32 %v641_v57, %v575_v51  ;;  %v604_v60 = vpop.f32.mrf.mxu0  ;;  %v617_v0 = vpop.f32.mrf.mxu1 }
 0x15d   : > { %v762_v55 = vpop.eup %761 }
 0x15e   : > { %v764_v1 = vpop.eup %763  ;;  %649 = vst [vmem:[%s280_s14] sm:$0xff] %v762_v55  ;;  %765 = vtanh.f32 %v629_v58 }
 0x15f   : > { %650 = vst [vmem:[%s280_s14 + $0x8] sm:$0xff] %v764_v1  ;;  %767 = vtanh.f32 %v642_v59 }
 0x163   : > { %v630_v2 = vpop.f32.mrf.mxu2  ;;  %v643_v3 = vpop.f32.mrf.mxu3 }
 0x164   : > { %v766_v61 = vpop.eup %765 }
 0x165   : > { %v768_v4 = vpop.eup %767  ;;  %651 = vst [vmem:[%s280_s14 + $0x10] sm:$0xff] %v766_v61 }
 0x166   : > { %652 = vst [vmem:[%s280_s14 + $0x18] sm:$0xff] %v768_v4 }
 0x167 PF: > { %p13_p9 = scmp.ge.s32.totalorder %s844_s23, 6   ;;  %s1030_s20 = smov %s787_s21 }
 0x168   : > { %s1031_s21 = smov %s853_s26  ;;  %s1032_s22 = smov %s844_s23 }
 0x169   :  { %15 = sbr.rel (!%p13_p9) target bundleno = 4 (0x4), region = 98 }

</bundles_post_ra>
